<compile_context>
chip_gen: v6e
topology: v6e:2x2x1
jax: 0.10.0
libtpu: 0.0.40
codegen_flags: <defaults>
</compile_context>

<pallas_src>
import math

import jax
import jax.numpy as jnp
from jax import lax
from jax.experimental import pallas as pl
from jax.experimental.pallas import tpu as pltpu


def _round_up(x, m):
    return ((x + m - 1) // m) * m


# ----------------------------------------------------------------------------
# Pallas kernels
# ----------------------------------------------------------------------------
def _lstm_kernel(x_ref, wih_ref, whh_ref, b_ref, out_ref, hfin_ref,
                 g_scr, h_scr, c_scr):
    """One grid step = one (direction d, time-block i) tile.

    x_ref:    (Tt, Bp, Cin)  input block (time-block already reversed for
                             d == 1 via the index_map)
    wih_ref:  (Cin, 4Hp)     input->gates weight for direction d (transposed)
    whh_ref:  (Hp, 4Hp)      hidden->gates weight for direction d
    b_ref:    (1, 4Hp)       combined bias b_ih + b_hh for direction d
    out_ref:  (Tt, Bp, Hp)   per-step hidden outputs for this tile/direction
    hfin_ref: (Bp, Hp)       final hidden for direction d
    g_scr:    (Tt, Bp, 4Hp)  precomputed input projection for this block
    h_scr/c_scr: (Bp, Hp)    recurrent state, carried across time blocks
    """
    d = pl.program_id(0)
    tt, bp, cin = x_ref.shape
    hp = h_scr.shape[1]

    @pl.when(pl.program_id(1) == 0)
    def _():
        h_scr[...] = jnp.zeros_like(h_scr)
        c_scr[...] = jnp.zeros_like(c_scr)

    # Prologue: hoist the input projection (and the bias broadcast) off the
    # serial recurrence -- one large MXU matmul per time block.
    x_blk = x_ref[...].reshape(tt * bp, cin)
    g_scr[...] = (jnp.dot(x_blk, wih_ref[...],
                          preferred_element_type=jnp.float32)
                  + b_ref[...]).reshape(tt, bp, 4 * hp)

    def step(t, carry):
        # Local time index; the backward direction walks the block in reverse.
        lt = (1 - d) * t + d * (tt - 1 - t)
        gates = g_scr[lt] + jnp.dot(h_scr[...], whh_ref[...],
                                    preferred_element_type=jnp.float32)
        # Lane-aligned gate slices (each gate occupies a full Hp lane block).
        i_g = jax.nn.sigmoid(gates[:, 0 * hp:1 * hp])
        f_g = jax.nn.sigmoid(gates[:, 1 * hp:2 * hp])
        g_g = jnp.tanh(gates[:, 2 * hp:3 * hp])
        o_g = jax.nn.sigmoid(gates[:, 3 * hp:4 * hp])
        c_new = f_g * c_scr[...] + i_g * g_g
        h_new = o_g * jnp.tanh(c_new)
        c_scr[...] = c_new
        h_scr[...] = h_new
        out_ref[lt] = h_new.astype(out_ref.dtype)
        return carry

    lax.fori_loop(0, tt, step, 0, unroll=min(tt, 8))
    hfin_ref[...] = h_scr[...].astype(hfin_ref.dtype)


def _pick_time_block(seq_len, bp, cin, hp, budget_bytes=24 * 1024 * 1024):
    """Largest divisor of seq_len whose VMEM working set fits the budget."""
    fixed = 4 * (2 * (cin * 4 * hp + hp * 4 * hp + 4 * hp) + 4 * bp * hp)
    per_t = 4 * bp * (2 * cin + 2 * hp + 4 * hp)   # x, out (x2 buf) + g_scr
    tt = max(1, min(seq_len, (budget_bytes - fixed) // per_t))
    while seq_len % tt:
        tt -= 1
    return int(tt)


def lstm_layer(x, wih_s, whh_s, b_s):
    """One (optionally bidirectional) LSTM layer.

    x:     (T, Bp, Cin) f32 (Cin lane-padded)
    wih_s: (D, Cin, 4Hp), whh_s: (D, Hp, 4Hp), b_s: (D, 1, 4Hp)
    Returns (out_seq (T, Bp, D*Hp), h_fin (Bp, D*Hp)); direction d's hidden
    occupies lanes [d*Hp, (d+1)*Hp).
    """
    seq_len, bp, cin = x.shape
    num_dir = whh_s.shape[0]
    hp = whh_s.shape[1]
    tt = _pick_time_block(seq_len, bp, cin, hp)
    tb = seq_len // tt

    def tmap(d, i):
        # Forward walks time blocks 0..tb-1, backward walks them in reverse
        # (reversal done here instead of an HBM [::-1] copy).
        return (1 - d) * i + d * (tb - 1 - i)

    return pl.pallas_call(
        _lstm_kernel,
        grid=(num_dir, tb),
        out_shape=(jax.ShapeDtypeStruct((seq_len, bp, num_dir * hp),
                                        jnp.float32),
                   jax.ShapeDtypeStruct((bp, num_dir * hp), jnp.float32)),
        in_specs=[
            pl.BlockSpec((tt, bp, cin), lambda d, i: (tmap(d, i), 0, 0)),
            pl.BlockSpec((None, cin, 4 * hp), lambda d, i: (d, 0, 0)),
            pl.BlockSpec((None, hp, 4 * hp), lambda d, i: (d, 0, 0)),
            pl.BlockSpec((None, 1, 4 * hp), lambda d, i: (d, 0, 0)),
        ],
        out_specs=(
            # Both directions write directly into one (T, Bp, D*Hp) buffer at
            # 128-aligned lane offsets -> no concatenate between layers.
            pl.BlockSpec((tt, bp, hp), lambda d, i: (tmap(d, i), 0, d)),
            pl.BlockSpec((bp, hp), lambda d, i: (0, d)),
        ),
        scratch_shapes=[
            pltpu.VMEM((tt, bp, 4 * hp), jnp.float32),   # x @ Wih + b block
            pltpu.VMEM((bp, hp), jnp.float32),           # h state
            pltpu.VMEM((bp, hp), jnp.float32),           # c state
        ],
        compiler_params=pltpu.CompilerParams(
            dimension_semantics=("parallel", "arbitrary"),
            vmem_limit_bytes=48 * 1024 * 1024),
    )(x, wih_s, whh_s, b_s)


def _linear_kernel(x_ref, w_ref, b_ref, o_ref):
    o_ref[...] = (jnp.dot(x_ref[...], w_ref[...],
                          preferred_element_type=jnp.float32)
                  + b_ref[...]).astype(o_ref.dtype)


def linear(x, w_t, b):
    """x: (Bp, D_in), w_t: (D_in, D_out), b: (1, D_out) -> (Bp, D_out)."""
    vmem = pl.BlockSpec(memory_space=pltpu.MemorySpace.VMEM)
    return pl.pallas_call(
        _linear_kernel,
        out_shape=jax.ShapeDtypeStruct((x.shape[0], w_t.shape[1]),
                                       jnp.float32),
        in_specs=[vmem, vmem, vmem],
        out_specs=vmem,
    )(x, w_t, b)


# ----------------------------------------------------------------------------
# Parameter init (deterministic, synthetic), stored in padded layout
# ----------------------------------------------------------------------------
def _pad_cols_gate_aligned(w, h, hp):
    """(rows, 4h) -> (rows, 4hp); each gate's h real cols land lane-aligned."""
    out = jnp.zeros((w.shape[0], 4 * hp), w.dtype)
    for g in range(4):
        out = out.at[:, g * hp:g * hp + h].set(w[:, g * h:(g + 1) * h])
    return out


def _pad_rows_chunked(w, chunk_real, chunk_pad, n_chunks):
    """(n_chunks*chunk_real, cols) -> (n_chunks*chunk_pad, cols), zero pad."""
    out = jnp.zeros((n_chunks * chunk_pad, w.shape[1]), w.dtype)
    for c in range(n_chunks):
        out = out.at[c * chunk_pad:c * chunk_pad + chunk_real].set(
            w[c * chunk_real:(c + 1) * chunk_real])
    return out


def init_params(key, vocab_size, embedding_dim, hidden_dim, output_dim,
                n_layers, bidirectional):
    num_dir = 2 if bidirectional else 1
    ep = _round_up(embedding_dim, 128)
    hp = _round_up(hidden_dim, 128)
    k = 1.0 / math.sqrt(hidden_dim)

    params = {"n_layers": n_layers, "num_dir": num_dir,
              "hidden_dim": hidden_dim, "hidden_pad": hp}

    emb = jax.random.normal(jax.random.fold_in(key, 0),
                            (vocab_size, embedding_dim), jnp.float32)
    params["embedding"] = jnp.pad(emb, ((0, 0), (0, ep - embedding_dim)))

    lstm = []
    idx = 1
    for layer in range(n_layers):
        if layer == 0:
            in_real, in_chunk, in_chunk_pad, n_chunks = (
                embedding_dim, embedding_dim, ep, 1)
        else:
            in_real = hidden_dim * num_dir
            in_chunk, in_chunk_pad, n_chunks = hidden_dim, hp, num_dir
        wih_l, whh_l, b_l = [], [], []
        for _ in range(num_dir):
            kw1 = jax.random.fold_in(key, idx); idx += 1
            kw2 = jax.random.fold_in(key, idx); idx += 1
            kb1 = jax.random.fold_in(key, idx); idx += 1
            kb2 = jax.random.fold_in(key, idx); idx += 1
            wih_t = jax.random.uniform(kw1, (in_real, 4 * hidden_dim),
                                       jnp.float32, -k, k)
            whh_t = jax.random.uniform(kw2, (hidden_dim, 4 * hidden_dim),
                                       jnp.float32, -k, k)
            b_ih = jax.random.uniform(kb1, (4 * hidden_dim,), jnp.float32,
                                      -k, k)
            b_hh = jax.random.uniform(kb2, (4 * hidden_dim,), jnp.float32,
                                      -k, k)
            wih_l.append(_pad_rows_chunked(
                _pad_cols_gate_aligned(wih_t, hidden_dim, hp),
                in_chunk, in_chunk_pad, n_chunks))
            whh_l.append(_pad_rows_chunked(
                _pad_cols_gate_aligned(whh_t, hidden_dim, hp),
                hidden_dim, hp, 1))
            b_l.append(_pad_cols_gate_aligned(
                (b_ih + b_hh).reshape(1, 4 * hidden_dim), hidden_dim, hp))
        lstm.append((jnp.stack(wih_l), jnp.stack(whh_l), jnp.stack(b_l)))
    params["lstm"] = lstm

    fc_in_real = hidden_dim * num_dir
    kfc = 1.0 / math.sqrt(fc_in_real)
    fc_w = jax.random.uniform(jax.random.fold_in(key, idx),
                              (fc_in_real, output_dim), jnp.float32,
                              -kfc, kfc)
    params["fc_w"] = _pad_rows_chunked(fc_w, hidden_dim, hp, num_dir)
    params["fc_b"] = jax.random.uniform(jax.random.fold_in(key, idx + 1),
                                        (1, output_dim), jnp.float32,
                                        -kfc, kfc)
    return params


# ----------------------------------------------------------------------------
# Forward pass (matches RNN.forward in eval mode)
# ----------------------------------------------------------------------------
def rnn_forward(text, params):
    """text: (T, B) int32 -> logits (B, output_dim)."""
    _, batch = text.shape
    bp = _round_up(max(batch, 8), 8)
    if bp != batch:
        # Pad the batch to the f32 sublane granularity; padded rows are
        # independent and sliced off before returning.
        text = jnp.pad(text, ((0, 0), (0, bp - batch)))

    # TODO(synk): embedding gather kept in plain JAX (data-dependent gather;
    # fusing it needs scalar-prefetched token ids + pl.Element BlockSpec).
    x = params["embedding"][text].astype(jnp.float32)      # (T, Bp, Ep)
    # TODO(synk): nn.Dropout is identity here (eval mode / p effectively 0).

    h_fin = None
    for layer in range(params["n_layers"]):
        wih_s, whh_s, b_s = params["lstm"][layer]
        x, h_fin = lstm_layer(x, wih_s, whh_s, b_s)
    # h_fin = [last-layer fwd final | last-layer bwd final] along lanes,
    # i.e. torch.cat((hidden[-2], hidden[-1]), dim=1) in padded layout.
    logits = linear(h_fin, params["fc_w"], params["fc_b"])
    return logits[:batch]


# ----------------------------------------------------------------------------
if __name__ == "__main__":
    VOCAB_SIZE = 20
    EMBEDDING_DIM = 16
    HIDDEN_DIM = 32
    OUTPUT_DIM = 5
    N_LAYERS = 2
    BIDIRECTIONAL = True
    SEQ_LEN = 8
    BATCH = 2

    key = jax.random.PRNGKey(0)
    params = init_params(key, VOCAB_SIZE, EMBEDDING_DIM, HIDDEN_DIM,
                         OUTPUT_DIM, N_LAYERS, BIDIRECTIONAL)
    text = jax.random.randint(jax.random.fold_in(key, 999),
                              (SEQ_LEN, BATCH), 0, VOCAB_SIZE,
                              dtype=jnp.int32)

    logits = rnn_forward(text, params)
    jax.block_until_ready(logits)
    assert logits.shape == (BATCH, OUTPUT_DIM)
    assert bool(jnp.all(jnp.isfinite(logits)))
    print("KERNEL_OK")
</pallas_src>

<mosaic_0001>
module attributes {stable_mosaic.version = 11 : i64} {
  func.func @_lstm_kernel(%arg0: i32, %arg1: i32, %arg2: memref<8x8x128xf32, #tpu.memory_space<vmem>>, %arg3: memref<1x128x512xf32, #tpu.memory_space<vmem>>, %arg4: memref<1x128x512xf32, #tpu.memory_space<vmem>>, %arg5: memref<1x1x512xf32, #tpu.memory_space<vmem>>, %arg6: memref<8x8x128xf32, #tpu.memory_space<vmem>>, %arg7: memref<8x128xf32, #tpu.memory_space<vmem>>, %arg8: memref<8x8x512xf32, #tpu.memory_space<vmem>>, %arg9: memref<8x128xf32, #tpu.memory_space<vmem>>, %arg10: memref<8x128xf32, #tpu.memory_space<vmem>>) attributes {dimension_semantics = [#tpu.dimension_semantics<parallel>, #tpu.dimension_semantics<arbitrary>], iteration_bounds = array<i64: 2, 1>, scalar_prefetch = 0 : i64, scratch_operands = 3 : i64, tpu.core_type = #tpu.core_type<tc>, window_params = [{transform_indices = @transform_0, window_bounds = array<i64: 8, 8, 128>}, {transform_indices = @transform_1, window_bounds = array<i64: 1, 128, 512>}, {transform_indices = @transform_2, window_bounds = array<i64: 1, 128, 512>}, {transform_indices = @transform_3, window_bounds = array<i64: 1, 1, 512>}, {transform_indices = @transform_4, window_bounds = array<i64: 8, 8, 128>}, {transform_indices = @transform_5, window_bounds = array<i64: 8, 128>}]} {
    %c0_i32 = arith.constant 0 : i32
    %0 = arith.cmpi eq, %arg1, %c0_i32 : i32
    %1 = arith.extui %0 : i1 to i32
    %c0_i32_0 = arith.constant 0 : i32
    %2 = arith.cmpi ne, %1, %c0_i32_0 : i32
    scf.if %2 {
      %cst_185 = arith.constant 0.000000e+00 : f32
      %376 = vector.broadcast %cst_185 : f32 to vector<8x128xf32>
      %c0_186 = arith.constant 0 : index
      %c0_187 = arith.constant 0 : index
      %377 = vector.load %arg9[%c0_186, %c0_187] : memref<8x128xf32, #tpu.memory_space<vmem>>, vector<8x128xf32>
      tpu.vector_store %arg9[%c0_186, %c0_187], %376 {strides = array<i32>} : memref<8x128xf32, #tpu.memory_space<vmem>>, vector<8x128xf32>,
      %cst_188 = arith.constant 0.000000e+00 : f32
      %378 = vector.broadcast %cst_188 : f32 to vector<8x128xf32>
      %c0_189 = arith.constant 0 : index
      %c0_190 = arith.constant 0 : index
      %379 = vector.load %arg10[%c0_189, %c0_190] : memref<8x128xf32, #tpu.memory_space<vmem>>, vector<8x128xf32>
      tpu.vector_store %arg10[%c0_189, %c0_190], %378 {strides = array<i32>} : memref<8x128xf32, #tpu.memory_space<vmem>>, vector<8x128xf32>,
    } else {
    }
    %c0 = arith.constant 0 : index
    %c0_1 = arith.constant 0 : index
    %c0_2 = arith.constant 0 : index
    %3 = vector.load %arg2[%c0, %c0_1, %c0_2] : memref<8x8x128xf32, #tpu.memory_space<vmem>>, vector<8x8x128xf32>
    %4 = vector.shape_cast %3 : vector<8x8x128xf32> to vector<64x128xf32>
    %c0_3 = arith.constant 0 : index
    %c0_4 = arith.constant 0 : index
    %c0_5 = arith.constant 0 : index
    %5 = vector.load %arg3[%c0_3, %c0_4, %c0_5] : memref<1x128x512xf32, #tpu.memory_space<vmem>>, vector<1x128x512xf32>
    %6 = vector.shape_cast %5 : vector<1x128x512xf32> to vector<128x512xf32>
    %cst = arith.constant dense<0.000000e+00> : vector<64x512xf32>
    %7 = tpu.matmul %4, %6, %cst {dimension_numbers = #tpu.dot_dimension_numbers<[1], [0], [0], [1], [0, 0, 1, 1], [], []>} : vector<64x128xf32>, vector<128x512xf32>, vector<64x512xf32> -> vector<64x512xf32>
    %c0_6 = arith.constant 0 : index
    %c0_7 = arith.constant 0 : index
    %c0_8 = arith.constant 0 : index
    %8 = vector.load %arg5[%c0_6, %c0_7, %c0_8] : memref<1x1x512xf32, #tpu.memory_space<vmem>>, vector<1x1x512xf32>
    %9 = vector.shape_cast %8 : vector<1x1x512xf32> to vector<1x512xf32>
    %10 = vector.broadcast %9 : vector<1x512xf32> to vector<64x512xf32>
    %11 = arith.addf %7, %10 : vector<64x512xf32>
    %12 = vector.shape_cast %11 : vector<64x512xf32> to vector<8x8x512xf32>
    %c0_9 = arith.constant 0 : index
    %c0_10 = arith.constant 0 : index
    %c0_11 = arith.constant 0 : index
    %13 = vector.load %arg8[%c0_9, %c0_10, %c0_11] : memref<8x8x512xf32, #tpu.memory_space<vmem>>, vector<8x8x512xf32>
    tpu.vector_store %arg8[%c0_9, %c0_10, %c0_11], %12 {strides = array<i32>} : memref<8x8x512xf32, #tpu.memory_space<vmem>>, vector<8x8x512xf32>,
    %c0_i32_12 = arith.constant 0 : i32
    %c1_i32 = arith.constant 1 : i32
    %14 = arith.subi %c1_i32, %arg0 : i32
    %15 = arith.muli %14, %c0_i32_12 : i32
    %c7_i32 = arith.constant 7 : i32
    %16 = arith.subi %c7_i32, %c0_i32_12 : i32
    %17 = arith.muli %arg0, %16 : i32
    %18 = arith.addi %15, %17 : i32
    %19 = arith.index_cast %18 : i32 to index
    %c0_13 = arith.constant 0 : index
    %c0_14 = arith.constant 0 : index
    %20 = vector.load %arg8[%19, %c0_13, %c0_14] : memref<8x8x512xf32, #tpu.memory_space<vmem>>, vector<1x8x512xf32>
    %21 = vector.shape_cast %20 : vector<1x8x512xf32> to vector<8x512xf32>
    %c0_15 = arith.constant 0 : index
    %c0_16 = arith.constant 0 : index
    %22 = vector.load %arg9[%c0_15, %c0_16] : memref<8x128xf32, #tpu.memory_space<vmem>>, vector<8x128xf32>
    %c0_17 = arith.constant 0 : index
    %c0_18 = arith.constant 0 : index
    %c0_19 = arith.constant 0 : index
    %23 = vector.load %arg4[%c0_17, %c0_18, %c0_19] : memref<1x128x512xf32, #tpu.memory_space<vmem>>, vector<1x128x512xf32>
    %24 = vector.shape_cast %23 : vector<1x128x512xf32> to vector<128x512xf32>
    %cst_20 = arith.constant dense<0.000000e+00> : vector<8x512xf32>
    %25 = tpu.matmul %22, %24, %cst_20 {dimension_numbers = #tpu.dot_dimension_numbers<[1], [0], [0], [1], [0, 0, 1, 1], [], []>} : vector<8x128xf32>, vector<128x512xf32>, vector<8x512xf32> -> vector<8x512xf32>
    %26 = arith.addf %21, %25 : vector<8x512xf32>
    %27 = vector.extract_strided_slice %26 {offsets = [0, 0], sizes = [8, 128], strides = [1, 1]} : vector<8x512xf32> to vector<8x128xf32>
    %28 = arith.negf %27 : vector<8x128xf32>
    %29 = math.exp %28 : vector<8x128xf32>
    %cst_21 = arith.constant 1.000000e+00 : f32
    %30 = vector.broadcast %cst_21 : f32 to vector<8x128xf32>
    %31 = arith.addf %30, %29 : vector<8x128xf32>
    %32 = arith.divf %30, %31 : vector<8x128xf32>
    %33 = vector.extract_strided_slice %26 {offsets = [0, 128], sizes = [8, 128], strides = [1, 1]} : vector<8x512xf32> to vector<8x128xf32>
    %34 = arith.negf %33 : vector<8x128xf32>
    %35 = math.exp %34 : vector<8x128xf32>
    %cst_22 = arith.constant 1.000000e+00 : f32
    %36 = vector.broadcast %cst_22 : f32 to vector<8x128xf32>
    %37 = arith.addf %36, %35 : vector<8x128xf32>
    %38 = arith.divf %36, %37 : vector<8x128xf32>
    %39 = vector.extract_strided_slice %26 {offsets = [0, 256], sizes = [8, 128], strides = [1, 1]} : vector<8x512xf32> to vector<8x128xf32>
    %40 = math.tanh %39 : vector<8x128xf32>
    %41 = vector.extract_strided_slice %26 {offsets = [0, 384], sizes = [8, 128], strides = [1, 1]} : vector<8x512xf32> to vector<8x128xf32>
    %42 = arith.negf %41 : vector<8x128xf32>
    %43 = math.exp %42 : vector<8x128xf32>
    %cst_23 = arith.constant 1.000000e+00 : f32
    %44 = vector.broadcast %cst_23 : f32 to vector<8x128xf32>
    %45 = arith.addf %44, %43 : vector<8x128xf32>
    %46 = arith.divf %44, %45 : vector<8x128xf32>
    %c0_24 = arith.constant 0 : index
    %c0_25 = arith.constant 0 : index
    %47 = vector.load %arg10[%c0_24, %c0_25] : memref<8x128xf32, #tpu.memory_space<vmem>>, vector<8x128xf32>
    %48 = arith.mulf %38, %47 : vector<8x128xf32>
    %49 = arith.mulf %32, %40 : vector<8x128xf32>
    %50 = arith.addf %48, %49 : vector<8x128xf32>
    %51 = math.tanh %50 : vector<8x128xf32>
    %52 = arith.mulf %46, %51 : vector<8x128xf32>
    %c0_26 = arith.constant 0 : index
    %c0_27 = arith.constant 0 : index
    %53 = vector.load %arg10[%c0_26, %c0_27] : memref<8x128xf32, #tpu.memory_space<vmem>>, vector<8x128xf32>
    tpu.vector_store %arg10[%c0_26, %c0_27], %50 {strides = array<i32>} : memref<8x128xf32, #tpu.memory_space<vmem>>, vector<8x128xf32>,
    %c0_28 = arith.constant 0 : index
    %c0_29 = arith.constant 0 : index
    %54 = vector.load %arg9[%c0_28, %c0_29] : memref<8x128xf32, #tpu.memory_space<vmem>>, vector<8x128xf32>
    tpu.vector_store %arg9[%c0_28, %c0_29], %52 {strides = array<i32>} : memref<8x128xf32, #tpu.memory_space<vmem>>, vector<8x128xf32>,
    %55 = arith.index_cast %18 : i32 to index
    %c0_30 = arith.constant 0 : index
    %c0_31 = arith.constant 0 : index
    %56 = vector.load %arg6[%55, %c0_30, %c0_31] : memref<8x8x128xf32, #tpu.memory_space<vmem>>, vector<1x8x128xf32>
    %57 = vector.shape_cast %56 : vector<1x8x128xf32> to vector<8x128xf32>
    %58 = vector.shape_cast %52 : vector<8x128xf32> to vector<1x8x128xf32>
    tpu.vector_store %arg6[%55, %c0_30, %c0_31], %58 {strides = array<i32>} : memref<8x8x128xf32, #tpu.memory_space<vmem>>, vector<1x8x128xf32>,
    %c1_i32_32 = arith.constant 1 : i32
    %c1_i32_33 = arith.constant 1 : i32
    %59 = arith.subi %c1_i32_33, %arg0 : i32
    %60 = arith.muli %59, %c1_i32_32 : i32
    %c7_i32_34 = arith.constant 7 : i32
    %61 = arith.subi %c7_i32_34, %c1_i32_32 : i32
    %62 = arith.muli %arg0, %61 : i32
    %63 = arith.addi %60, %62 : i32
    %64 = arith.index_cast %63 : i32 to index
    %c0_35 = arith.constant 0 : index
    %c0_36 = arith.constant 0 : index
    %65 = vector.load %arg8[%64, %c0_35, %c0_36] : memref<8x8x512xf32, #tpu.memory_space<vmem>>, vector<1x8x512xf32>
    %66 = vector.shape_cast %65 : vector<1x8x512xf32> to vector<8x512xf32>
    %c0_37 = arith.constant 0 : index
    %c0_38 = arith.constant 0 : index
    %67 = vector.load %arg9[%c0_37, %c0_38] : memref<8x128xf32, #tpu.memory_space<vmem>>, vector<8x128xf32>
    %c0_39 = arith.constant 0 : index
    %c0_40 = arith.constant 0 : index
    %c0_41 = arith.constant 0 : index
    %68 = vector.load %arg4[%c0_39, %c0_40, %c0_41] : memref<1x128x512xf32, #tpu.memory_space<vmem>>, vector<1x128x512xf32>
    %69 = vector.shape_cast %68 : vector<1x128x512xf32> to vector<128x512xf32>
    %cst_42 = arith.constant dense<0.000000e+00> : vector<8x512xf32>
    %70 = tpu.matmul %67, %69, %cst_42 {dimension_numbers = #tpu.dot_dimension_numbers<[1], [0], [0], [1], [0, 0, 1, 1], [], []>} : vector<8x128xf32>, vector<128x512xf32>, vector<8x512xf32> -> vector<8x512xf32>
    %71 = arith.addf %66, %70 : vector<8x512xf32>
    %72 = vector.extract_strided_slice %71 {offsets = [0, 0], sizes = [8, 128], strides = [1, 1]} : vector<8x512xf32> to vector<8x128xf32>
    %73 = arith.negf %72 : vector<8x128xf32>
    %74 = math.exp %73 : vector<8x128xf32>
    %cst_43 = arith.constant 1.000000e+00 : f32
    %75 = vector.broadcast %cst_43 : f32 to vector<8x128xf32>
    %76 = arith.addf %75, %74 : vector<8x128xf32>
    %77 = arith.divf %75, %76 : vector<8x128xf32>
    %78 = vector.extract_strided_slice %71 {offsets = [0, 128], sizes = [8, 128], strides = [1, 1]} : vector<8x512xf32> to vector<8x128xf32>
    %79 = arith.negf %78 : vector<8x128xf32>
    %80 = math.exp %79 : vector<8x128xf32>
    %cst_44 = arith.constant 1.000000e+00 : f32
    %81 = vector.broadcast %cst_44 : f32 to vector<8x128xf32>
    %82 = arith.addf %81, %80 : vector<8x128xf32>
    %83 = arith.divf %81, %82 : vector<8x128xf32>
    %84 = vector.extract_strided_slice %71 {offsets = [0, 256], sizes = [8, 128], strides = [1, 1]} : vector<8x512xf32> to vector<8x128xf32>
    %85 = math.tanh %84 : vector<8x128xf32>
    %86 = vector.extract_strided_slice %71 {offsets = [0, 384], sizes = [8, 128], strides = [1, 1]} : vector<8x512xf32> to vector<8x128xf32>
    %87 = arith.negf %86 : vector<8x128xf32>
    %88 = math.exp %87 : vector<8x128xf32>
    %cst_45 = arith.constant 1.000000e+00 : f32
    %89 = vector.broadcast %cst_45 : f32 to vector<8x128xf32>
    %90 = arith.addf %89, %88 : vector<8x128xf32>
    %91 = arith.divf %89, %90 : vector<8x128xf32>
    %c0_46 = arith.constant 0 : index
    %c0_47 = arith.constant 0 : index
    %92 = vector.load %arg10[%c0_46, %c0_47] : memref<8x128xf32, #tpu.memory_space<vmem>>, vector<8x128xf32>
    %93 = arith.mulf %83, %92 : vector<8x128xf32>
    %94 = arith.mulf %77, %85 : vector<8x128xf32>
    %95 = arith.addf %93, %94 : vector<8x128xf32>
    %96 = math.tanh %95 : vector<8x128xf32>
    %97 = arith.mulf %91, %96 : vector<8x128xf32>
    %c0_48 = arith.constant 0 : index
    %c0_49 = arith.constant 0 : index
    %98 = vector.load %arg10[%c0_48, %c0_49] : memref<8x128xf32, #tpu.memory_space<vmem>>, vector<8x128xf32>
    tpu.vector_store %arg10[%c0_48, %c0_49], %95 {strides = array<i32>} : memref<8x128xf32, #tpu.memory_space<vmem>>, vector<8x128xf32>,
    %c0_50 = arith.constant 0 : index
    %c0_51 = arith.constant 0 : index
    %99 = vector.load %arg9[%c0_50, %c0_51] : memref<8x128xf32, #tpu.memory_space<vmem>>, vector<8x128xf32>
    tpu.vector_store %arg9[%c0_50, %c0_51], %97 {strides = array<i32>} : memref<8x128xf32, #tpu.memory_space<vmem>>, vector<8x128xf32>,
    %100 = arith.index_cast %63 : i32 to index
    %c0_52 = arith.constant 0 : index
    %c0_53 = arith.constant 0 : index
    %101 = vector.load %arg6[%100, %c0_52, %c0_53] : memref<8x8x128xf32, #tpu.memory_space<vmem>>, vector<1x8x128xf32>
    %102 = vector.shape_cast %101 : vector<1x8x128xf32> to vector<8x128xf32>
    %103 = vector.shape_cast %97 : vector<8x128xf32> to vector<1x8x128xf32>
    tpu.vector_store %arg6[%100, %c0_52, %c0_53], %103 {strides = array<i32>} : memref<8x8x128xf32, #tpu.memory_space<vmem>>, vector<1x8x128xf32>,
    %c2_i32 = arith.constant 2 : i32
    %c1_i32_54 = arith.constant 1 : i32
    %104 = arith.subi %c1_i32_54, %arg0 : i32
    %105 = arith.muli %104, %c2_i32 : i32
    %c7_i32_55 = arith.constant 7 : i32
    %106 = arith.subi %c7_i32_55, %c2_i32 : i32
    %107 = arith.muli %arg0, %106 : i32
    %108 = arith.addi %105, %107 : i32
    %109 = arith.index_cast %108 : i32 to index
    %c0_56 = arith.constant 0 : index
    %c0_57 = arith.constant 0 : index
    %110 = vector.load %arg8[%109, %c0_56, %c0_57] : memref<8x8x512xf32, #tpu.memory_space<vmem>>, vector<1x8x512xf32>
    %111 = vector.shape_cast %110 : vector<1x8x512xf32> to vector<8x512xf32>
    %c0_58 = arith.constant 0 : index
    %c0_59 = arith.constant 0 : index
    %112 = vector.load %arg9[%c0_58, %c0_59] : memref<8x128xf32, #tpu.memory_space<vmem>>, vector<8x128xf32>
    %c0_60 = arith.constant 0 : index
    %c0_61 = arith.constant 0 : index
    %c0_62 = arith.constant 0 : index
    %113 = vector.load %arg4[%c0_60, %c0_61, %c0_62] : memref<1x128x512xf32, #tpu.memory_space<vmem>>, vector<1x128x512xf32>
    %114 = vector.shape_cast %113 : vector<1x128x512xf32> to vector<128x512xf32>
    %cst_63 = arith.constant dense<0.000000e+00> : vector<8x512xf32>
    %115 = tpu.matmul %112, %114, %cst_63 {dimension_numbers = #tpu.dot_dimension_numbers<[1], [0], [0], [1], [0, 0, 1, 1], [], []>} : vector<8x128xf32>, vector<128x512xf32>, vector<8x512xf32> -> vector<8x512xf32>
    %116 = arith.addf %111, %115 : vector<8x512xf32>
    %117 = vector.extract_strided_slice %116 {offsets = [0, 0], sizes = [8, 128], strides = [1, 1]} : vector<8x512xf32> to vector<8x128xf32>
    %118 = arith.negf %117 : vector<8x128xf32>
    %119 = math.exp %118 : vector<8x128xf32>
    %cst_64 = arith.constant 1.000000e+00 : f32
    %120 = vector.broadcast %cst_64 : f32 to vector<8x128xf32>
    %121 = arith.addf %120, %119 : vector<8x128xf32>
    %122 = arith.divf %120, %121 : vector<8x128xf32>
    %123 = vector.extract_strided_slice %116 {offsets = [0, 128], sizes = [8, 128], strides = [1, 1]} : vector<8x512xf32> to vector<8x128xf32>
    %124 = arith.negf %123 : vector<8x128xf32>
    %125 = math.exp %124 : vector<8x128xf32>
    %cst_65 = arith.constant 1.000000e+00 : f32
    %126 = vector.broadcast %cst_65 : f32 to vector<8x128xf32>
    %127 = arith.addf %126, %125 : vector<8x128xf32>
    %128 = arith.divf %126, %127 : vector<8x128xf32>
    %129 = vector.extract_strided_slice %116 {offsets = [0, 256], sizes = [8, 128], strides = [1, 1]} : vector<8x512xf32> to vector<8x128xf32>
    %130 = math.tanh %129 : vector<8x128xf32>
    %131 = vector.extract_strided_slice %116 {offsets = [0, 384], sizes = [8, 128], strides = [1, 1]} : vector<8x512xf32> to vector<8x128xf32>
    %132 = arith.negf %131 : vector<8x128xf32>
    %133 = math.exp %132 : vector<8x128xf32>
    %cst_66 = arith.constant 1.000000e+00 : f32
    %134 = vector.broadcast %cst_66 : f32 to vector<8x128xf32>
    %135 = arith.addf %134, %133 : vector<8x128xf32>
    %136 = arith.divf %134, %135 : vector<8x128xf32>
    %c0_67 = arith.constant 0 : index
    %c0_68 = arith.constant 0 : index
    %137 = vector.load %arg10[%c0_67, %c0_68] : memref<8x128xf32, #tpu.memory_space<vmem>>, vector<8x128xf32>
    %138 = arith.mulf %128, %137 : vector<8x128xf32>
    %139 = arith.mulf %122, %130 : vector<8x128xf32>
    %140 = arith.addf %138, %139 : vector<8x128xf32>
    %141 = math.tanh %140 : vector<8x128xf32>
    %142 = arith.mulf %136, %141 : vector<8x128xf32>
    %c0_69 = arith.constant 0 : index
    %c0_70 = arith.constant 0 : index
    %143 = vector.load %arg10[%c0_69, %c0_70] : memref<8x128xf32, #tpu.memory_space<vmem>>, vector<8x128xf32>
    tpu.vector_store %arg10[%c0_69, %c0_70], %140 {strides = array<i32>} : memref<8x128xf32, #tpu.memory_space<vmem>>, vector<8x128xf32>,
    %c0_71 = arith.constant 0 : index
    %c0_72 = arith.constant 0 : index
    %144 = vector.load %arg9[%c0_71, %c0_72] : memref<8x128xf32, #tpu.memory_space<vmem>>, vector<8x128xf32>
    tpu.vector_store %arg9[%c0_71, %c0_72], %142 {strides = array<i32>} : memref<8x128xf32, #tpu.memory_space<vmem>>, vector<8x128xf32>,
    %145 = arith.index_cast %108 : i32 to index
    %c0_73 = arith.constant 0 : index
    %c0_74 = arith.constant 0 : index
    %146 = vector.load %arg6[%145, %c0_73, %c0_74] : memref<8x8x128xf32, #tpu.memory_space<vmem>>, vector<1x8x128xf32>
    %147 = vector.shape_cast %146 : vector<1x8x128xf32> to vector<8x128xf32>
    %148 = vector.shape_cast %142 : vector<8x128xf32> to vector<1x8x128xf32>
    tpu.vector_store %arg6[%145, %c0_73, %c0_74], %148 {strides = array<i32>} : memref<8x8x128xf32, #tpu.memory_space<vmem>>, vector<1x8x128xf32>,
    %c3_i32 = arith.constant 3 : i32
    %c1_i32_75 = arith.constant 1 : i32
    %149 = arith.subi %c1_i32_75, %arg0 : i32
    %150 = arith.muli %149, %c3_i32 : i32
    %c7_i32_76 = arith.constant 7 : i32
    %151 = arith.subi %c7_i32_76, %c3_i32 : i32
    %152 = arith.muli %arg0, %151 : i32
    %153 = arith.addi %150, %152 : i32
    %154 = arith.index_cast %153 : i32 to index
    %c0_77 = arith.constant 0 : index
    %c0_78 = arith.constant 0 : index
    %155 = vector.load %arg8[%154, %c0_77, %c0_78] : memref<8x8x512xf32, #tpu.memory_space<vmem>>, vector<1x8x512xf32>
    %156 = vector.shape_cast %155 : vector<1x8x512xf32> to vector<8x512xf32>
    %c0_79 = arith.constant 0 : index
    %c0_80 = arith.constant 0 : index
    %157 = vector.load %arg9[%c0_79, %c0_80] : memref<8x128xf32, #tpu.memory_space<vmem>>, vector<8x128xf32>
    %c0_81 = arith.constant 0 : index
    %c0_82 = arith.constant 0 : index
    %c0_83 = arith.constant 0 : index
    %158 = vector.load %arg4[%c0_81, %c0_82, %c0_83] : memref<1x128x512xf32, #tpu.memory_space<vmem>>, vector<1x128x512xf32>
    %159 = vector.shape_cast %158 : vector<1x128x512xf32> to vector<128x512xf32>
    %cst_84 = arith.constant dense<0.000000e+00> : vector<8x512xf32>
    %160 = tpu.matmul %157, %159, %cst_84 {dimension_numbers = #tpu.dot_dimension_numbers<[1], [0], [0], [1], [0, 0, 1, 1], [], []>} : vector<8x128xf32>, vector<128x512xf32>, vector<8x512xf32> -> vector<8x512xf32>
    %161 = arith.addf %156, %160 : vector<8x512xf32>
    %162 = vector.extract_strided_slice %161 {offsets = [0, 0], sizes = [8, 128], strides = [1, 1]} : vector<8x512xf32> to vector<8x128xf32>
    %163 = arith.negf %162 : vector<8x128xf32>
    %164 = math.exp %163 : vector<8x128xf32>
    %cst_85 = arith.constant 1.000000e+00 : f32
    %165 = vector.broadcast %cst_85 : f32 to vector<8x128xf32>
    %166 = arith.addf %165, %164 : vector<8x128xf32>
    %167 = arith.divf %165, %166 : vector<8x128xf32>
    %168 = vector.extract_strided_slice %161 {offsets = [0, 128], sizes = [8, 128], strides = [1, 1]} : vector<8x512xf32> to vector<8x128xf32>
    %169 = arith.negf %168 : vector<8x128xf32>
    %170 = math.exp %169 : vector<8x128xf32>
    %cst_86 = arith.constant 1.000000e+00 : f32
    %171 = vector.broadcast %cst_86 : f32 to vector<8x128xf32>
    %172 = arith.addf %171, %170 : vector<8x128xf32>
    %173 = arith.divf %171, %172 : vector<8x128xf32>
    %174 = vector.extract_strided_slice %161 {offsets = [0, 256], sizes = [8, 128], strides = [1, 1]} : vector<8x512xf32> to vector<8x128xf32>
    %175 = math.tanh %174 : vector<8x128xf32>
    %176 = vector.extract_strided_slice %161 {offsets = [0, 384], sizes = [8, 128], strides = [1, 1]} : vector<8x512xf32> to vector<8x128xf32>
    %177 = arith.negf %176 : vector<8x128xf32>
    %178 = math.exp %177 : vector<8x128xf32>
    %cst_87 = arith.constant 1.000000e+00 : f32
    %179 = vector.broadcast %cst_87 : f32 to vector<8x128xf32>
    %180 = arith.addf %179, %178 : vector<8x128xf32>
    %181 = arith.divf %179, %180 : vector<8x128xf32>
    %c0_88 = arith.constant 0 : index
    %c0_89 = arith.constant 0 : index
    %182 = vector.load %arg10[%c0_88, %c0_89] : memref<8x128xf32, #tpu.memory_space<vmem>>, vector<8x128xf32>
    %183 = arith.mulf %173, %182 : vector<8x128xf32>
    %184 = arith.mulf %167, %175 : vector<8x128xf32>
    %185 = arith.addf %183, %184 : vector<8x128xf32>
    %186 = math.tanh %185 : vector<8x128xf32>
    %187 = arith.mulf %181, %186 : vector<8x128xf32>
    %c0_90 = arith.constant 0 : index
    %c0_91 = arith.constant 0 : index
    %188 = vector.load %arg10[%c0_90, %c0_91] : memref<8x128xf32, #tpu.memory_space<vmem>>, vector<8x128xf32>
    tpu.vector_store %arg10[%c0_90, %c0_91], %185 {strides = array<i32>} : memref<8x128xf32, #tpu.memory_space<vmem>>, vector<8x128xf32>,
    %c0_92 = arith.constant 0 : index
    %c0_93 = arith.constant 0 : index
    %189 = vector.load %arg9[%c0_92, %c0_93] : memref<8x128xf32, #tpu.memory_space<vmem>>, vector<8x128xf32>
    tpu.vector_store %arg9[%c0_92, %c0_93], %187 {strides = array<i32>} : memref<8x128xf32, #tpu.memory_space<vmem>>, vector<8x128xf32>,
    %190 = arith.index_cast %153 : i32 to index
    %c0_94 = arith.constant 0 : index
    %c0_95 = arith.constant 0 : index
    %191 = vector.load %arg6[%190, %c0_94, %c0_95] : memref<8x8x128xf32, #tpu.memory_space<vmem>>, vector<1x8x128xf32>
    %192 = vector.shape_cast %191 : vector<1x8x128xf32> to vector<8x128xf32>
    %193 = vector.shape_cast %187 : vector<8x128xf32> to vector<1x8x128xf32>
    tpu.vector_store %arg6[%190, %c0_94, %c0_95], %193 {strides = array<i32>} : memref<8x8x128xf32, #tpu.memory_space<vmem>>, vector<1x8x128xf32>,
    %c4_i32 = arith.constant 4 : i32
    %c1_i32_96 = arith.constant 1 : i32
    %194 = arith.subi %c1_i32_96, %arg0 : i32
    %195 = arith.muli %194, %c4_i32 : i32
    %c7_i32_97 = arith.constant 7 : i32
    %196 = arith.subi %c7_i32_97, %c4_i32 : i32
    %197 = arith.muli %arg0, %196 : i32
    %198 = arith.addi %195, %197 : i32
    %199 = arith.index_cast %198 : i32 to index
    %c0_98 = arith.constant 0 : index
    %c0_99 = arith.constant 0 : index
    %200 = vector.load %arg8[%199, %c0_98, %c0_99] : memref<8x8x512xf32, #tpu.memory_space<vmem>>, vector<1x8x512xf32>
    %201 = vector.shape_cast %200 : vector<1x8x512xf32> to vector<8x512xf32>
    %c0_100 = arith.constant 0 : index
    %c0_101 = arith.constant 0 : index
    %202 = vector.load %arg9[%c0_100, %c0_101] : memref<8x128xf32, #tpu.memory_space<vmem>>, vector<8x128xf32>
    %c0_102 = arith.constant 0 : index
    %c0_103 = arith.constant 0 : index
    %c0_104 = arith.constant 0 : index
    %203 = vector.load %arg4[%c0_102, %c0_103, %c0_104] : memref<1x128x512xf32, #tpu.memory_space<vmem>>, vector<1x128x512xf32>
    %204 = vector.shape_cast %203 : vector<1x128x512xf32> to vector<128x512xf32>
    %cst_105 = arith.constant dense<0.000000e+00> : vector<8x512xf32>
    %205 = tpu.matmul %202, %204, %cst_105 {dimension_numbers = #tpu.dot_dimension_numbers<[1], [0], [0], [1], [0, 0, 1, 1], [], []>} : vector<8x128xf32>, vector<128x512xf32>, vector<8x512xf32> -> vector<8x512xf32>
    %206 = arith.addf %201, %205 : vector<8x512xf32>
    %207 = vector.extract_strided_slice %206 {offsets = [0, 0], sizes = [8, 128], strides = [1, 1]} : vector<8x512xf32> to vector<8x128xf32>
    %208 = arith.negf %207 : vector<8x128xf32>
    %209 = math.exp %208 : vector<8x128xf32>
    %cst_106 = arith.constant 1.000000e+00 : f32
    %210 = vector.broadcast %cst_106 : f32 to vector<8x128xf32>
    %211 = arith.addf %210, %209 : vector<8x128xf32>
    %212 = arith.divf %210, %211 : vector<8x128xf32>
    %213 = vector.extract_strided_slice %206 {offsets = [0, 128], sizes = [8, 128], strides = [1, 1]} : vector<8x512xf32> to vector<8x128xf32>
    %214 = arith.negf %213 : vector<8x128xf32>
    %215 = math.exp %214 : vector<8x128xf32>
    %cst_107 = arith.constant 1.000000e+00 : f32
    %216 = vector.broadcast %cst_107 : f32 to vector<8x128xf32>
    %217 = arith.addf %216, %215 : vector<8x128xf32>
    %218 = arith.divf %216, %217 : vector<8x128xf32>
    %219 = vector.extract_strided_slice %206 {offsets = [0, 256], sizes = [8, 128], strides = [1, 1]} : vector<8x512xf32> to vector<8x128xf32>
    %220 = math.tanh %219 : vector<8x128xf32>
    %221 = vector.extract_strided_slice %206 {offsets = [0, 384], sizes = [8, 128], strides = [1, 1]} : vector<8x512xf32> to vector<8x128xf32>
    %222 = arith.negf %221 : vector<8x128xf32>
    %223 = math.exp %222 : vector<8x128xf32>
    %cst_108 = arith.constant 1.000000e+00 : f32
    %224 = vector.broadcast %cst_108 : f32 to vector<8x128xf32>
    %225 = arith.addf %224, %223 : vector<8x128xf32>
    %226 = arith.divf %224, %225 : vector<8x128xf32>
    %c0_109 = arith.constant 0 : index
    %c0_110 = arith.constant 0 : index
    %227 = vector.load %arg10[%c0_109, %c0_110] : memref<8x128xf32, #tpu.memory_space<vmem>>, vector<8x128xf32>
    %228 = arith.mulf %218, %227 : vector<8x128xf32>
    %229 = arith.mulf %212, %220 : vector<8x128xf32>
    %230 = arith.addf %228, %229 : vector<8x128xf32>
    %231 = math.tanh %230 : vector<8x128xf32>
    %232 = arith.mulf %226, %231 : vector<8x128xf32>
    %c0_111 = arith.constant 0 : index
    %c0_112 = arith.constant 0 : index
    %233 = vector.load %arg10[%c0_111, %c0_112] : memref<8x128xf32, #tpu.memory_space<vmem>>, vector<8x128xf32>
    tpu.vector_store %arg10[%c0_111, %c0_112], %230 {strides = array<i32>} : memref<8x128xf32, #tpu.memory_space<vmem>>, vector<8x128xf32>,
    %c0_113 = arith.constant 0 : index
    %c0_114 = arith.constant 0 : index
    %234 = vector.load %arg9[%c0_113, %c0_114] : memref<8x128xf32, #tpu.memory_space<vmem>>, vector<8x128xf32>
    tpu.vector_store %arg9[%c0_113, %c0_114], %232 {strides = array<i32>} : memref<8x128xf32, #tpu.memory_space<vmem>>, vector<8x128xf32>,
    %235 = arith.index_cast %198 : i32 to index
    %c0_115 = arith.constant 0 : index
    %c0_116 = arith.constant 0 : index
    %236 = vector.load %arg6[%235, %c0_115, %c0_116] : memref<8x8x128xf32, #tpu.memory_space<vmem>>, vector<1x8x128xf32>
    %237 = vector.shape_cast %236 : vector<1x8x128xf32> to vector<8x128xf32>
    %238 = vector.shape_cast %232 : vector<8x128xf32> to vector<1x8x128xf32>
    tpu.vector_store %arg6[%235, %c0_115, %c0_116], %238 {strides = array<i32>} : memref<8x8x128xf32, #tpu.memory_space<vmem>>, vector<1x8x128xf32>,
    %c5_i32 = arith.constant 5 : i32
    %c1_i32_117 = arith.constant 1 : i32
    %239 = arith.subi %c1_i32_117, %arg0 : i32
    %240 = arith.muli %239, %c5_i32 : i32
    %c7_i32_118 = arith.constant 7 : i32
    %241 = arith.subi %c7_i32_118, %c5_i32 : i32
    %242 = arith.muli %arg0, %241 : i32
    %243 = arith.addi %240, %242 : i32
    %244 = arith.index_cast %243 : i32 to index
    %c0_119 = arith.constant 0 : index
    %c0_120 = arith.constant 0 : index
    %245 = vector.load %arg8[%244, %c0_119, %c0_120] : memref<8x8x512xf32, #tpu.memory_space<vmem>>, vector<1x8x512xf32>
    %246 = vector.shape_cast %245 : vector<1x8x512xf32> to vector<8x512xf32>
    %c0_121 = arith.constant 0 : index
    %c0_122 = arith.constant 0 : index
    %247 = vector.load %arg9[%c0_121, %c0_122] : memref<8x128xf32, #tpu.memory_space<vmem>>, vector<8x128xf32>
    %c0_123 = arith.constant 0 : index
    %c0_124 = arith.constant 0 : index
    %c0_125 = arith.constant 0 : index
    %248 = vector.load %arg4[%c0_123, %c0_124, %c0_125] : memref<1x128x512xf32, #tpu.memory_space<vmem>>, vector<1x128x512xf32>
    %249 = vector.shape_cast %248 : vector<1x128x512xf32> to vector<128x512xf32>
    %cst_126 = arith.constant dense<0.000000e+00> : vector<8x512xf32>
    %250 = tpu.matmul %247, %249, %cst_126 {dimension_numbers = #tpu.dot_dimension_numbers<[1], [0], [0], [1], [0, 0, 1, 1], [], []>} : vector<8x128xf32>, vector<128x512xf32>, vector<8x512xf32> -> vector<8x512xf32>
    %251 = arith.addf %246, %250 : vector<8x512xf32>
    %252 = vector.extract_strided_slice %251 {offsets = [0, 0], sizes = [8, 128], strides = [1, 1]} : vector<8x512xf32> to vector<8x128xf32>
    %253 = arith.negf %252 : vector<8x128xf32>
    %254 = math.exp %253 : vector<8x128xf32>
    %cst_127 = arith.constant 1.000000e+00 : f32
    %255 = vector.broadcast %cst_127 : f32 to vector<8x128xf32>
    %256 = arith.addf %255, %254 : vector<8x128xf32>
    %257 = arith.divf %255, %256 : vector<8x128xf32>
    %258 = vector.extract_strided_slice %251 {offsets = [0, 128], sizes = [8, 128], strides = [1, 1]} : vector<8x512xf32> to vector<8x128xf32>
    %259 = arith.negf %258 : vector<8x128xf32>
    %260 = math.exp %259 : vector<8x128xf32>
    %cst_128 = arith.constant 1.000000e+00 : f32
    %261 = vector.broadcast %cst_128 : f32 to vector<8x128xf32>
    %262 = arith.addf %261, %260 : vector<8x128xf32>
    %263 = arith.divf %261, %262 : vector<8x128xf32>
    %264 = vector.extract_strided_slice %251 {offsets = [0, 256], sizes = [8, 128], strides = [1, 1]} : vector<8x512xf32> to vector<8x128xf32>
    %265 = math.tanh %264 : vector<8x128xf32>
    %266 = vector.extract_strided_slice %251 {offsets = [0, 384], sizes = [8, 128], strides = [1, 1]} : vector<8x512xf32> to vector<8x128xf32>
    %267 = arith.negf %266 : vector<8x128xf32>
    %268 = math.exp %267 : vector<8x128xf32>
    %cst_129 = arith.constant 1.000000e+00 : f32
    %269 = vector.broadcast %cst_129 : f32 to vector<8x128xf32>
    %270 = arith.addf %269, %268 : vector<8x128xf32>
    %271 = arith.divf %269, %270 : vector<8x128xf32>
    %c0_130 = arith.constant 0 : index
    %c0_131 = arith.constant 0 : index
    %272 = vector.load %arg10[%c0_130, %c0_131] : memref<8x128xf32, #tpu.memory_space<vmem>>, vector<8x128xf32>
    %273 = arith.mulf %263, %272 : vector<8x128xf32>
    %274 = arith.mulf %257, %265 : vector<8x128xf32>
    %275 = arith.addf %273, %274 : vector<8x128xf32>
    %276 = math.tanh %275 : vector<8x128xf32>
    %277 = arith.mulf %271, %276 : vector<8x128xf32>
    %c0_132 = arith.constant 0 : index
    %c0_133 = arith.constant 0 : index
    %278 = vector.load %arg10[%c0_132, %c0_133] : memref<8x128xf32, #tpu.memory_space<vmem>>, vector<8x128xf32>
    tpu.vector_store %arg10[%c0_132, %c0_133], %275 {strides = array<i32>} : memref<8x128xf32, #tpu.memory_space<vmem>>, vector<8x128xf32>,
    %c0_134 = arith.constant 0 : index
    %c0_135 = arith.constant 0 : index
    %279 = vector.load %arg9[%c0_134, %c0_135] : memref<8x128xf32, #tpu.memory_space<vmem>>, vector<8x128xf32>
    tpu.vector_store %arg9[%c0_134, %c0_135], %277 {strides = array<i32>} : memref<8x128xf32, #tpu.memory_space<vmem>>, vector<8x128xf32>,
    %280 = arith.index_cast %243 : i32 to index
    %c0_136 = arith.constant 0 : index
    %c0_137 = arith.constant 0 : index
    %281 = vector.load %arg6[%280, %c0_136, %c0_137] : memref<8x8x128xf32, #tpu.memory_space<vmem>>, vector<1x8x128xf32>
    %282 = vector.shape_cast %281 : vector<1x8x128xf32> to vector<8x128xf32>
    %283 = vector.shape_cast %277 : vector<8x128xf32> to vector<1x8x128xf32>
    tpu.vector_store %arg6[%280, %c0_136, %c0_137], %283 {strides = array<i32>} : memref<8x8x128xf32, #tpu.memory_space<vmem>>, vector<1x8x128xf32>,
    %c6_i32 = arith.constant 6 : i32
    %c1_i32_138 = arith.constant 1 : i32
    %284 = arith.subi %c1_i32_138, %arg0 : i32
    %285 = arith.muli %284, %c6_i32 : i32
    %c7_i32_139 = arith.constant 7 : i32
    %286 = arith.subi %c7_i32_139, %c6_i32 : i32
    %287 = arith.muli %arg0, %286 : i32
    %288 = arith.addi %285, %287 : i32
    %289 = arith.index_cast %288 : i32 to index
    %c0_140 = arith.constant 0 : index
    %c0_141 = arith.constant 0 : index
    %290 = vector.load %arg8[%289, %c0_140, %c0_141] : memref<8x8x512xf32, #tpu.memory_space<vmem>>, vector<1x8x512xf32>
    %291 = vector.shape_cast %290 : vector<1x8x512xf32> to vector<8x512xf32>
    %c0_142 = arith.constant 0 : index
    %c0_143 = arith.constant 0 : index
    %292 = vector.load %arg9[%c0_142, %c0_143] : memref<8x128xf32, #tpu.memory_space<vmem>>, vector<8x128xf32>
    %c0_144 = arith.constant 0 : index
    %c0_145 = arith.constant 0 : index
    %c0_146 = arith.constant 0 : index
    %293 = vector.load %arg4[%c0_144, %c0_145, %c0_146] : memref<1x128x512xf32, #tpu.memory_space<vmem>>, vector<1x128x512xf32>
    %294 = vector.shape_cast %293 : vector<1x128x512xf32> to vector<128x512xf32>
    %cst_147 = arith.constant dense<0.000000e+00> : vector<8x512xf32>
    %295 = tpu.matmul %292, %294, %cst_147 {dimension_numbers = #tpu.dot_dimension_numbers<[1], [0], [0], [1], [0, 0, 1, 1], [], []>} : vector<8x128xf32>, vector<128x512xf32>, vector<8x512xf32> -> vector<8x512xf32>
    %296 = arith.addf %291, %295 : vector<8x512xf32>
    %297 = vector.extract_strided_slice %296 {offsets = [0, 0], sizes = [8, 128], strides = [1, 1]} : vector<8x512xf32> to vector<8x128xf32>
    %298 = arith.negf %297 : vector<8x128xf32>
    %299 = math.exp %298 : vector<8x128xf32>
    %cst_148 = arith.constant 1.000000e+00 : f32
    %300 = vector.broadcast %cst_148 : f32 to vector<8x128xf32>
    %301 = arith.addf %300, %299 : vector<8x128xf32>
    %302 = arith.divf %300, %301 : vector<8x128xf32>
    %303 = vector.extract_strided_slice %296 {offsets = [0, 128], sizes = [8, 128], strides = [1, 1]} : vector<8x512xf32> to vector<8x128xf32>
    %304 = arith.negf %303 : vector<8x128xf32>
    %305 = math.exp %304 : vector<8x128xf32>
    %cst_149 = arith.constant 1.000000e+00 : f32
    %306 = vector.broadcast %cst_149 : f32 to vector<8x128xf32>
    %307 = arith.addf %306, %305 : vector<8x128xf32>
    %308 = arith.divf %306, %307 : vector<8x128xf32>
    %309 = vector.extract_strided_slice %296 {offsets = [0, 256], sizes = [8, 128], strides = [1, 1]} : vector<8x512xf32> to vector<8x128xf32>
    %310 = math.tanh %309 : vector<8x128xf32>
    %311 = vector.extract_strided_slice %296 {offsets = [0, 384], sizes = [8, 128], strides = [1, 1]} : vector<8x512xf32> to vector<8x128xf32>
    %312 = arith.negf %311 : vector<8x128xf32>
    %313 = math.exp %312 : vector<8x128xf32>
    %cst_150 = arith.constant 1.000000e+00 : f32
    %314 = vector.broadcast %cst_150 : f32 to vector<8x128xf32>
    %315 = arith.addf %314, %313 : vector<8x128xf32>
    %316 = arith.divf %314, %315 : vector<8x128xf32>
    %c0_151 = arith.constant 0 : index
    %c0_152 = arith.constant 0 : index
    %317 = vector.load %arg10[%c0_151, %c0_152] : memref<8x128xf32, #tpu.memory_space<vmem>>, vector<8x128xf32>
    %318 = arith.mulf %308, %317 : vector<8x128xf32>
    %319 = arith.mulf %302, %310 : vector<8x128xf32>
    %320 = arith.addf %318, %319 : vector<8x128xf32>
    %321 = math.tanh %320 : vector<8x128xf32>
    %322 = arith.mulf %316, %321 : vector<8x128xf32>
    %c0_153 = arith.constant 0 : index
    %c0_154 = arith.constant 0 : index
    %323 = vector.load %arg10[%c0_153, %c0_154] : memref<8x128xf32, #tpu.memory_space<vmem>>, vector<8x128xf32>
    tpu.vector_store %arg10[%c0_153, %c0_154], %320 {strides = array<i32>} : memref<8x128xf32, #tpu.memory_space<vmem>>, vector<8x128xf32>,
    %c0_155 = arith.constant 0 : index
    %c0_156 = arith.constant 0 : index
    %324 = vector.load %arg9[%c0_155, %c0_156] : memref<8x128xf32, #tpu.memory_space<vmem>>, vector<8x128xf32>
    tpu.vector_store %arg9[%c0_155, %c0_156], %322 {strides = array<i32>} : memref<8x128xf32, #tpu.memory_space<vmem>>, vector<8x128xf32>,
    %325 = arith.index_cast %288 : i32 to index
    %c0_157 = arith.constant 0 : index
    %c0_158 = arith.constant 0 : index
    %326 = vector.load %arg6[%325, %c0_157, %c0_158] : memref<8x8x128xf32, #tpu.memory_space<vmem>>, vector<1x8x128xf32>
    %327 = vector.shape_cast %326 : vector<1x8x128xf32> to vector<8x128xf32>
    %328 = vector.shape_cast %322 : vector<8x128xf32> to vector<1x8x128xf32>
    tpu.vector_store %arg6[%325, %c0_157, %c0_158], %328 {strides = array<i32>} : memref<8x8x128xf32, #tpu.memory_space<vmem>>, vector<1x8x128xf32>,
    %c7_i32_159 = arith.constant 7 : i32
    %c1_i32_160 = arith.constant 1 : i32
    %329 = arith.subi %c1_i32_160, %arg0 : i32
    %330 = arith.muli %329, %c7_i32_159 : i32
    %c7_i32_161 = arith.constant 7 : i32
    %331 = arith.subi %c7_i32_161, %c7_i32_159 : i32
    %332 = arith.muli %arg0, %331 : i32
    %333 = arith.addi %330, %332 : i32
    %334 = arith.index_cast %333 : i32 to index
    %c0_162 = arith.constant 0 : index
    %c0_163 = arith.constant 0 : index
    %335 = vector.load %arg8[%334, %c0_162, %c0_163] : memref<8x8x512xf32, #tpu.memory_space<vmem>>, vector<1x8x512xf32>
    %336 = vector.shape_cast %335 : vector<1x8x512xf32> to vector<8x512xf32>
    %c0_164 = arith.constant 0 : index
    %c0_165 = arith.constant 0 : index
    %337 = vector.load %arg9[%c0_164, %c0_165] : memref<8x128xf32, #tpu.memory_space<vmem>>, vector<8x128xf32>
    %c0_166 = arith.constant 0 : index
    %c0_167 = arith.constant 0 : index
    %c0_168 = arith.constant 0 : index
    %338 = vector.load %arg4[%c0_166, %c0_167, %c0_168] : memref<1x128x512xf32, #tpu.memory_space<vmem>>, vector<1x128x512xf32>
    %339 = vector.shape_cast %338 : vector<1x128x512xf32> to vector<128x512xf32>
    %cst_169 = arith.constant dense<0.000000e+00> : vector<8x512xf32>
    %340 = tpu.matmul %337, %339, %cst_169 {dimension_numbers = #tpu.dot_dimension_numbers<[1], [0], [0], [1], [0, 0, 1, 1], [], []>} : vector<8x128xf32>, vector<128x512xf32>, vector<8x512xf32> -> vector<8x512xf32>
    %341 = arith.addf %336, %340 : vector<8x512xf32>
    %342 = vector.extract_strided_slice %341 {offsets = [0, 0], sizes = [8, 128], strides = [1, 1]} : vector<8x512xf32> to vector<8x128xf32>
    %343 = arith.negf %342 : vector<8x128xf32>
    %344 = math.exp %343 : vector<8x128xf32>
    %cst_170 = arith.constant 1.000000e+00 : f32
    %345 = vector.broadcast %cst_170 : f32 to vector<8x128xf32>
    %346 = arith.addf %345, %344 : vector<8x128xf32>
    %347 = arith.divf %345, %346 : vector<8x128xf32>
    %348 = vector.extract_strided_slice %341 {offsets = [0, 128], sizes = [8, 128], strides = [1, 1]} : vector<8x512xf32> to vector<8x128xf32>
    %349 = arith.negf %348 : vector<8x128xf32>
    %350 = math.exp %349 : vector<8x128xf32>
    %cst_171 = arith.constant 1.000000e+00 : f32
    %351 = vector.broadcast %cst_171 : f32 to vector<8x128xf32>
    %352 = arith.addf %351, %350 : vector<8x128xf32>
    %353 = arith.divf %351, %352 : vector<8x128xf32>
    %354 = vector.extract_strided_slice %341 {offsets = [0, 256], sizes = [8, 128], strides = [1, 1]} : vector<8x512xf32> to vector<8x128xf32>
    %355 = math.tanh %354 : vector<8x128xf32>
    %356 = vector.extract_strided_slice %341 {offsets = [0, 384], sizes = [8, 128], strides = [1, 1]} : vector<8x512xf32> to vector<8x128xf32>
    %357 = arith.negf %356 : vector<8x128xf32>
    %358 = math.exp %357 : vector<8x128xf32>
    %cst_172 = arith.constant 1.000000e+00 : f32
    %359 = vector.broadcast %cst_172 : f32 to vector<8x128xf32>
    %360 = arith.addf %359, %358 : vector<8x128xf32>
    %361 = arith.divf %359, %360 : vector<8x128xf32>
    %c0_173 = arith.constant 0 : index
    %c0_174 = arith.constant 0 : index
    %362 = vector.load %arg10[%c0_173, %c0_174] : memref<8x128xf32, #tpu.memory_space<vmem>>, vector<8x128xf32>
    %363 = arith.mulf %353, %362 : vector<8x128xf32>
    %364 = arith.mulf %347, %355 : vector<8x128xf32>
    %365 = arith.addf %363, %364 : vector<8x128xf32>
    %366 = math.tanh %365 : vector<8x128xf32>
    %367 = arith.mulf %361, %366 : vector<8x128xf32>
    %c0_175 = arith.constant 0 : index
    %c0_176 = arith.constant 0 : index
    %368 = vector.load %arg10[%c0_175, %c0_176] : memref<8x128xf32, #tpu.memory_space<vmem>>, vector<8x128xf32>
    tpu.vector_store %arg10[%c0_175, %c0_176], %365 {strides = array<i32>} : memref<8x128xf32, #tpu.memory_space<vmem>>, vector<8x128xf32>,
    %c0_177 = arith.constant 0 : index
    %c0_178 = arith.constant 0 : index
    %369 = vector.load %arg9[%c0_177, %c0_178] : memref<8x128xf32, #tpu.memory_space<vmem>>, vector<8x128xf32>
    tpu.vector_store %arg9[%c0_177, %c0_178], %367 {strides = array<i32>} : memref<8x128xf32, #tpu.memory_space<vmem>>, vector<8x128xf32>,
    %370 = arith.index_cast %333 : i32 to index
    %c0_179 = arith.constant 0 : index
    %c0_180 = arith.constant 0 : index
    %371 = vector.load %arg6[%370, %c0_179, %c0_180] : memref<8x8x128xf32, #tpu.memory_space<vmem>>, vector<1x8x128xf32>
    %372 = vector.shape_cast %371 : vector<1x8x128xf32> to vector<8x128xf32>
    %373 = vector.shape_cast %367 : vector<8x128xf32> to vector<1x8x128xf32>
    tpu.vector_store %arg6[%370, %c0_179, %c0_180], %373 {strides = array<i32>} : memref<8x8x128xf32, #tpu.memory_space<vmem>>, vector<1x8x128xf32>,
    %c8_i32 = arith.constant 8 : i32
    %c0_181 = arith.constant 0 : index
    %c0_182 = arith.constant 0 : index
    %374 = vector.load %arg9[%c0_181, %c0_182] : memref<8x128xf32, #tpu.memory_space<vmem>>, vector<8x128xf32>
    %c0_183 = arith.constant 0 : index
    %c0_184 = arith.constant 0 : index
    %375 = vector.load %arg7[%c0_183, %c0_184] : memref<8x128xf32, #tpu.memory_space<vmem>>, vector<8x128xf32>
    tpu.vector_store %arg7[%c0_183, %c0_184], %374 {strides = array<i32>} : memref<8x128xf32, #tpu.memory_space<vmem>>, vector<8x128xf32>,
    return
  }
  func.func @transform_0(%arg0: i32, %arg1: i32) -> (i32, i32, i32) {
    %c1_i32 = arith.constant 1 : i32
    %0 = arith.subi %c1_i32, %arg0 : i32
    %1 = arith.muli %0, %arg1 : i32
    %c0_i32 = arith.constant 0 : i32
    %2 = arith.subi %c0_i32, %arg1 : i32
    %3 = arith.muli %arg0, %2 : i32
    %4 = arith.addi %1, %3 : i32
    %c0_i32_0 = arith.constant 0 : i32
    %c0_i32_1 = arith.constant 0 : i32
    %c0_i32_2 = arith.constant 0 : i32
    return %4, %c0_i32_0, %c0_i32_1 : i32, i32, i32
  }
  func.func @transform_1(%arg0: i32, %arg1: i32) -> (i32, i32, i32) {
    %c0_i32 = arith.constant 0 : i32
    %c0_i32_0 = arith.constant 0 : i32
    %c0_i32_1 = arith.constant 0 : i32
    return %arg0, %c0_i32, %c0_i32_0 : i32, i32, i32
  }
  func.func @transform_2(%arg0: i32, %arg1: i32) -> (i32, i32, i32) {
    %c0_i32 = arith.constant 0 : i32
    %c0_i32_0 = arith.constant 0 : i32
    %c0_i32_1 = arith.constant 0 : i32
    return %arg0, %c0_i32, %c0_i32_0 : i32, i32, i32
  }
  func.func @transform_3(%arg0: i32, %arg1: i32) -> (i32, i32, i32) {
    %c0_i32 = arith.constant 0 : i32
    %c0_i32_0 = arith.constant 0 : i32
    %c0_i32_1 = arith.constant 0 : i32
    return %arg0, %c0_i32, %c0_i32_0 : i32, i32, i32
  }
  func.func @transform_4(%arg0: i32, %arg1: i32) -> (i32, i32, i32) {
    %c1_i32 = arith.constant 1 : i32
    %0 = arith.subi %c1_i32, %arg0 : i32
    %1 = arith.muli %0, %arg1 : i32
    %c0_i32 = arith.constant 0 : i32
    %2 = arith.subi %c0_i32, %arg1 : i32
    %3 = arith.muli %arg0, %2 : i32
    %4 = arith.addi %1, %3 : i32
    %c0_i32_0 = arith.constant 0 : i32
    %c0_i32_1 = arith.constant 0 : i32
    return %4, %c0_i32_0, %arg0 : i32, i32, i32
  }
  func.func @transform_5(%arg0: i32, %arg1: i32) -> (i32, i32) {
    %c0_i32 = arith.constant 0 : i32
    %c0_i32_0 = arith.constant 0 : i32
    return %c0_i32, %arg0 : i32, i32
  }
}

</mosaic_0001>

<bundles_post_ra>
// kernel: tpu_custom_call.1
= control target key start
LH: loop header
LB: loop body
LE: loop exit
PB: predicated region body
PF: predicated region fallthrough
CT: control target
= control target key end

     0   :  { %s5039_s0 = inlined_call_operand.hbm [shape: f32[8,8,128], index: 0, kind: input, shape index: {}]   ;;  %s5040_s1 = inlined_call_operand.hbm [shape: f32[2,128,512], index: 1, kind: input, shape index: {}]   ;;  %s5041_s2 = inlined_call_operand.hbm [shape: f32[2,128,512], index: 2, kind: input, shape index: {}]   ;;  %s5042_s3 = inlined_call_operand.hbm [shape: f32[2,1,512], index: 3, kind: input, shape index: {}]   ;;  %s5043_s4 = inlined_call_operand.hbm [shape: f32[8,8,256], index: 4, kind: output, shape index: {0}]   ;;  %s5044_s5 = inlined_call_operand.hbm [shape: f32[8,256], index: 5, kind: output, shape index: {1}]  }
   0x1   :  { %5113 = sst [smem:[#allocation43_spill]] %s5039_s0 }
   0x2   :  { %5114 = sst [smem:[#allocation44_spill]] %s5040_s1 }
   0x3   :  { %5115 = sst [smem:[#allocation45_spill]] %s5041_s2 }
   0x4   :  { %11 = vsyncpa [#allocation6], 0 }
   0x5   :  { %13 = vsyncpa [#allocation6 + $0x1], 0 }
   0x6   :  { %14 = vsyncpa [#allocation9], 0 }
   0x7   :  { %16 = vsyncpa [#allocation9 + $0x1], 0 }
   0x8   :  { %17 = vsyncpa [#allocation12], 0 }
   0x9   :  { %19 = vsyncpa [#allocation12 + $0x1], 0 }
   0xa   :  { %20 = vsyncpa [#allocation7], 0 }
   0xb   :  { %22 = vsyncpa [#allocation7 + $0x1], 0 }
   0xc   :  { %23 = vsyncpa [#allocation15], 0 }
   0xd   :  { %25 = vsyncpa [#allocation15 + $0x1], 0  ;;  %s3656_s18 = smov 0   ;;  %s3658_s19 = smov 0  }
   0xe   :  { %s3660_s20 = smov 0   ;;  %s3662_s21 = smov 0  }
   0xf   :  { %s3664_s22 = smov 0   ;;  %s3666_s23 = smov 0  }
  0x10 LB: > { %5116 = sst [smem:[#allocation21_spill]] %s3598_s20  ;;  %s3687_s24 = sadd.s32 4294967295, %s3610_s23   ;;  %s3610_s23 = sphi %s3666_s23, %s31_s23   ;;  %s3606_s22 = sphi %s3664_s22, %s5257_s22   ;;  %s3602_s21 = sphi %s3662_s21, %s5256_s21   ;;  %s3598_s20 = sphi %s3660_s20, %s5252_s20   ;;  %s3594_s19 = sphi %s3658_s19, %s5255_s19   ;;  %s3590_s18 = sphi %s3656_s18, %s5254_s18  }
  0x11   : > { %s3070_s25 = sadd.s32 4294967294, %s3610_s23   ;;  %s43_s26 = sadd.s32 1, %s3606_s22 }
  0x12   : > { %s86_s27 = sadd.s32 1, %s3598_s20  ;;  %p45_p0 = scmp.ge.s32.totalorder %s43_s26, 2 }
  0x13   : > { %p93_p1 = scmp.ne.s32.totalorder %s3598_s20, %s3594_s19  ;;  %p94_p2 = scmp.eq.s32.totalorder %s3610_s23, 0 }
  0x14   : > { %p99_p3 = scmp.ne.s32.totalorder %s3594_s19, %s3590_s18  ;;  %s5259_s26 = smov (%p45_p0, %s43_s26), 0 }
  0x15   : > { %5117 = sst [smem:[#allocation22_spill]] %s5259_s26  ;;  %p3701_p4 = por %p94_p2, %p93_p1 }
  0x16   : > { %p5045_p5 = scmp.eq.s32.totalorder %s3687_s24, 0  ;;  %s83_s29 = ssub.s32 %s3606_s22, %s5259_s26 }
  0x17   : > { %p187_p6 = scmp.eq.s32.totalorder %s3687_s24, 1  ;;  %p84_p7 = scmp.eq.s32.totalorder %s83_s29, 0 }
  0x18   : > { %p3711_p8 = por %p5045_p5, %p99_p3  ;;  %p193_p10 = scmp.eq.s32.totalorder %s3070_s25, 1 }
  0x19   : > { %p3715_p9 = por %p187_p6, %p93_p1  ;;  %p3193_p13 = scmp.lt.s32.totalorder %s3610_s23, 2 }
  0x1a   : > { %s3720_s7 = scalar_select %p84_p7, %s3598_s20, %s86_s27  }
  0x1b   : > { %s5120_s6 = scalar_select %p3715_p9, 1, 0 }
  0x1c   : > { %5121 = sst [smem:[#allocation23_spill]] %s3720_s7  ;;  %p3722_p11 = por %p193_p10, %p99_p3 }
  0x1d   : > { %s265_s9 = sand.u32 1, %s3610_s23   ;;  %s3730_s10 = sand.u32 1, %s3598_s20  }
  0x1e   : > { %s5122_s8 = scalar_select %p3722_p11, 1, 0 }
  0x1f   : > { %s3074_s11 = sshll.u32 %s3730_s10, 9  ;;  %s3148_s12 = sshll.u32 %s3606_s22, 13 }
  0x20   : > { %s5123_s1 = sld [smem:[#allocation44_spill]]  ;;  %s269_s16 = scalar_lea.vmem [#allocation8], %s3074_s11 }
  0x21   : > { %s276_s17 = sshll.u32 %s269_s16, 4  ;;  %p3743_p0 = pnand %p3193_p13, %p3701_p4  ;;  %s277_s17 = int_to_ptr.vmem [resolvable:$true] %s276_s17 }
  0x22   : > { %s3747_s27 = scalar_lea.sflag [#allocation9], %s265_s9  ;;  %s3395_s29 = scalar_lea.vmem %s277_s17, 8192 }
  0x23   : > { %p5048_p1 = pneg %p3743_p0  ;;  %p3396_p3 = scmp.ne.s32.totalorder %s277_s17, %s3395_s29 }
  0x24   : > { %s3612_s13 = smov [#allocation8]  }
  0x25   : > { %p3398_p6 = pnand %p3396_p3, %p5048_p1  ;;  %s3400_s14 = sshll.u32 %s3612_s13, 4  ;;  %s3401_s14 = int_to_ptr.vmem [resolvable:$false] %s3400_s14 }
  0x26   : > { %s275_s15 = scalar_lea.hbm %s5123_s1, %s3148_s12  ;;  %s3402_s28 = scalar_lea.vmem %s3401_s14, 16384 }
  0x27   : > { %p3399_p7 = pneg %p3398_p6  ;;  %p3403_p4 = scmp.lt.s32.totalorder %s277_s17, %s3401_s14 }
  0x28   : > { %p3404_p10 = scmp.lt.s32.totalorder %s3402_s28, %s3395_s29 }
  0x2a   : > { %p3405_p12 = por %p3404_p10, %p3403_p4 }
  0x2c   : > { %p3406_p5 = pnand %p3405_p12, %p3399_p7 }
  0x2e   : > { %3409 = shalt.err (!%p3406_p5)
}
  0x2f   : > { %s5050_s16 = smov 512   ;;  %s3614_s9 = smov 32  }
  0x30   : > { %3179 = dma.hbm_to_vmem [thread:$0]  (!%p3743_p0), %s275_s15, 8192, %s277_s17, %s3747_s27, %s5050_s16, %s5050_s16, %s3614_s9  }
  0x31   : > { %s5125_s2 = sld [smem:[#allocation45_spill]]  ;;  %s290_s28 = scalar_lea.vmem [#allocation10], %s3074_s11 }
  0x32   : > { %s297_s1 = sshll.u32 %s290_s28, 4  ;;  %p3083_p5 = scmp.ge.s32.totalorder %s3610_s23, 1  ;;  %s3767_s1 = int_to_ptr.vmem [resolvable:$true] %s297_s1 }
  0x33   : > { %p324_p12 = scmp.lt.s32.totalorder %s3610_s23, 3  ;;  %s3615_s7 = smov [#allocation5]  }
  0x34   : > { %s255_s20 = sshll.u32 %s3615_s7, 4  ;;  %p3779_p6 = pnand %p3193_p13, %p94_p2  ;;  %s256_s20 = int_to_ptr.vmem [resolvable:$true] %s255_s20 }
  0x35   : > { %p3771_p3 = pnand %p3083_p5, %p324_p12  ;;  %s3421_s11 = scalar_lea.vmem %s256_s20, 1024 }
  0x36   : > { %p3412_p7 = pneg %p3779_p6  ;;  %p3422_p4 = scmp.ne.s32.totalorder %s256_s20, %s3421_s11 }
  0x37   : > { %s3763_s29 = scalar_lea.hbm %s5125_s2, %s3148_s12  ;;  %s3428_s12 = scalar_lea.vmem %s256_s20, 2048 }
  0x38   : > { %p3424_p10 = pnand %p3422_p4, %p3412_p7  ;;  %p3429_p5 = scmp.lt.s32.totalorder %s256_s20, %s256_s20 }
  0x39   : > { %p3430_p12 = scmp.lt.s32.totalorder %s3428_s12, %s3421_s11 }
  0x3a   : > { %p3425_p1 = pneg %p3424_p10 }
  0x3b   : > { %p3431_p11 = por %p3430_p12, %p3429_p5 }
  0x3d   : > { %p3432_p9 = pnand %p3431_p11, %p3425_p1 }
  0x3f   : > { %3435 = shalt.err (!%p3432_p9)
}
  0x40   : > { %s3616_s7 = smov 128   ;;  %s3617_s17 = smov 8  }
  0x41   : > { %s5128_s0 = sld [smem:[#allocation43_spill]]  ;;  %s3449_s28 = scalar_lea.vmem %s3767_s1, 8192 }
  0x42   : > { %p3450_p2 = scmp.ne.s32.totalorder %s3767_s1, %s3449_s28  ;;  %p5129_p13 = pneg %p3743_p0 }
  0x43   : > { %s3618_s11 = smov [#allocation10]  }
  0x44   : > { %p3452_p7 = pnand %p3450_p2, %p5129_p13  ;;  %s3454_s12 = sshll.u32 %s3618_s11, 4  ;;  %s3455_s12 = int_to_ptr.vmem [resolvable:$false] %s3454_s12 }
  0x45   : > { %s3456_s16 = scalar_lea.vmem %s3455_s12, 16384  ;;  %p3457_p9 = scmp.lt.s32.totalorder %s3767_s1, %s3455_s12 }
  0x46   : > { %p3453_p4 = pneg %p3452_p7  ;;  %p3458_p11 = scmp.lt.s32.totalorder %s3456_s16, %s3449_s28 }
  0x47   : > { %3176 = dma.hbm_to_vmem [thread:$0]  (!%p3779_p6), %s5128_s0, 1024, %s256_s20, [#allocation6], %s3616_s7, %s3616_s7, %s3617_s17  }
  0x48   : > { %p3459_p1 = por %p3458_p11, %p3457_p9 }
  0x4a   : > { %p3460_p10 = pnand %p3459_p1, %p3453_p4 }
  0x4c   : > { %3463 = shalt.err (!%p3460_p10)
}
  0x4d   : > { %s5130_s15 = smov 512   ;;  %s3080_s20 = sshll.u32 %s3730_s10, 2 }
  0x4e   : > { %3182 = dma.hbm_to_vmem [thread:$0]  (!%p3743_p0), %s3763_s29, 8192, %s3767_s1, %s3747_s27, %s5130_s15, %s5130_s15, %s3614_s9  }
  0x4f   : > { %s3150_s7 = sshll.u32 %s3606_s22, 6  ;;  %s311_s14 = scalar_lea.vmem [#allocation11], %s3080_s20 }
  0x50   : > { %s317_s13 = scalar_lea.hbm %s5042_s3, %s3150_s7  ;;  %s319_s28 = sshll.u32 %s311_s14, 4  ;;  %s320_s28 = int_to_ptr.vmem [resolvable:$true] %s319_s28 }
  0x51   : > { %s308_s11 = scalar_lea.sflag [#allocation12], %s3730_s10  ;;  %s3477_s12 = scalar_lea.vmem %s320_s28, 64 }
  0x52   : > { %p3478_p6 = scmp.ne.s32.totalorder %s320_s28, %s3477_s12  ;;  %p5131_p5 = pmov %p5129_p13 }
  0x53   : > { %s3619_s0 = smov [#allocation11]  }
  0x54   : > { %p3480_p12 = pnand %p3478_p6, %p5131_p5  ;;  %s3482_s2 = sshll.u32 %s3619_s0, 4  ;;  %s3483_s2 = int_to_ptr.vmem [resolvable:$false] %s3482_s2 }
  0x55   : > { %s3484_s1 = scalar_lea.vmem %s3483_s2, 128  ;;  %p3485_p13 = scmp.lt.s32.totalorder %s320_s28, %s3483_s2 }
  0x56   : > { %p3481_p2 = pneg %p3480_p12  ;;  %p3486_p7 = scmp.lt.s32.totalorder %s3484_s1, %s3477_s12 }
  0x58   : > { %p3487_p4 = por %p3486_p7, %p3485_p13 }
  0x5a   : > { %p3488_p9 = pnand %p3487_p4, %p3481_p2 }
  0x5c   : > { %3491 = shalt.err (!%p3488_p9)
}
  0x5d   : > { %3185 = dma.hbm_to_vmem [thread:$0]  (!%p3743_p0), %s317_s13, 64, %s320_s28, %s308_s11  }
  0x5e   : > { %328 = sbr.rel (%p3771_p3) target bundleno = 2219 (0x8ab), region = 36 }
  0x63   : > { %p5132_p11 = scmp.eq.s32.totalorder %s3687_s24, 0 }
  0x65   : > { %3569 = dma.done.wait (%p5132_p11), [#allocation6], 1024   ;;  %p5133_p1 = pmov %p5132_p11 }
  0x66   : > { %s339_s0 = sand.u32 1, %s3687_s24   ;;  %s3823_s2 = sand.u32 1, %s3594_s19  }
  0x67   : > { %3571 = vsyncadd (%p5133_p1), [#allocation6], 4294966272  ;;  %s3085_s10 = sshll.u32 %s3823_s2, 9  ;;  %s340_s27 = scalar_lea.sflag [#allocation9], %s339_s0 }
  0x68   : > { %s3826_s25 = scalar_lea.vmem [#allocation8], %s3085_s10 }
  0x69   : > { %3573 = dma.done.wait (%p3711_p8), %s340_s27, 16384  }
  0x6a   : > { %3575 = vsyncadd (%p3711_p8), %s340_s27, 4294950912  ;;  %s3087_s26 = sshll.u32 %s3823_s2, 2  ;;  %s3833_s9 = scalar_lea.vmem [#allocation10], %s3085_s10 }
  0x6b   : > { %s358_s29 = scalar_lea.sflag [#allocation12], %s3823_s2  ;;  %s3836_s24 = scalar_lea.vmem [#allocation11], %s3087_s26 }
  0x6c   : > { %3577 = dma.done.wait (%p3711_p8), %s358_s29, 64  }
  0x6d   : > { %3579 = vsyncadd (%p3711_p8), %s358_s29, 4294967232  ;;  %v5053_v0 = vmov 0.0   ;;  %v495_v1 = vld [vmem:[%s3826_s25 + $0x1e8] sm:$0xff]  ;;  %v497_v2 = vld [vmem:[%s3826_s25 + $0x1f8] sm:$0xff]  ;;  %s3151_s30 = smul.u32 224, %s3602_s21  ;;  %s3088_s20 = sshll.u32 %s3823_s2, 6 }
  0x6e   : > { %584 = vmatprep.mubr.f32.mxu0 %v5053_v0  ;;  %697 = vmatprep.mubr.f32.mxu1 %v5053_v0  ;;  %v494_v3 = vld [vmem:[%s3826_s25 + $0x1e0] sm:$0xff]  ;;  %v496_v4 = vld [vmem:[%s3826_s25 + $0x1f0] sm:$0xff]  ;;  %v491_v5 = vld [vmem:[%s3826_s25 + $0x1c8] sm:$0xff]  ;;  %s3095_s7 = smul.u32 56, %s3602_s21  ;;  %s4297_s17 = scalar_lea.vmem [#allocation13], %s3088_s20 }
  0x6f   : > { %520 = vmatprep.subr.mxu0 %v495_v1  ;;  %633 = vmatprep.subr.mxu1 %v497_v2  ;;  %v493_v6 = vld [vmem:[%s3826_s25 + $0x1d8] sm:$0xff]  ;;  %v490_v7 = vld [vmem:[%s3826_s25 + $0x1c0] sm:$0xff]  ;;  %v492_v8 = vld [vmem:[%s3826_s25 + $0x1d0] sm:$0xff]  ;;  %s781_s15 = scalar_lea.vmem [#allocation2], %s3151_s30  ;;  %s1028_s13 = smul.u32 6, %s3602_s21 }
  0x70   : > { %521 = vmatpush1.msra.mxu0 %v494_v3  ;;  %634 = vmatpush1.msra.mxu1 %v496_v4  ;;  %v487_v9 = vld [vmem:[%s3826_s25 + $0x1a8] sm:$0xff]  ;;  %v489_v10 = vld [vmem:[%s3826_s25 + $0x1b8] sm:$0xff]  ;;  %v486_v11 = vld [vmem:[%s3826_s25 + $0x1a0] sm:$0xff]  ;;  %s1025_s16 = scalar_lea.vmem %s4297_s17, %s3095_s7 [#allocation13]  ;;  %s4366_s14 = ssub.s32 1, %s3602_s21 }
  0x71   : > { %522 = vmatprep.subr.mxu0 %v491_v5  ;;  %635 = vmatprep.subr.mxu1 %v493_v6  ;;  %v488_v12 = vld [vmem:[%s3826_s25 + $0x1b0] sm:$0xff]  ;;  %v483_v13 = vld [vmem:[%s3826_s25 + $0x188] sm:$0xff]  ;;  %v485_v14 = vld [vmem:[%s3826_s25 + $0x198] sm:$0xff]  ;;  %s4369_s28 = sadd.s32 %s1028_s13, %s4366_s14  ;;  %s1279_s10 = smul.u32 5, %s3602_s21 }
  0x72   : > { %523 = vmatpush1.msra.mxu0 %v490_v7  ;;  %636 = vmatpush1.msra.mxu1 %v492_v8  ;;  %v482_v15 = vld [vmem:[%s3826_s25 + $0x180] sm:$0xff]  ;;  %v484_v16 = vld [vmem:[%s3826_s25 + $0x190] sm:$0xff]  ;;  %v479_v17 = vld [vmem:[%s3826_s25 + $0x168] sm:$0xff]  ;;  %s3152_s11 = sshll.u32 %s4369_s28, 5  ;;  %s3101_s1 = sshll.u32 %s4369_s28, 3 }
  0x73   : > { %524 = vmatprep.subr.mxu0 %v487_v9  ;;  %637 = vmatprep.subr.mxu1 %v489_v10  ;;  %v481_v18 = vld [vmem:[%s3826_s25 + $0x178] sm:$0xff]  ;;  %v478_v19 = vld [vmem:[%s3826_s25 + $0x160] sm:$0xff]  ;;  %v480_v20 = vld [vmem:[%s3826_s25 + $0x170] sm:$0xff]  ;;  %s1032_s12 = scalar_lea.vmem [#allocation2], %s3152_s11  ;;  %s1276_s0 = scalar_lea.vmem %s4297_s17, %s3101_s1 [#allocation13] }
  0x74   : > { %525 = vmatpush1.msra.mxu0 %v486_v11  ;;  %638 = vmatpush1.msra.mxu1 %v488_v12  ;;  %v475_v21 = vld [vmem:[%s3826_s25 + $0x148] sm:$0xff]  ;;  %v477_v22 = vld [vmem:[%s3826_s25 + $0x158] sm:$0xff]  ;;  %v474_v23 = vld [vmem:[%s3826_s25 + $0x140] sm:$0xff]  ;;  %s3102_s27 = sshll.u32 %s4366_s14, 1  ;;  %s3109_s20 = sshll.u32 %s3602_s21, 2 }
  0x75   : > { %526 = vmatprep.subr.mxu0 %v483_v13  ;;  %639 = vmatprep.subr.mxu1 %v485_v14  ;;  %v476_v24 = vld [vmem:[%s3826_s25 + $0x150] sm:$0xff]  ;;  %v471_v25 = vld [vmem:[%s3826_s25 + $0x128] sm:$0xff]  ;;  %v473_v26 = vld [vmem:[%s3826_s25 + $0x138] sm:$0xff]  ;;  %s3116_s1 = sshll.u32 %s4366_s14, 2  ;;  %p5248_p0 = scmp.ne.s32.totalorder %s5120_s6, 0 }
  0x76   : > { %527 = vmatpush1.msra.mxu0 %v482_v15  ;;  %640 = vmatpush1.msra.mxu1 %v484_v16  ;;  %v470_v27 = vld [vmem:[%s3826_s25 + $0x120] sm:$0xff]  ;;  %v472_v28 = vld [vmem:[%s3826_s25 + $0x130] sm:$0xff]  ;;  %v467_v29 = vld [vmem:[%s3826_s25 + $0x108] sm:$0xff] }
  0x77   : > { %528 = vmatprep.subr.mxu0 %v479_v17  ;;  %641 = vmatprep.subr.mxu1 %v481_v18  ;;  %v469_v30 = vld [vmem:[%s3826_s25 + $0x118] sm:$0xff]  ;;  %v466_v31 = vld [vmem:[%s3826_s25 + $0x100] sm:$0xff]  ;;  %v468_v32 = vld [vmem:[%s3826_s25 + $0x110] sm:$0xff] }
  0x78   : > { %529 = vmatpush1.msra.mxu0 %v478_v19  ;;  %642 = vmatpush1.msra.mxu1 %v480_v20  ;;  %v463_v33 = vld [vmem:[%s3826_s25 + $0xe8] sm:$0xff]  ;;  %v465_v34 = vld [vmem:[%s3826_s25 + $0xf8] sm:$0xff]  ;;  %v462_v35 = vld [vmem:[%s3826_s25 + $0xe0] sm:$0xff] }
  0x79   : > { %530 = vmatprep.subr.mxu0 %v475_v21  ;;  %643 = vmatprep.subr.mxu1 %v477_v22  ;;  %v464_v36 = vld [vmem:[%s3826_s25 + $0xf0] sm:$0xff]  ;;  %v459_v37 = vld [vmem:[%s3826_s25 + $0xc8] sm:$0xff]  ;;  %v461_v38 = vld [vmem:[%s3826_s25 + $0xd8] sm:$0xff] }
  0x7a   : > { %531 = vmatpush1.msra.mxu0 %v474_v23  ;;  %644 = vmatpush1.msra.mxu1 %v476_v24  ;;  %v458_v39 = vld [vmem:[%s3826_s25 + $0xc0] sm:$0xff]  ;;  %v460_v40 = vld [vmem:[%s3826_s25 + $0xd0] sm:$0xff]  ;;  %v455_v41 = vld [vmem:[%s3826_s25 + $0xa8] sm:$0xff] }
  0x7b   : > { %532 = vmatprep.subr.mxu0 %v471_v25  ;;  %645 = vmatprep.subr.mxu1 %v473_v26  ;;  %v457_v42 = vld [vmem:[%s3826_s25 + $0xb8] sm:$0xff]  ;;  %v454_v43 = vld [vmem:[%s3826_s25 + $0xa0] sm:$0xff]  ;;  %v456_v44 = vld [vmem:[%s3826_s25 + $0xb0] sm:$0xff] }
  0x7c   : > { %533 = vmatpush1.msra.mxu0 %v470_v27  ;;  %646 = vmatpush1.msra.mxu1 %v472_v28  ;;  %v451_v45 = vld [vmem:[%s3826_s25 + $0x88] sm:$0xff]  ;;  %v453_v46 = vld [vmem:[%s3826_s25 + $0x98] sm:$0xff]  ;;  %v450_v47 = vld [vmem:[%s3826_s25 + $0x80] sm:$0xff] }
  0x7d   : > { %534 = vmatprep.subr.mxu0 %v467_v29  ;;  %647 = vmatprep.subr.mxu1 %v469_v30  ;;  %v452_v48 = vld [vmem:[%s3826_s25 + $0x90] sm:$0xff]  ;;  %v447_v49 = vld [vmem:[%s3826_s25 + $0x68] sm:$0xff]  ;;  %v449_v50 = vld [vmem:[%s3826_s25 + $0x78] sm:$0xff] }
  0x7e   : > { %535 = vmatpush1.msra.mxu0 %v466_v31  ;;  %648 = vmatpush1.msra.mxu1 %v468_v32  ;;  %v446_v51 = vld [vmem:[%s3826_s25 + $0x60] sm:$0xff]  ;;  %v448_v52 = vld [vmem:[%s3826_s25 + $0x70] sm:$0xff]  ;;  %v443_v53 = vld [vmem:[%s3826_s25 + $0x48] sm:$0xff] }
  0x7f   : > { %536 = vmatprep.subr.mxu0 %v463_v33  ;;  %649 = vmatprep.subr.mxu1 %v465_v34  ;;  %v445_v54 = vld [vmem:[%s3826_s25 + $0x58] sm:$0xff]  ;;  %v442_v55 = vld [vmem:[%s3826_s25 + $0x40] sm:$0xff]  ;;  %v444_v56 = vld [vmem:[%s3826_s25 + $0x50] sm:$0xff] }
  0x80   : > { %537 = vmatpush1.msra.mxu0 %v462_v35  ;;  %650 = vmatpush1.msra.mxu1 %v464_v36  ;;  %v439_v57 = vld [vmem:[%s3826_s25 + $0x28] sm:$0xff]  ;;  %v441_v58 = vld [vmem:[%s3826_s25 + $0x38] sm:$0xff]  ;;  %v438_v59 = vld [vmem:[%s3826_s25 + $0x20] sm:$0xff] }
  0x81   : > { %538 = vmatprep.subr.mxu0 %v459_v37  ;;  %651 = vmatprep.subr.mxu1 %v461_v38  ;;  %v440_v60 = vld [vmem:[%s3826_s25 + $0x30] sm:$0xff]  ;;  %v435_v61 = vld [vmem:[%s3826_s25 + $0x8] sm:$0xff]  ;;  %v437_v62 = vld [vmem:[%s3826_s25 + $0x18] sm:$0xff] }
  0x82   : > { %539 = vmatpush1.msra.mxu0 %v458_v39  ;;  %652 = vmatpush1.msra.mxu1 %v460_v40  ;;  %v434_v63 = vld [vmem:[%s3826_s25] sm:$0xff]  ;;  %v436_v1 = vld [vmem:[%s3826_s25 + $0x10] sm:$0xff]  ;;  %v3909_v3 = vld [vmem:[%s3833_s9 + $0x1e8] sm:$0xff]  ;;  %s4640_s25 = sadd.s32 %s3102_s27, %s1279_s10 }
  0x83   : > { %540 = vmatprep.subr.mxu0 %v455_v41  ;;  %653 = vmatprep.subr.mxu1 %v457_v42  ;;  %v426_v2 = vld [vmem:[#allocation5] sm:$0xff]  ;;  %v3912_v4 = vld [vmem:[%s3833_s9 + $0x1f8] sm:$0xff]  ;;  %v3918_v6 = vld [vmem:[%s3833_s9 + $0x1f0] sm:$0xff]  ;;  %s3153_s26 = sshll.u32 %s4640_s25, 5 }
  0x84   : > { %541 = vmatpush1.msra.mxu0 %v454_v43  ;;  %654 = vmatpush1.msra.mxu1 %v456_v44  ;;  %v3915_v5 = vld [vmem:[%s3833_s9 + $0x1e0] sm:$0xff]  ;;  %v427_v7 = vld [vmem:[#allocation5 + $0x8] sm:$0xff]  ;;  %v3936_v11 = vld [vmem:[%s3833_s9 + $0x1d8] sm:$0xff]  ;;  %s1283_s29 = scalar_lea.vmem [#allocation2], %s3153_s26 }
  0x85   : > { %542 = vmatprep.subr.mxu0 %v451_v45  ;;  %655 = vmatprep.subr.mxu1 %v453_v46  ;;  %v3924_v8 = vld [vmem:[%s3833_s9 + $0x1c8] sm:$0xff]  ;;  %v3929_v9 = vld [vmem:[%s3833_s9 + $0x1c0] sm:$0xff]  ;;  %v428_v12 = vld [vmem:[#allocation5 + $0x10] sm:$0xff] }
  0x86   : > { %543 = vmatpush1.msra.mxu0 %v450_v47  ;;  %656 = vmatpush1.msra.mxu1 %v452_v48  ;;  %v3933_v10 = vld [vmem:[%s3833_s9 + $0x1a8] sm:$0xff]  ;;  %v3943_v13 = vld [vmem:[%s3833_s9 + $0x1a0] sm:$0xff]  ;;  %v3946_v14 = vld [vmem:[%s3833_s9 + $0x1d0] sm:$0xff] }
  0x87   : > { %544 = vmatprep.subr.mxu0 %v447_v49  ;;  %657 = vmatprep.subr.mxu1 %v449_v50  ;;  %v3951_v15 = vld [vmem:[%s3833_s9 + $0x188] sm:$0xff]  ;;  %v3954_v16 = vld [vmem:[%s3833_s9 + $0x1b8] sm:$0xff]  ;;  %v3959_v17 = vld [vmem:[%s3833_s9 + $0x180] sm:$0xff] }
  0x88   : > { %545 = vmatpush1.msra.mxu0 %v446_v51  ;;  %658 = vmatpush1.msra.mxu1 %v448_v52  ;;  %v3962_v18 = vld [vmem:[%s3833_s9 + $0x1b0] sm:$0xff]  ;;  %v429_v19 = vld [vmem:[#allocation5 + $0x18] sm:$0xff]  ;;  %v3969_v20 = vld [vmem:[%s3833_s9 + $0x168] sm:$0xff] }
  0x89   : > { %546 = vmatprep.subr.mxu0 %v443_v53  ;;  %659 = vmatprep.subr.mxu1 %v445_v54  ;;  %v3972_v21 = vld [vmem:[%s3833_s9 + $0x198] sm:$0xff]  ;;  %v3977_v22 = vld [vmem:[%s3833_s9 + $0x160] sm:$0xff]  ;;  %v3980_v23 = vld [vmem:[%s3833_s9 + $0x190] sm:$0xff] }
  0x8a   : > { %547 = vmatpush1.msra.mxu0 %v442_v55  ;;  %660 = vmatpush1.msra.mxu1 %v444_v56  ;;  %v3983_v24 = vld [vmem:[%s3833_s9 + $0x148] sm:$0xff]  ;;  %v3986_v25 = vld [vmem:[%s3833_s9 + $0x178] sm:$0xff]  ;;  %v3993_v26 = vld [vmem:[%s3833_s9 + $0x140] sm:$0xff] }
  0x8b   : > { %548 = vmatprep.subr.mxu0 %v439_v57  ;;  %661 = vmatprep.subr.mxu1 %v441_v58  ;;  %v3996_v27 = vld [vmem:[%s3833_s9 + $0x170] sm:$0xff]  ;;  %v430_v28 = vld [vmem:[#allocation5 + $0x20] sm:$0xff]  ;;  %v4003_v29 = vld [vmem:[%s3833_s9 + $0x128] sm:$0xff] }
  0x8c   : > { %549 = vmatpush1.msra.mxu0 %v438_v59  ;;  %662 = vmatpush1.msra.mxu1 %v440_v60  ;;  %v4006_v30 = vld [vmem:[%s3833_s9 + $0x158] sm:$0xff]  ;;  %v4011_v31 = vld [vmem:[%s3833_s9 + $0x120] sm:$0xff]  ;;  %v4014_v32 = vld [vmem:[%s3833_s9 + $0x150] sm:$0xff] }
  0x8d   : > { %550 = vmatprep.subr.mxu0 %v435_v61  ;;  %663 = vmatprep.subr.mxu1 %v437_v62  ;;  %v4017_v33 = vld [vmem:[%s3833_s9 + $0x108] sm:$0xff]  ;;  %v4020_v34 = vld [vmem:[%s3833_s9 + $0x138] sm:$0xff]  ;;  %v4027_v35 = vld [vmem:[%s3833_s9 + $0x100] sm:$0xff] }
  0x8e   : > { %551 = vmatpush1.msra.mxu0 %v434_v63  ;;  %664 = vmatpush1.msra.mxu1 %v436_v1  ;;  %v4030_v36 = vld [vmem:[%s3833_s9 + $0x130] sm:$0xff]  ;;  %v431_v37 = vld [vmem:[#allocation5 + $0x28] sm:$0xff]  ;;  %v4040_v39 = vld [vmem:[%s3833_s9 + $0x118] sm:$0xff] }
  0x8f   : > { %585 = vmatmul.mubr.f32.vlgmr.msra.gmra.mxu0 %v426_v2  ;;  %698 = vmatmul.mubr.f32.vlgmr.msra.gmra.mxu1 %v426_v2  ;;  %v4037_v38 = vld [vmem:[%s3833_s9 + $0xe8] sm:$0xff]  ;;  %v4045_v40 = vld [vmem:[%s3833_s9 + $0xe0] sm:$0xff]  ;;  %v4048_v41 = vld [vmem:[%s3833_s9 + $0x110] sm:$0xff] }
  0x90   : > { %590 = vmatprep.mubr.f32.mxu0 %v5053_v0  ;;  %703 = vmatprep.mubr.f32.mxu1 %v5053_v0  ;;  %v4051_v42 = vld [vmem:[%s3833_s9 + $0xc8] sm:$0xff]  ;;  %v4054_v43 = vld [vmem:[%s3833_s9 + $0xf8] sm:$0xff]  ;;  %v4061_v44 = vld [vmem:[%s3833_s9 + $0xc0] sm:$0xff] }
  0x91   : > { %851 = vmatprep.subr.mxu0 %v3909_v3  ;;  %922 = vmatprep.subr.mxu1 %v3912_v4  ;;  %v4064_v45 = vld [vmem:[%s3833_s9 + $0xf0] sm:$0xff]  ;;  %v4071_v47 = vld [vmem:[%s3833_s9 + $0xa8] sm:$0xff]  ;;  %v4074_v48 = vld [vmem:[%s3833_s9 + $0xd8] sm:$0xff] }
  0x92   : > { %852 = vmatpush1.msra.mxu0 %v3915_v5  ;;  %923 = vmatpush1.msra.mxu1 %v3918_v6  ;;  %v432_v46 = vld [vmem:[#allocation5 + $0x30] sm:$0xff]  ;;  %v4079_v49 = vld [vmem:[%s3833_s9 + $0xa0] sm:$0xff]  ;;  %v4085_v51 = vld [vmem:[%s3833_s9 + $0x88] sm:$0xff] }
  0x93   : > { %591 = vmatmul.mubr.f32.gmra.mxu0 %v427_v7  ;;  %704 = vmatmul.mubr.f32.gmra.mxu1 %v427_v7  ;;  %v4082_v50 = vld [vmem:[%s3833_s9 + $0xd0] sm:$0xff]  ;;  %v4088_v52 = vld [vmem:[%s3833_s9 + $0xb8] sm:$0xff]  ;;  %v4095_v53 = vld [vmem:[%s3833_s9 + $0x80] sm:$0xff] }
  0x94   : > { %853 = vmatprep.subr.mxu0 %v3924_v8  ;;  %596 = vmatprep.mubr.f32.mxu0 %v5053_v0  ;;  %v4098_v54 = vld [vmem:[%s3833_s9 + $0xb0] sm:$0xff]  ;;  %v433_v55 = vld [vmem:[#allocation5 + $0x38] sm:$0xff]  ;;  %v4105_v56 = vld [vmem:[%s3833_s9 + $0x68] sm:$0xff] }
  0x95   : > { %709 = vmatprep.mubr.f32.mxu1 %v5053_v0  ;;  %854 = vmatpush1.msra.mxu0 %v3929_v9  ;;  %5134 = vst [vmem:[#allocation24_spill] sm:$0xff] %v4105_v56  ;;  %v4108_v57 = vld [vmem:[%s3833_s9 + $0x98] sm:$0xff]  ;;  %v4113_v58 = vld [vmem:[%s3833_s9 + $0x60] sm:$0xff]  ;;  %v4116_v59 = vld [vmem:[%s3833_s9 + $0x90] sm:$0xff] }
  0x96   : > { %855 = vmatprep.subr.mxu0 %v3933_v10  ;;  %924 = vmatprep.subr.mxu1 %v3936_v11  ;;  %5135 = vst [vmem:[#allocation25_spill] sm:$0xff] %v4113_v58  ;;  %5136 = vst [vmem:[#allocation26_spill] sm:$0xff] %v4116_v59  ;;  %v4119_v60 = vld [vmem:[%s3833_s9 + $0x48] sm:$0xff]  ;;  %v4122_v61 = vld [vmem:[%s3833_s9 + $0x78] sm:$0xff] }
  0x97   : > { %597 = vmatmul.mubr.f32.gmra.mxu0 %v428_v12  ;;  %710 = vmatmul.mubr.f32.gmra.mxu1 %v428_v12  ;;  %5137 = vst [vmem:[#allocation27_spill] sm:$0xff] %v4119_v60  ;;  %5138 = vst [vmem:[#allocation28_spill] sm:$0xff] %v4122_v61  ;;  %v4127_v62 = vld [vmem:[%s3833_s9 + $0x40] sm:$0xff]  ;;  %v4130_v63 = vld [vmem:[%s3833_s9 + $0x70] sm:$0xff] }
  0x98   : > { %856 = vmatpush1.msra.mxu0 %v3943_v13  ;;  %925 = vmatpush1.msra.mxu1 %v3946_v14  ;;  %5139 = vst [vmem:[#allocation29_spill] sm:$0xff] %v4127_v62  ;;  %5140 = vst [vmem:[#allocation30_spill] sm:$0xff] %v4130_v63  ;;  %v4135_v1 = vld [vmem:[%s3833_s9 + $0x28] sm:$0xff]  ;;  %v4138_v2 = vld [vmem:[%s3833_s9 + $0x58] sm:$0xff] }
  0x99   : > { %857 = vmatprep.subr.mxu0 %v3951_v15  ;;  %926 = vmatprep.subr.mxu1 %v3954_v16  ;;  %5141 = vst [vmem:[#allocation31_spill] sm:$0xff] %v4135_v1  ;;  %5142 = vst [vmem:[#allocation32_spill] sm:$0xff] %v4138_v2  ;;  %v4143_v7 = vld [vmem:[%s3833_s9 + $0x20] sm:$0xff]  ;;  %v4146_v12 = vld [vmem:[%s3833_s9 + $0x50] sm:$0xff] }
  0x9a   : > { %602 = vmatprep.mubr.f32.mxu0 %v5053_v0  ;;  %715 = vmatprep.mubr.f32.mxu1 %v5053_v0  ;;  %5143 = vst [vmem:[#allocation33_spill] sm:$0xff] %v4143_v7  ;;  %5144 = vst [vmem:[#allocation34_spill] sm:$0xff] %v4146_v12 }
  0x9b   : > { %858 = vmatpush1.msra.mxu0 %v3959_v17  ;;  %927 = vmatpush1.msra.mxu1 %v3962_v18 }
  0x9c   : > { %603 = vmatmul.mubr.f32.gmra.mxu0 %v429_v19  ;;  %716 = vmatmul.mubr.f32.gmra.mxu1 %v429_v19  ;;  %v4151_v19 = vld [vmem:[%s3833_s9 + $0x8] sm:$0xff] }
  0x9d   : > { %859 = vmatprep.subr.mxu0 %v3969_v20  ;;  %928 = vmatprep.subr.mxu1 %v3972_v21  ;;  %5145 = vst [vmem:[#allocation35_spill] sm:$0xff] %v4151_v19 }
  0x9e   : > { %860 = vmatpush1.msra.mxu0 %v3977_v22  ;;  %929 = vmatpush1.msra.mxu1 %v3980_v23 }
  0x9f   : > { %861 = vmatprep.subr.mxu0 %v3983_v24  ;;  %930 = vmatprep.subr.mxu1 %v3986_v25 }
  0xa0   : > { %608 = vmatprep.mubr.f32.mxu0 %v5053_v0  ;;  %721 = vmatprep.mubr.f32.mxu1 %v5053_v0 }
  0xa1   : > { %862 = vmatpush1.msra.mxu0 %v3993_v26  ;;  %931 = vmatpush1.msra.mxu1 %v3996_v27 }
  0xa2   : > { %609 = vmatmul.mubr.f32.gmra.mxu0 %v430_v28  ;;  %722 = vmatmul.mubr.f32.gmra.mxu1 %v430_v28  ;;  %v4154_v28 = vld [vmem:[%s3833_s9 + $0x38] sm:$0xff] }
  0xa3   : > { %863 = vmatprep.subr.mxu0 %v4003_v29  ;;  %932 = vmatprep.subr.mxu1 %v4006_v30  ;;  %5146 = vst [vmem:[#allocation36_spill] sm:$0xff] %v4154_v28 }
  0xa4   : > { %864 = vmatpush1.msra.mxu0 %v4011_v31  ;;  %933 = vmatpush1.msra.mxu1 %v4014_v32 }
  0xa5   : > { %865 = vmatprep.subr.mxu0 %v4017_v33  ;;  %934 = vmatprep.subr.mxu1 %v4020_v34 }
  0xa6   : > { %614 = vmatprep.mubr.f32.mxu0 %v5053_v0  ;;  %727 = vmatprep.mubr.f32.mxu1 %v5053_v0 }
  0xa7   : > { %866 = vmatpush1.msra.mxu0 %v4027_v35  ;;  %935 = vmatpush1.msra.mxu1 %v4030_v36 }
  0xa8   : > { %615 = vmatmul.mubr.f32.gmra.mxu0 %v431_v37  ;;  %728 = vmatmul.mubr.f32.gmra.mxu1 %v431_v37  ;;  %v4159_v37 = vld [vmem:[%s3833_s9] sm:$0xff] }
  0xa9   : > { %867 = vmatprep.subr.mxu0 %v4037_v38  ;;  %936 = vmatprep.subr.mxu1 %v4040_v39  ;;  %5147 = vst [vmem:[#allocation37_spill] sm:$0xff] %v4159_v37 }
  0xaa   : > { %868 = vmatpush1.msra.mxu0 %v4045_v40  ;;  %937 = vmatpush1.msra.mxu1 %v4048_v41 }
  0xab   : > { %869 = vmatprep.subr.mxu0 %v4051_v42  ;;  %938 = vmatprep.subr.mxu1 %v4054_v43 }
  0xac   : > { %620 = vmatprep.mubr.f32.mxu0 %v5053_v0  ;;  %733 = vmatprep.mubr.f32.mxu1 %v5053_v0 }
  0xad   : > { %870 = vmatpush1.msra.mxu0 %v4061_v44  ;;  %939 = vmatpush1.msra.mxu1 %v4064_v45 }
  0xae   : > { %621 = vmatmul.mubr.f32.gmra.mxu0 %v432_v46  ;;  %734 = vmatmul.mubr.f32.gmra.mxu1 %v432_v46  ;;  %v4164_v46 = vld [vmem:[%s3833_s9 + $0x30] sm:$0xff] }
  0xaf   : > { %871 = vmatprep.subr.mxu0 %v4071_v47  ;;  %940 = vmatprep.subr.mxu1 %v4074_v48  ;;  %5148 = vst [vmem:[#allocation38_spill] sm:$0xff] %v4164_v46 }
  0xb0   : > { %872 = vmatpush1.msra.mxu0 %v4079_v49  ;;  %941 = vmatpush1.msra.mxu1 %v4082_v50 }
  0xb1   : > { %873 = vmatprep.subr.mxu0 %v4085_v51  ;;  %942 = vmatprep.subr.mxu1 %v4088_v52 }
  0xb2   : > { %626 = vmatprep.mubr.f32.mxu0 %v5053_v0  ;;  %739 = vmatprep.mubr.f32.mxu1 %v5053_v0 }
  0xb3   : > { %874 = vmatpush1.msra.mxu0 %v4095_v53  ;;  %943 = vmatpush1.msra.mxu1 %v4098_v54 }
  0xb4   : > { %627 = vmatmul.mubr.f32.gmra.mxu0 %v433_v55  ;;  %740 = vmatmul.mubr.f32.gmra.mxu1 %v433_v55  ;;  %v4169_v55 = vld [vmem:[%s3833_s9 + $0x18] sm:$0xff] }
  0xb5   : > { %875 = vmatprep.subr.mxu0 %v4105_v56  ;;  %944 = vmatprep.subr.mxu1 %v4108_v57  ;;  %5149 = vst [vmem:[#allocation39_spill] sm:$0xff] %v4169_v55 }
  0xb6   : > { %876 = vmatpush1.msra.mxu0 %v4113_v58  ;;  %945 = vmatpush1.msra.mxu1 %v4116_v59 }
  0xb7   : > { %877 = vmatprep.subr.mxu0 %v4119_v60  ;;  %946 = vmatprep.subr.mxu1 %v4122_v61 }
  0xb8   : > { %878 = vmatpush1.msra.mxu0 %v4127_v62  ;;  %947 = vmatpush1.msra.mxu1 %v4130_v63 }
  0xb9   : > { %879 = vmatprep.subr.mxu0 %v4135_v1  ;;  %948 = vmatprep.subr.mxu1 %v4138_v2  ;;  %v4174_v1 = vld [vmem:[%s3833_s9 + $0x10] sm:$0xff] }
  0xba   : > { %880 = vmatpush1.msra.mxu0 %v4143_v7  ;;  %949 = vmatpush1.msra.mxu1 %v4146_v12  ;;  %5150 = vst [vmem:[#allocation40_spill] sm:$0xff] %v4174_v1 }
  0xbb   : > { %881 = vmatprep.subr.mxu0 %v4151_v19  ;;  %950 = vmatprep.subr.mxu1 %v4154_v28 }
  0xbc   : > { %882 = vmatpush1.msra.mxu0 %v4159_v37  ;;  %915 = vmatprep.mubr.f32.mxu0 %v5053_v0 }
  0xbd   : > { %951 = vmatpush1.msra.mxu1 %v4164_v46  ;;  %916 = vmatmul.mubr.f32.vlgmr.msra.gmra.mxu0 %v5053_v0 }
  0xbe   : > { %952 = vmatprep.subr.mxu1 %v4169_v55  ;;  %986 = vmatprep.mubr.f32.mxu1 %v5053_v0 }
  0xbf   : > { %953 = vmatpush1.msra.mxu1 %v4174_v1  ;;  %1102 = vmatprep.subr.mxu0 %v3909_v3 }
  0xc0   : > { %987 = vmatmul.mubr.f32.vlgmr.msra.gmra.mxu1 %v5053_v0  ;;  %1173 = vmatprep.subr.mxu1 %v3912_v4  ;;  %v5151_v0 = vld [vmem:[#allocation31_spill] sm:$0xff] }
  0xc1   : > { %1103 = vmatpush1.msra.mxu0 %v3915_v5  ;;  %1174 = vmatpush1.msra.mxu1 %v3918_v6 }
  0xc2   : > { %1104 = vmatprep.subr.mxu0 %v3924_v8  ;;  %1175 = vmatprep.subr.mxu1 %v3936_v11 }
  0xc3   : > { %1105 = vmatpush1.msra.mxu0 %v3929_v9  ;;  %1176 = vmatpush1.msra.mxu1 %v3946_v14 }
  0xc4   : > { %1106 = vmatprep.subr.mxu0 %v3933_v10  ;;  %1177 = vmatprep.subr.mxu1 %v3954_v16 }
  0xc5   : > { %1107 = vmatpush1.msra.mxu0 %v3943_v13  ;;  %1178 = vmatpush1.msra.mxu1 %v3962_v18 }
  0xc6   : > { %1108 = vmatprep.subr.mxu0 %v3951_v15  ;;  %1179 = vmatprep.subr.mxu1 %v3972_v21 }
  0xc7   : > { %1109 = vmatpush1.msra.mxu0 %v3959_v17  ;;  %1180 = vmatpush1.msra.mxu1 %v3980_v23 }
  0xc8   : > { %1110 = vmatprep.subr.mxu0 %v3969_v20  ;;  %1181 = vmatprep.subr.mxu1 %v3986_v25 }
  0xc9   : > { %1111 = vmatpush1.msra.mxu0 %v3977_v22  ;;  %1182 = vmatpush1.msra.mxu1 %v3996_v27 }
  0xca   : > { %1112 = vmatprep.subr.mxu0 %v3983_v24  ;;  %1183 = vmatprep.subr.mxu1 %v4006_v30 }
  0xcb   : > { %1113 = vmatpush1.msra.mxu0 %v3993_v26  ;;  %1184 = vmatpush1.msra.mxu1 %v4014_v32 }
  0xcc   : > { %1114 = vmatprep.subr.mxu0 %v4003_v29  ;;  %1185 = vmatprep.subr.mxu1 %v4020_v34 }
  0xcd   : > { %1115 = vmatpush1.msra.mxu0 %v4011_v31  ;;  %1186 = vmatpush1.msra.mxu1 %v4030_v36 }
  0xce   : > { %1116 = vmatprep.subr.mxu0 %v4017_v33  ;;  %1187 = vmatprep.subr.mxu1 %v4040_v39 }
  0xcf   : > { %1117 = vmatpush1.msra.mxu0 %v4027_v35  ;;  %1188 = vmatpush1.msra.mxu1 %v4048_v41 }
  0xd0   : > { %1118 = vmatprep.subr.mxu0 %v4037_v38  ;;  %1189 = vmatprep.subr.mxu1 %v4054_v43 }
  0xd1   : > { %1119 = vmatpush1.msra.mxu0 %v4045_v40  ;;  %1190 = vmatpush1.msra.mxu1 %v4064_v45 }
  0xd2   : > { %1120 = vmatprep.subr.mxu0 %v4051_v42  ;;  %1191 = vmatprep.subr.mxu1 %v4074_v48 }
  0xd3   : > { %1121 = vmatpush1.msra.mxu0 %v4061_v44  ;;  %1192 = vmatpush1.msra.mxu1 %v4082_v50 }
  0xd4   : > { %1122 = vmatprep.subr.mxu0 %v4071_v47  ;;  %1193 = vmatprep.subr.mxu1 %v4088_v52 }
  0xd5   : > { %1123 = vmatpush1.msra.mxu0 %v4079_v49  ;;  %1194 = vmatpush1.msra.mxu1 %v4098_v54 }
  0xd6   : > { %1124 = vmatprep.subr.mxu0 %v4085_v51  ;;  %1195 = vmatprep.subr.mxu1 %v4108_v57 }
  0xd7   : > { %1125 = vmatpush1.msra.mxu0 %v4095_v53  ;;  %1196 = vmatpush1.msra.mxu1 %v4116_v59 }
  0xd8   : > { %1126 = vmatprep.subr.mxu0 %v4105_v56  ;;  %1197 = vmatprep.subr.mxu1 %v4122_v61 }
  0xd9   : > { %1127 = vmatpush1.msra.mxu0 %v4113_v58  ;;  %1198 = vmatpush1.msra.mxu1 %v4130_v63 }
  0xda   : > { %1128 = vmatprep.subr.mxu0 %v4119_v60  ;;  %1199 = vmatprep.subr.mxu1 %v4138_v2  ;;  %v5152_v2 = vmov 0.0  }
  0xdb   : > { %1129 = vmatpush1.msra.mxu0 %v4127_v62  ;;  %1200 = vmatpush1.msra.mxu1 %v4146_v12  ;;  %v498_v12 = vld [vmem:[%s3836_s24] sm:$0xf]  ;;  %s3108_s24 = sshll.u32 %s4640_s25, 3 }
  0xdc   : > { %1130 = vmatprep.subr.mxu0 %v5151_v0  ;;  %1201 = vmatprep.subr.mxu1 %v4154_v28  ;;  %v500_v28 = vlaneseq  ;;  %s1527_s30 = scalar_lea.vmem %s4297_s17, %s3108_s24 [#allocation13]  ;;  %s3123_s24 = sshll.u32 %s3602_s21, 1 }
  0xdd   : > { %1131 = vmatpush1.msra.mxu0 %v4143_v7  ;;  %1202 = vmatpush1.msra.mxu1 %v4164_v46 }
  0xde   : > { %1132 = vmatprep.subr.mxu0 %v4151_v19  ;;  %1203 = vmatprep.subr.mxu1 %v4169_v55  ;;  %v501_v7 = vshrl.u32 %v500_v28, 7 }
  0xdf   : > { %1133 = vmatpush1.msra.mxu0 %v4159_v37  ;;  %1166 = vmatprep.mubr.f32.mxu0 %v5152_v2 }
  0xe0   : > { %1204 = vmatpush1.msra.mxu1 %v4174_v1  ;;  %1237 = vmatprep.mubr.f32.mxu1 %v5152_v2  ;;  %v502_v0 = vsub.s32 0, %v501_v7  ;;  %v510_v46 = vsub.s32 2, %v501_v7  ;;  %v506_v19 = vsub.s32 1, %v501_v7  ;;  %v514_v62 = vsub.s32 3, %v501_v7 }
  0xe1   : > { %1353 = vmatprep.subr.mxu0 %v3909_v3  ;;  %1424 = vmatprep.subr.mxu1 %v3912_v4 }
  0xe2   : > { %v4251_v55 = vrot.slane %v498_v12, %v502_v0  ;;  %v4253_v37 = vrot.slane %v498_v12, %v510_v46  ;;  %v4255_v60 = vrot.slane %v498_v12, %v506_v19  ;;  %v4257_v1 = vrot.slane %v498_v12, %v514_v62 }
 0x14f   : > { %v586_v2 = vpop.f32.mrf.mxu0  ;;  %v699_v63 = vpop.f32.mrf.mxu1 }
 0x150   : > { %v587_v3 = vadd.f32 %v586_v2, %v4251_v55  ;;  %v700_v4 = vadd.f32 %v699_v63, %v4253_v37 }
 0x151   : > { %v588_v28 = vpop.f32.mrf.mxu0  ;;  %v701_v58 = vpop.f32.mrf.mxu1 }
 0x152   : > { %746 = vst [vmem:[#allocation2] sm:$0xff] %v587_v3  ;;  %748 = vst [vmem:[#allocation2 + $0x10] sm:$0xff] %v700_v4  ;;  %v589_v7 = vadd.f32 %v588_v28, %v4255_v60  ;;  %v702_v0 = vadd.f32 %v701_v58, %v4257_v1 }
 0x153   : > { %v592_v46 = vpop.f32.mrf.mxu0  ;;  %v705_v61 = vpop.f32.mrf.mxu1 }
 0x154   : > { %747 = vst [vmem:[#allocation2 + $0x8] sm:$0xff] %v589_v7  ;;  %749 = vst [vmem:[#allocation2 + $0x18] sm:$0xff] %v702_v0  ;;  %v593_v62 = vadd.f32 %v592_v46, %v4251_v55  ;;  %v706_v12 = vadd.f32 %v705_v61, %v4253_v37 }
 0x155   : > { %v594_v19 = vpop.f32.mrf.mxu0  ;;  %v707_v2 = vpop.f32.mrf.mxu1 }
 0x156   : > { %750 = vst [vmem:[#allocation2 + $0x20] sm:$0xff] %v593_v62  ;;  %752 = vst [vmem:[#allocation2 + $0x30] sm:$0xff] %v706_v12  ;;  %v595_v63 = vadd.f32 %v594_v19, %v4255_v60  ;;  %v708_v3 = vadd.f32 %v707_v2, %v4257_v1 }
 0x157   : > { %v598_v4 = vpop.f32.mrf.mxu0  ;;  %v711_v28 = vpop.f32.mrf.mxu1 }
 0x158   : > { %751 = vst [vmem:[#allocation2 + $0x28] sm:$0xff] %v595_v63  ;;  %753 = vst [vmem:[#allocation2 + $0x38] sm:$0xff] %v708_v3  ;;  %v599_v58 = vadd.f32 %v598_v4, %v4251_v55  ;;  %v712_v7 = vadd.f32 %v711_v28, %v4253_v37 }
 0x159   : > { %v600_v0 = vpop.f32.mrf.mxu0  ;;  %v713_v46 = vpop.f32.mrf.mxu1 }
 0x15a   : > { %754 = vst [vmem:[#allocation2 + $0x40] sm:$0xff] %v599_v58  ;;  %756 = vst [vmem:[#allocation2 + $0x50] sm:$0xff] %v712_v7  ;;  %v601_v61 = vadd.f32 %v600_v0, %v4255_v60  ;;  %v714_v62 = vadd.f32 %v713_v46, %v4257_v1 }
 0x15c   : > { %755 = vst [vmem:[#allocation2 + $0x48] sm:$0xff] %v601_v61  ;;  %757 = vst [vmem:[#allocation2 + $0x58] sm:$0xff] %v714_v62  ;;  %v604_v12 = vpop.f32.mrf.mxu0  ;;  %v717_v19 = vpop.f32.mrf.mxu1 }
 0x15d   : > { %v605_v2 = vadd.f32 %v604_v12, %v4251_v55  ;;  %v718_v63 = vadd.f32 %v717_v19, %v4253_v37 }
 0x15e   : > { %v606_v3 = vpop.f32.mrf.mxu0  ;;  %v719_v4 = vpop.f32.mrf.mxu1 }
 0x15f   : > { %758 = vst [vmem:[#allocation2 + $0x60] sm:$0xff] %v605_v2  ;;  %760 = vst [vmem:[#allocation2 + $0x70] sm:$0xff] %v718_v63  ;;  %v607_v28 = vadd.f32 %v606_v3, %v4255_v60  ;;  %v720_v58 = vadd.f32 %v719_v4, %v4257_v1 }
 0x161   : > { %759 = vst [vmem:[#allocation2 + $0x68] sm:$0xff] %v607_v28  ;;  %761 = vst [vmem:[#allocation2 + $0x78] sm:$0xff] %v720_v58 }
 0x162   : > { %v610_v7 = vpop.f32.mrf.mxu0  ;;  %v723_v0 = vpop.f32.mrf.mxu1 }
 0x163   : > { %v611_v46 = vadd.f32 %v610_v7, %v4251_v55  ;;  %v724_v61 = vadd.f32 %v723_v0, %v4253_v37 }
 0x164   : > { %v612_v62 = vpop.f32.mrf.mxu0  ;;  %v725_v12 = vpop.f32.mrf.mxu1 }
 0x165   : > { %762 = vst [vmem:[#allocation2 + $0x80] sm:$0xff] %v611_v46  ;;  %764 = vst [vmem:[#allocation2 + $0x90] sm:$0xff] %v724_v61  ;;  %v613_v19 = vadd.f32 %v612_v62, %v4255_v60  ;;  %v726_v2 = vadd.f32 %v725_v12, %v4257_v1 }
 0x167   : > { %763 = vst [vmem:[#allocation2 + $0x88] sm:$0xff] %v613_v19  ;;  %765 = vst [vmem:[#allocation2 + $0x98] sm:$0xff] %v726_v2 }
 0x168   : > { %v616_v63 = vpop.f32.mrf.mxu0  ;;  %v729_v3 = vpop.f32.mrf.mxu1 }
 0x169   : > { %v617_v4 = vadd.f32 %v616_v63, %v4251_v55  ;;  %v730_v28 = vadd.f32 %v729_v3, %v4253_v37 }
 0x16a   : > { %v618_v58 = vpop.f32.mrf.mxu0  ;;  %v731_v7 = vpop.f32.mrf.mxu1 }
 0x16b   : > { %766 = vst [vmem:[#allocation2 + $0xa0] sm:$0xff] %v617_v4  ;;  %768 = vst [vmem:[#allocation2 + $0xb0] sm:$0xff] %v730_v28  ;;  %v619_v0 = vadd.f32 %v618_v58, %v4255_v60  ;;  %v732_v46 = vadd.f32 %v731_v7, %v4257_v1 }
 0x16d   : > { %767 = vst [vmem:[#allocation2 + $0xa8] sm:$0xff] %v619_v0  ;;  %769 = vst [vmem:[#allocation2 + $0xb8] sm:$0xff] %v732_v46 }
 0x16e   : > { %v622_v61 = vpop.f32.mrf.mxu0  ;;  %v735_v62 = vpop.f32.mrf.mxu1 }
 0x16f   : > { %v623_v12 = vadd.f32 %v622_v61, %v4251_v55  ;;  %v736_v19 = vadd.f32 %v735_v62, %v4253_v37 }
 0x170   : > { %v624_v2 = vpop.f32.mrf.mxu0  ;;  %v737_v63 = vpop.f32.mrf.mxu1 }
 0x171   : > { %770 = vst [vmem:[#allocation2 + $0xc0] sm:$0xff] %v623_v12  ;;  %772 = vst [vmem:[#allocation2 + $0xd0] sm:$0xff] %v736_v19  ;;  %v625_v3 = vadd.f32 %v624_v2, %v4255_v60  ;;  %v738_v4 = vadd.f32 %v737_v63, %v4257_v1 }
 0x173   : > { %771 = vst [vmem:[#allocation2 + $0xc8] sm:$0xff] %v625_v3  ;;  %773 = vst [vmem:[#allocation2 + $0xd8] sm:$0xff] %v738_v4 }
 0x174   : > { %v628_v28 = vpop.f32.mrf.mxu0  ;;  %v741_v58 = vpop.f32.mrf.mxu1 }
 0x175   : > { %v629_v7 = vadd.f32 %v628_v28, %v4251_v55  ;;  %v742_v0 = vadd.f32 %v741_v58, %v4253_v37 }
 0x176   : > { %v630_v46 = vpop.f32.mrf.mxu0  ;;  %v743_v61 = vpop.f32.mrf.mxu1 }
 0x177   : > { %774 = vst [vmem:[#allocation2 + $0xe0] sm:$0xff] %v629_v7  ;;  %776 = vst [vmem:[#allocation2 + $0xf0] sm:$0xff] %v742_v0  ;;  %v631_v62 = vadd.f32 %v630_v46, %v4255_v60  ;;  %v744_v12 = vadd.f32 %v743_v61, %v4257_v1 }
 0x179   : > { %775 = vst [vmem:[#allocation2 + $0xe8] sm:$0xff] %v631_v62  ;;  %777 = vst [vmem:[#allocation2 + $0xf8] sm:$0xff] %v744_v12 }
 0x17d   : > { %v917_v19 = vpop.f32.mrf.mxu0 }
 0x17f   : > { %v919_v3 = vpop.f32.mrf.mxu0 }
 0x180   : > { %v782_v2 = vld [vmem:[%s781_s15] sm:$0xff]  ;;  %v783_v63 = vld [vmem:[%s781_s15 + $0x8] sm:$0xff]  ;;  %v988_v58 = vpop.f32.mrf.mxu1  ;;  %v785_v7 = vld [vmem:[%s781_s15 + $0x18] sm:$0xff] }
 0x181   : > { %v993_v4 = vadd.f32 %v917_v19, %v782_v2  ;;  %v994_v55 = vadd.f32 %v919_v3, %v783_v63  ;;  %v784_v46 = vld [vmem:[%s781_s15 + $0x10] sm:$0xff]  ;;  %s1529_s15 = smul.u32 3, %s4366_s14 }
 0x182   : > { %v990_v0 = vpop.f32.mrf.mxu1  ;;  %v995_v61 = vadd.f32 %v988_v58, %v784_v46  ;;  %v4381_v46 = vld [vmem:[%s3833_s9 + $0x1e8] sm:$0xff] }
 0x183   : > { %v3092_v28 = vmul.f32 -1.442695, %v993_v4  ;;  %v3093_v37 = vmul.f32 -1.442695, %v994_v55  ;;  %v996_v60 = vadd.f32 %v990_v0, %v785_v7  ;;  %s4717_s7 = sadd.s32 %s3109_s20, %s1529_s15 }
 0x184   : > { %s3115_s28 = sshll.u32 %s4717_s7, 3 }
 0x185   : > { %3254 = vpow2.f32 %v3092_v28  ;;  %v3094_v1 = vmul.f32 -1.442695, %v996_v60  ;;  %s1778_s11 = scalar_lea.vmem %s4297_s17, %s3115_s28 [#allocation13] }
 0x186   : > { %3256 = vpow2.f32 %v3093_v37 }
 0x187   : > { %3258 = vpow2.f32 %v3094_v1  ;;  %v4384_v1 = vld [vmem:[%s3833_s9 + $0x1f8] sm:$0xff] }
 0x188   : > { %3260 = vtanh.f32 %v995_v61  ;;  %v4389_v61 = vld [vmem:[%s3833_s9 + $0x1e0] sm:$0xff] }
 0x192   : > { %v3255_v62 = vpop.eup %3254 }
 0x193   : > { %v3257_v12 = vpop.eup %3256  ;;  %v1000_v56 = vadd.f32 1.0, %v3255_v62  ;;  %v4392_v62 = vld [vmem:[%s3833_s9 + $0x1f0] sm:$0xff] }
 0x194   : > { %v1006_v59 = vadd.f32 1.0, %v3257_v12  ;;  %v3259_v19 = vpop.eup %3258  ;;  %v4397_v12 = vld [vmem:[%s3833_s9 + $0x1c8] sm:$0xff] }
 0x195   : > { %3262 = vrcp.f32 %v1000_v56  ;;  %v3261_v2 = vpop.eup %3260  ;;  %v1013_v55 = vadd.f32 1.0, %v3259_v19  ;;  %v4400_v19 = vld [vmem:[%s3833_s9 + $0x1d8] sm:$0xff] }
 0x196   : > { %3264 = vrcp.f32 %v1006_v59 }
 0x197   : > { %3266 = vrcp.f32 %v1013_v55  ;;  %v4421_v55 = vld [vmem:[%s3833_s9 + $0x1a0] sm:$0xff] }
 0x1a2   : > { %v3263_v63 = vpop.eup %3262 }
 0x1a3   : > { %v3265_v3 = vpop.eup %3264  ;;  %v1018_v4 = vmul.f32 %v3263_v63, %v3261_v2  ;;  %v4405_v2 = vld [vmem:[%s3833_s9 + $0x1c0] sm:$0xff]  ;;  %v4408_v63 = vld [vmem:[%s3833_s9 + $0x1d0] sm:$0xff] }
 0x1a4   : > { %v1017_v28 = vmul.f32 0.0, %v3265_v3  ;;  %v3267_v58 = vpop.eup %3266  ;;  %v4413_v3 = vld [vmem:[%s3833_s9 + $0x1a8] sm:$0xff] }
 0x1a6   : > { %v4292_v37 = vadd.f32 %v1018_v4, %v1017_v28  ;;  %v4416_v4 = vld [vmem:[%s3833_s9 + $0x1b8] sm:$0xff]  ;;  %v4424_v28 = vld [vmem:[%s3833_s9 + $0x1b0] sm:$0xff] }
 0x1a8   : > { %3268 = vtanh.f32 %v4292_v37 }
 0x1b5   : > { %v3269_v7 = vpop.eup %3268 }
 0x1b6   : > { %v1021_v56 = vmul.f32 %v3269_v7, %v3267_v58  ;;  %v4432_v58 = vld [vmem:[%s3833_s9 + $0x198] sm:$0xff]  ;;  %v4437_v7 = vld [vmem:[%s3833_s9 + $0x180] sm:$0xff] }
 0x1b8   : > { %1026 = vst [vmem:[%s1025_s16] sm:$0xff] %v1021_v56  ;;  %1167 = vmatmul.mubr.f32.vlgmr.msra.gmra.mxu0 %v1021_v56  ;;  %1238 = vmatmul.mubr.f32.vlgmr.msra.gmra.mxu1 %v1021_v56  ;;  %v4440_v56 = vld [vmem:[%s3833_s9 + $0x190] sm:$0xff]  ;;  %s3154_s16 = sshll.u32 %s4717_s7, 5 }
 0x1b9   : > { %1354 = vmatpush1.msra.mxu0 %v3915_v5  ;;  %1425 = vmatpush1.msra.mxu1 %v3918_v6  ;;  %v5153_v5 = vld [vmem:[#allocation26_spill] sm:$0xff]  ;;  %v5154_v6 = vld [vmem:[#allocation24_spill] sm:$0xff]  ;;  %s1534_s13 = scalar_lea.vmem [#allocation2], %s3154_s16 }
 0x1ba   : > { %1355 = vmatprep.subr.mxu0 %v3924_v8  ;;  %1426 = vmatprep.subr.mxu1 %v3936_v11  ;;  %v5155_v8 = vld [vmem:[#allocation28_spill] sm:$0xff]  ;;  %v5158_v11 = vld [vmem:[#allocation27_spill] sm:$0xff]  ;;  %5171 = vst [vmem:[#allocation26_spill] sm:$0xff] %v4381_v46  ;;  %5172 = vst [vmem:[#allocation24_spill] sm:$0xff] %v4384_v1 }
 0x1bb   : > { %1356 = vmatpush1.msra.mxu0 %v3929_v9  ;;  %1427 = vmatpush1.msra.mxu1 %v3946_v14  ;;  %v5156_v9 = vld [vmem:[#allocation25_spill] sm:$0xff] }
 0x1bc   : > { %1357 = vmatprep.subr.mxu0 %v3933_v10  ;;  %1428 = vmatprep.subr.mxu1 %v3954_v16  ;;  %v5157_v10 = vld [vmem:[#allocation30_spill] sm:$0xff]  ;;  %v5160_v14 = vld [vmem:[#allocation29_spill] sm:$0xff]  ;;  %v5162_v16 = vld [vmem:[#allocation31_spill] sm:$0xff] }
 0x1bd   : > { %1358 = vmatpush1.msra.mxu0 %v3943_v13  ;;  %1429 = vmatpush1.msra.mxu1 %v3962_v18  ;;  %v5159_v13 = vld [vmem:[#allocation32_spill] sm:$0xff]  ;;  %v5164_v18 = vld [vmem:[#allocation33_spill] sm:$0xff] }
 0x1be   : > { %1359 = vmatprep.subr.mxu0 %v3951_v15  ;;  %1430 = vmatprep.subr.mxu1 %v3972_v21  ;;  %v5161_v15 = vld [vmem:[#allocation34_spill] sm:$0xff]  ;;  %v5166_v21 = vld [vmem:[#allocation35_spill] sm:$0xff] }
 0x1bf   : > { %1360 = vmatpush1.msra.mxu0 %v3959_v17  ;;  %1431 = vmatpush1.msra.mxu1 %v3980_v23  ;;  %v5163_v17 = vld [vmem:[#allocation36_spill] sm:$0xff]  ;;  %v5168_v23 = vld [vmem:[#allocation37_spill] sm:$0xff] }
 0x1c0   : > { %1361 = vmatprep.subr.mxu0 %v3969_v20  ;;  %1432 = vmatprep.subr.mxu1 %v3986_v25  ;;  %v5165_v20 = vld [vmem:[#allocation38_spill] sm:$0xff]  ;;  %v5170_v25 = vld [vmem:[#allocation40_spill] sm:$0xff] }
 0x1c1   : > { %1362 = vmatpush1.msra.mxu0 %v3977_v22  ;;  %1433 = vmatpush1.msra.mxu1 %v3996_v27  ;;  %v5167_v22 = vld [vmem:[#allocation39_spill] sm:$0xff] }
 0x1c2   : > { %1363 = vmatprep.subr.mxu0 %v3983_v24  ;;  %1434 = vmatprep.subr.mxu1 %v4006_v30  ;;  %v5169_v24 = vmov 0.0   ;;  %v1034_v30 = vld [vmem:[%s1032_s12 + $0x8] sm:$0xff] }
 0x1c3   : > { %1364 = vmatpush1.msra.mxu0 %v3993_v26  ;;  %1435 = vmatpush1.msra.mxu1 %v4014_v32  ;;  %v1033_v26 = vld [vmem:[%s1032_s12] sm:$0xff] }
 0x1c4   : > { %1365 = vmatprep.subr.mxu0 %v4003_v29  ;;  %1436 = vmatprep.subr.mxu1 %v4020_v34 }
 0x1c5   : > { %1366 = vmatpush1.msra.mxu0 %v4011_v31  ;;  %1437 = vmatpush1.msra.mxu1 %v4030_v36 }
 0x1c6   : > { %1367 = vmatprep.subr.mxu0 %v4017_v33  ;;  %1438 = vmatprep.subr.mxu1 %v4040_v39 }
 0x1c7   : > { %1368 = vmatpush1.msra.mxu0 %v4027_v35  ;;  %1439 = vmatpush1.msra.mxu1 %v4048_v41  ;;  %v1035_v41 = vld [vmem:[%s1032_s12 + $0x10] sm:$0xff] }
 0x1c8   : > { %1369 = vmatprep.subr.mxu0 %v4037_v38  ;;  %1440 = vmatprep.subr.mxu1 %v4054_v43  ;;  %v1036_v38 = vld [vmem:[%s1032_s12 + $0x18] sm:$0xff]  ;;  %s1781_s12 = smul.u32 3, %s3602_s21 }
 0x1c9   : > { %1370 = vmatpush1.msra.mxu0 %v4045_v40  ;;  %1441 = vmatpush1.msra.mxu1 %v4064_v45 }
 0x1ca   : > { %1371 = vmatprep.subr.mxu0 %v4051_v42  ;;  %1442 = vmatprep.subr.mxu1 %v4074_v48 }
 0x1cb   : > { %1372 = vmatpush1.msra.mxu0 %v4061_v44  ;;  %1443 = vmatpush1.msra.mxu1 %v4082_v50 }
 0x1cc   : > { %1373 = vmatprep.subr.mxu0 %v4071_v47  ;;  %1444 = vmatprep.subr.mxu1 %v4088_v52 }
 0x1cd   : > { %1374 = vmatpush1.msra.mxu0 %v4079_v49  ;;  %1445 = vmatpush1.msra.mxu1 %v4098_v54 }
 0x1ce   : > { %1375 = vmatprep.subr.mxu0 %v4085_v51  ;;  %1446 = vmatprep.subr.mxu1 %v4108_v57 }
 0x1cf   : > { %1376 = vmatpush1.msra.mxu0 %v4095_v53  ;;  %1447 = vmatpush1.msra.mxu1 %v5153_v5  ;;  %v4445_v5 = vld [vmem:[%s3833_s9 + $0x168] sm:$0xff] }
 0x1d0   : > { %1377 = vmatprep.subr.mxu0 %v5154_v6  ;;  %1448 = vmatprep.subr.mxu1 %v5155_v8  ;;  %v4448_v6 = vld [vmem:[%s3833_s9 + $0x178] sm:$0xff]  ;;  %v4453_v8 = vld [vmem:[%s3833_s9 + $0x160] sm:$0xff] }
 0x1d1   : > { %1378 = vmatpush1.msra.mxu0 %v5156_v9  ;;  %1449 = vmatpush1.msra.mxu1 %v5157_v10  ;;  %v4456_v9 = vld [vmem:[%s3833_s9 + $0x170] sm:$0xff]  ;;  %v4461_v10 = vld [vmem:[%s3833_s9 + $0x148] sm:$0xff] }
 0x1d2   : > { %1379 = vmatprep.subr.mxu0 %v5158_v11  ;;  %1450 = vmatprep.subr.mxu1 %v5159_v13  ;;  %v4464_v11 = vld [vmem:[%s3833_s9 + $0x158] sm:$0xff]  ;;  %v4469_v13 = vld [vmem:[%s3833_s9 + $0x140] sm:$0xff] }
 0x1d3   : > { %1380 = vmatpush1.msra.mxu0 %v5160_v14  ;;  %1451 = vmatpush1.msra.mxu1 %v5161_v15  ;;  %v4472_v14 = vld [vmem:[%s3833_s9 + $0x150] sm:$0xff]  ;;  %v4477_v15 = vld [vmem:[%s3833_s9 + $0x128] sm:$0xff] }
 0x1d4   : > { %1381 = vmatprep.subr.mxu0 %v5162_v16  ;;  %1452 = vmatprep.subr.mxu1 %v5163_v17  ;;  %v4480_v16 = vld [vmem:[%s3833_s9 + $0x138] sm:$0xff]  ;;  %v4483_v17 = vld [vmem:[%s3833_s9 + $0x120] sm:$0xff] }
 0x1d5   : > { %1382 = vmatpush1.msra.mxu0 %v5164_v18  ;;  %1453 = vmatpush1.msra.mxu1 %v5165_v20  ;;  %v4488_v18 = vld [vmem:[%s3833_s9 + $0x130] sm:$0xff]  ;;  %v4491_v20 = vld [vmem:[%s3833_s9 + $0x108] sm:$0xff] }
 0x1d6   : > { %1383 = vmatprep.subr.mxu0 %v5166_v21  ;;  %1454 = vmatprep.subr.mxu1 %v5167_v22  ;;  %v4494_v21 = vld [vmem:[%s3833_s9 + $0x118] sm:$0xff]  ;;  %v4499_v22 = vld [vmem:[%s3833_s9 + $0x100] sm:$0xff] }
 0x1d7   : > { %1384 = vmatpush1.msra.mxu0 %v5168_v23  ;;  %1417 = vmatprep.mubr.f32.mxu0 %v5169_v24  ;;  %v4502_v23 = vld [vmem:[%s3833_s9 + $0x110] sm:$0xff] }
 0x1d8   : > { %1455 = vmatpush1.msra.mxu1 %v5170_v25  ;;  %1488 = vmatprep.mubr.f32.mxu1 %v5169_v24  ;;  %v4505_v25 = vld [vmem:[%s3833_s9 + $0xe8] sm:$0xff] }
 0x1d9   : > { %1604 = vmatprep.subr.mxu0 %v4381_v46  ;;  %1675 = vmatprep.subr.mxu1 %v4384_v1 }
 0x278   : > { %v1168_v27 = vpop.f32.mrf.mxu0  ;;  %v1239_v34 = vpop.f32.mrf.mxu1 }
 0x279   : > { %v1244_v29 = vadd.f32 %v1168_v27, %v1033_v26  ;;  %v1246_v43 = vadd.f32 %v1239_v34, %v1035_v41  ;;  %v4510_v26 = vld [vmem:[%s3833_s9 + $0xf8] sm:$0xff]  ;;  %v4513_v27 = vld [vmem:[%s3833_s9 + $0xe0] sm:$0xff]  ;;  %v4537_v34 = vld [vmem:[%s3833_s9 + $0xa8] sm:$0xff] }
 0x27a   : > { %v1170_v31 = vpop.f32.mrf.mxu0  ;;  %v1241_v36 = vpop.f32.mrf.mxu1  ;;  %v4561_v41 = vld [vmem:[%s3833_s9 + $0x80] sm:$0xff] }
 0x27b   : > { %v3098_v32 = vmul.f32 -1.442695, %v1244_v29  ;;  %v1245_v33 = vadd.f32 %v1170_v31, %v1034_v30  ;;  %v1247_v39 = vadd.f32 %v1241_v36, %v1036_v38  ;;  %v4516_v29 = vld [vmem:[%s3833_s9 + $0xf0] sm:$0xff]  ;;  %v4521_v30 = vld [vmem:[%s3833_s9 + $0xc8] sm:$0xff]  ;;  %v4524_v31 = vld [vmem:[%s3833_s9 + $0xd8] sm:$0xff] }
 0x27c   : > { %v4545_v36 = vld [vmem:[%s3833_s9 + $0xa0] sm:$0xff]  ;;  %v4548_v38 = vld [vmem:[%s3833_s9 + $0xb0] sm:$0xff] }
 0x27d   : > { %3270 = vpow2.f32 %v3098_v32  ;;  %v3099_v35 = vmul.f32 -1.442695, %v1245_v33  ;;  %v3100_v40 = vmul.f32 -1.442695, %v1247_v39  ;;  %v4529_v32 = vld [vmem:[%s3833_s9 + $0xc0] sm:$0xff]  ;;  %v4532_v33 = vld [vmem:[%s3833_s9 + $0xd0] sm:$0xff] }
 0x27e   : > { %v4553_v39 = vld [vmem:[%s3833_s9 + $0x88] sm:$0xff] }
 0x27f   : > { %3272 = vpow2.f32 %v3099_v35  ;;  %v4540_v35 = vld [vmem:[%s3833_s9 + $0xb8] sm:$0xff] }
 0x280   : > { %3274 = vpow2.f32 %v3100_v40  ;;  %v4556_v40 = vld [vmem:[%s3833_s9 + $0x98] sm:$0xff] }
 0x28a   : > { %v3271_v42 = vpop.eup %3270 }
 0x28b   : > { %v1251_v44 = vadd.f32 1.0, %v3271_v42  ;;  %v4564_v42 = vld [vmem:[%s3833_s9 + $0x90] sm:$0xff] }
 0x28c   : > { %v3273_v45 = vpop.eup %3272  ;;  %5173 = vst [vmem:[#allocation28_spill] sm:$0xff] %v4564_v42 }
 0x28d   : > { %3276 = vrcp.f32 %v1251_v44  ;;  %v1257_v47 = vadd.f32 1.0, %v3273_v45  ;;  %v3275_v48 = vpop.eup %3274  ;;  %v4572_v44 = vld [vmem:[%s3833_s9 + $0x78] sm:$0xff]  ;;  %v4577_v45 = vld [vmem:[%s3833_s9 + $0x60] sm:$0xff] }
 0x28e   : > { %3278 = vtanh.f32 %v1246_v43  ;;  %v1264_v52 = vadd.f32 1.0, %v3275_v48  ;;  %v4569_v43 = vld [vmem:[%s3833_s9 + $0x68] sm:$0xff]  ;;  %5175 = vst [vmem:[#allocation30_spill] sm:$0xff] %v4572_v44  ;;  %5176 = vst [vmem:[#allocation27_spill] sm:$0xff] %v4577_v45 }
 0x28f   : > { %3280 = vrcp.f32 %v1257_v47  ;;  %5174 = vst [vmem:[#allocation25_spill] sm:$0xff] %v4569_v43  ;;  %v4580_v47 = vld [vmem:[%s3833_s9 + $0x70] sm:$0xff]  ;;  %v4585_v48 = vld [vmem:[%s3833_s9 + $0x48] sm:$0xff] }
 0x290   : > { %3282 = vrcp.f32 %v1264_v52  ;;  %5177 = vst [vmem:[#allocation32_spill] sm:$0xff] %v4580_v47  ;;  %5178 = vst [vmem:[#allocation29_spill] sm:$0xff] %v4585_v48  ;;  %v4601_v52 = vld [vmem:[%s3833_s9 + $0x28] sm:$0xff] }
 0x291   : > { %5182 = vst [vmem:[#allocation33_spill] sm:$0xff] %v4601_v52 }
 0x29a   : > { %v3277_v49 = vpop.eup %3276 }
 0x29b   : > { %v3279_v50 = vpop.eup %3278 }
 0x29c   : > { %v3281_v51 = vpop.eup %3280  ;;  %v1269_v53 = vmul.f32 %v3279_v50, %v3277_v49  ;;  %v4588_v49 = vld [vmem:[%s3833_s9 + $0x58] sm:$0xff]  ;;  %v4593_v50 = vld [vmem:[%s3833_s9 + $0x40] sm:$0xff] }
 0x29d   : > { %v1268_v54 = vmul.f32 %v3281_v51, %v4292_v37  ;;  %v3283_v59 = vpop.eup %3282  ;;  %v4429_v37 = vld [vmem:[%s3833_s9 + $0x188] sm:$0xff]  ;;  %5179 = vst [vmem:[#allocation34_spill] sm:$0xff] %v4588_v49  ;;  %5180 = vst [vmem:[#allocation31_spill] sm:$0xff] %v4593_v50  ;;  %v4596_v51 = vld [vmem:[%s3833_s9 + $0x50] sm:$0xff] }
 0x29e   : > { %5181 = vst [vmem:[#allocation36_spill] sm:$0xff] %v4596_v51 }
 0x29f   : > { %v4373_v57 = vadd.f32 %v1269_v53, %v1268_v54  ;;  %v4604_v53 = vld [vmem:[%s3833_s9 + $0x38] sm:$0xff]  ;;  %v4609_v54 = vld [vmem:[%s3833_s9 + $0x20] sm:$0xff] }
 0x2a0   : > { %5183 = vst [vmem:[#allocation38_spill] sm:$0xff] %v4604_v53  ;;  %5184 = vst [vmem:[#allocation35_spill] sm:$0xff] %v4609_v54 }
 0x2a1   : > { %3284 = vtanh.f32 %v4373_v57 }
 0x2ae   : > { %v3285_v0 = vpop.eup %3284 }
 0x2af   : > { %v1272_v60 = vmul.f32 %v3285_v0, %v3283_v59  ;;  %v4612_v59 = vld [vmem:[%s3833_s9 + $0x30] sm:$0xff]  ;;  %v4617_v0 = vld [vmem:[%s3833_s9 + $0x8] sm:$0xff] }
 0x2b0   : > { %5185 = vst [vmem:[#allocation39_spill] sm:$0xff] %v4612_v59  ;;  %5186 = vst [vmem:[#allocation37_spill] sm:$0xff] %v4617_v0 }
 0x2b1   : > { %1277 = vst [vmem:[%s1276_s0] sm:$0xff] %v1272_v60  ;;  %1418 = vmatmul.mubr.f32.vlgmr.msra.gmra.mxu0 %v1272_v60  ;;  %1489 = vmatmul.mubr.f32.vlgmr.msra.gmra.mxu1 %v1272_v60  ;;  %v4620_v60 = vld [vmem:[%s3833_s9 + $0x18] sm:$0xff]  ;;  %s4794_s0 = sadd.s32 %s3116_s1, %s1781_s12 }
 0x2b2   : > { %1668 = vmatprep.mubr.f32.mxu0 %v5169_v24  ;;  %1739 = vmatprep.mubr.f32.mxu1 %v5169_v24  ;;  %5187 = vst [vmem:[#allocation40_spill] sm:$0xff] %v4620_v60  ;;  %v4625_v24 = vld [vmem:[%s3833_s9] sm:$0xff]  ;;  %s3155_s10 = sshll.u32 %s4794_s0, 5  ;;  %s3122_s25 = sshll.u32 %s4794_s0, 3 }
 0x2b3   : > { %1605 = vmatpush1.msra.mxu0 %v4389_v61  ;;  %1676 = vmatpush1.msra.mxu1 %v4392_v62  ;;  %5188 = vst [vmem:[#allocation41_spill] sm:$0xff] %v4625_v24  ;;  %s1785_s27 = scalar_lea.vmem [#allocation2], %s3155_s10  ;;  %s2029_s26 = scalar_lea.vmem %s4297_s17, %s3122_s25 [#allocation13] }
 0x2b4   : > { %1606 = vmatprep.subr.mxu0 %v4397_v12  ;;  %1677 = vmatprep.subr.mxu1 %v4400_v19  ;;  %s3158_s0 = smul.u32 224, %s4366_s14  ;;  %s3089_s25 = sshll.u32 %s3823_s2, 3 }
 0x2b5   : > { %1607 = vmatpush1.msra.mxu0 %v4405_v2  ;;  %1678 = vmatpush1.msra.mxu1 %v4408_v63 }
 0x2b6   : > { %1608 = vmatprep.subr.mxu0 %v4413_v3  ;;  %1679 = vmatprep.subr.mxu1 %v4416_v4  ;;  %s2535_s10 = scalar_lea.vmem [#allocation2], %s3158_s0 }
 0x2b7   : > { %1609 = vmatpush1.msra.mxu0 %v4421_v55  ;;  %1680 = vmatpush1.msra.mxu1 %v4424_v28 }
 0x2b8   : > { %1610 = vmatprep.subr.mxu0 %v4429_v37  ;;  %1681 = vmatprep.subr.mxu1 %v4432_v58 }
 0x2b9   : > { %1611 = vmatpush1.msra.mxu0 %v4437_v7  ;;  %1682 = vmatpush1.msra.mxu1 %v4440_v56 }
 0x2ba   : > { %1612 = vmatprep.subr.mxu0 %v4445_v5  ;;  %1683 = vmatprep.subr.mxu1 %v4448_v6 }
 0x2bb   : > { %1613 = vmatpush1.msra.mxu0 %v4453_v8  ;;  %1684 = vmatpush1.msra.mxu1 %v4456_v9 }
 0x2bc   : > { %1614 = vmatprep.subr.mxu0 %v4461_v10  ;;  %1685 = vmatprep.subr.mxu1 %v4464_v11 }
 0x2bd   : > { %1615 = vmatpush1.msra.mxu0 %v4469_v13  ;;  %1686 = vmatpush1.msra.mxu1 %v4472_v14 }
 0x2be   : > { %1616 = vmatprep.subr.mxu0 %v4477_v15  ;;  %1687 = vmatprep.subr.mxu1 %v4480_v16 }
 0x2bf   : > { %1617 = vmatpush1.msra.mxu0 %v4483_v17  ;;  %1688 = vmatpush1.msra.mxu1 %v4488_v18 }
 0x2c0   : > { %1618 = vmatprep.subr.mxu0 %v4491_v20  ;;  %1689 = vmatprep.subr.mxu1 %v4494_v21 }
 0x2c1   : > { %1619 = vmatpush1.msra.mxu0 %v4499_v22  ;;  %1690 = vmatpush1.msra.mxu1 %v4502_v23 }
 0x2c2   : > { %1620 = vmatprep.subr.mxu0 %v4505_v25  ;;  %1691 = vmatprep.subr.mxu1 %v4510_v26 }
 0x2c3   : > { %1621 = vmatpush1.msra.mxu0 %v4513_v27  ;;  %1692 = vmatpush1.msra.mxu1 %v4516_v29 }
 0x2c4   : > { %1622 = vmatprep.subr.mxu0 %v4521_v30  ;;  %1693 = vmatprep.subr.mxu1 %v4524_v31 }
 0x2c5   : > { %1623 = vmatpush1.msra.mxu0 %v4529_v32  ;;  %1694 = vmatpush1.msra.mxu1 %v4532_v33 }
 0x2c6   : > { %1624 = vmatprep.subr.mxu0 %v4537_v34  ;;  %1695 = vmatprep.subr.mxu1 %v4540_v35 }
 0x2c7   : > { %1625 = vmatpush1.msra.mxu0 %v4545_v36  ;;  %1696 = vmatpush1.msra.mxu1 %v4548_v38 }
 0x2c8   : > { %1626 = vmatprep.subr.mxu0 %v4553_v39  ;;  %1697 = vmatprep.subr.mxu1 %v4556_v40 }
 0x2c9   : > { %1627 = vmatpush1.msra.mxu0 %v4561_v41  ;;  %1698 = vmatpush1.msra.mxu1 %v4564_v42 }
 0x2ca   : > { %1628 = vmatprep.subr.mxu0 %v4569_v43  ;;  %1699 = vmatprep.subr.mxu1 %v4572_v44 }
 0x2cb   : > { %1629 = vmatpush1.msra.mxu0 %v4577_v45  ;;  %1700 = vmatpush1.msra.mxu1 %v4580_v47  ;;  %v1286_v47 = vld [vmem:[%s1283_s29 + $0x10] sm:$0xff] }
 0x2cc   : > { %1630 = vmatprep.subr.mxu0 %v4585_v48  ;;  %1701 = vmatprep.subr.mxu1 %v4588_v49  ;;  %v4628_v49 = vld [vmem:[%s3833_s9 + $0x10] sm:$0xff] }
 0x2cd   : > { %1631 = vmatpush1.msra.mxu0 %v4593_v50  ;;  %1702 = vmatpush1.msra.mxu1 %v4596_v51  ;;  %5189 = vst [vmem:[#allocation42_spill] sm:$0xff] %v4628_v49 }
 0x2ce   : > { %1632 = vmatprep.subr.mxu0 %v4601_v52  ;;  %1703 = vmatprep.subr.mxu1 %v4604_v53  ;;  %v1285_v53 = vld [vmem:[%s1283_s29 + $0x8] sm:$0xff] }
 0x2cf   : > { %1633 = vmatpush1.msra.mxu0 %v4609_v54  ;;  %1704 = vmatpush1.msra.mxu1 %v4612_v59  ;;  %v1284_v59 = vld [vmem:[%s1283_s29] sm:$0xff] }
 0x2d0   : > { %1634 = vmatprep.subr.mxu0 %v4617_v0  ;;  %1705 = vmatprep.subr.mxu1 %v4620_v60 }
 0x2d1   : > { %1635 = vmatpush1.msra.mxu0 %v4625_v24  ;;  %1706 = vmatpush1.msra.mxu1 %v4628_v49 }
 0x2d2   : > { %1855 = vmatprep.subr.mxu0 %v4381_v46  ;;  %1926 = vmatprep.subr.mxu1 %v4384_v1  ;;  %v1287_v1 = vld [vmem:[%s1283_s29 + $0x18] sm:$0xff]  ;;  %s2031_s29 = smul.u32 5, %s4366_s14 }
 0x371   : > { %v1419_v54 = vpop.f32.mrf.mxu0  ;;  %v1490_v49 = vpop.f32.mrf.mxu1 }
 0x372   : > { %v1495_v0 = vadd.f32 %v1419_v54, %v1284_v59  ;;  %v1497_v44 = vadd.f32 %v1490_v49, %v1286_v47  ;;  %v5192_v47 = vld [vmem:[#allocation30_spill] sm:$0xff]  ;;  %v5194_v49 = vld [vmem:[#allocation32_spill] sm:$0xff] }
 0x373   : > { %v1421_v60 = vpop.f32.mrf.mxu0  ;;  %v1492_v46 = vpop.f32.mrf.mxu1 }
 0x374   : > { %v3105_v52 = vmul.f32 -1.442695, %v1495_v0  ;;  %v1496_v24 = vadd.f32 %v1421_v60, %v1285_v53  ;;  %v1498_v50 = vadd.f32 %v1492_v46, %v1287_v1  ;;  %v5196_v60 = vld [vmem:[#allocation34_spill] sm:$0xff] }
 0x376   : > { %3286 = vpow2.f32 %v3105_v52  ;;  %v3106_v51 = vmul.f32 -1.442695, %v1496_v24  ;;  %v3107_v48 = vmul.f32 -1.442695, %v1498_v50  ;;  %v5195_v50 = vld [vmem:[#allocation29_spill] sm:$0xff] }
 0x378   : > { %3288 = vpow2.f32 %v3106_v51 }
 0x379   : > { %3290 = vpow2.f32 %v3107_v48  ;;  %v5193_v48 = vld [vmem:[#allocation27_spill] sm:$0xff] }
 0x383   : > { %v3287_v45 = vpop.eup %3286 }
 0x384   : > { %v1502_v43 = vadd.f32 1.0, %v3287_v45 }
 0x385   : > { %v3289_v42 = vpop.eup %3288 }
 0x386   : > { %3292 = vrcp.f32 %v1502_v43  ;;  %v1508_v54 = vadd.f32 1.0, %v3289_v42  ;;  %v3291_v52 = vpop.eup %3290 }
 0x387   : > { %3294 = vtanh.f32 %v1497_v44  ;;  %v1515_v59 = vadd.f32 1.0, %v3291_v52  ;;  %v5191_v44 = vld [vmem:[#allocation25_spill] sm:$0xff]  ;;  %v5198_v52 = vld [vmem:[#allocation36_spill] sm:$0xff] }
 0x388   : > { %3296 = vrcp.f32 %v1508_v54  ;;  %v5197_v54 = vld [vmem:[#allocation31_spill] sm:$0xff] }
 0x389   : > { %3298 = vrcp.f32 %v1515_v59  ;;  %v5202_v59 = vld [vmem:[#allocation39_spill] sm:$0xff] }
 0x393   : > { %v3293_v53 = vpop.eup %3292 }
 0x394   : > { %v3295_v24 = vpop.eup %3294 }
 0x395   : > { %v3297_v51 = vpop.eup %3296  ;;  %v1520_v0 = vmul.f32 %v3295_v24, %v3293_v53  ;;  %v5199_v53 = vld [vmem:[#allocation33_spill] sm:$0xff]  ;;  %v5200_v24 = vld [vmem:[#allocation38_spill] sm:$0xff] }
 0x396   : > { %v1519_v46 = vmul.f32 %v3297_v51, %v4373_v57  ;;  %v3299_v45 = vpop.eup %3298  ;;  %v5190_v57 = vld [vmem:[#allocation28_spill] sm:$0xff]  ;;  %v5201_v51 = vld [vmem:[#allocation35_spill] sm:$0xff] }
 0x398   : > { %v4644_v1 = vadd.f32 %v1520_v0, %v1519_v46  ;;  %v5203_v0 = vld [vmem:[#allocation37_spill] sm:$0xff]  ;;  %v5204_v46 = vld [vmem:[#allocation40_spill] sm:$0xff] }
 0x39a   : > { %3300 = vtanh.f32 %v4644_v1 }
 0x3a7   : > { %v3301_v43 = vpop.eup %3300 }
 0x3a8   : > { %v1523_v42 = vmul.f32 %v3301_v43, %v3299_v45  ;;  %v5205_v45 = vld [vmem:[#allocation41_spill] sm:$0xff]  ;;  %v5206_v43 = vmov 0.0  }
 0x3aa   : > { %1528 = vst [vmem:[%s1527_s30] sm:$0xff] %v1523_v42  ;;  %1669 = vmatmul.mubr.f32.vlgmr.msra.gmra.mxu0 %v1523_v42  ;;  %1740 = vmatmul.mubr.f32.vlgmr.msra.gmra.mxu1 %v1523_v42  ;;  %v5207_v42 = vld [vmem:[#allocation42_spill] sm:$0xff]  ;;  %s4869_s30 = sadd.s32 %s3123_s24, %s2031_s29  ;;  %s3144_s29 = sshll.u32 %s3602_s21, 7 }
 0x3ab   : > { %1856 = vmatpush1.msra.mxu0 %v4389_v61  ;;  %1927 = vmatpush1.msra.mxu1 %v4392_v62  ;;  %s3156_s15 = sshll.u32 %s4869_s30, 5  ;;  %s3129_s7 = sshll.u32 %s4869_s30, 3 }
 0x3ac   : > { %1857 = vmatprep.subr.mxu0 %v4397_v12  ;;  %1928 = vmatprep.subr.mxu1 %v4400_v19  ;;  %s2036_s20 = scalar_lea.vmem [#allocation2], %s3156_s15  ;;  %s2280_s16 = scalar_lea.vmem %s4297_s17, %s3129_s7 [#allocation13] }
 0x3ad   : > { %1858 = vmatpush1.msra.mxu0 %v4405_v2  ;;  %1929 = vmatpush1.msra.mxu1 %v4408_v63  ;;  %s407_s7 = scalar_lea.vmem [#allocation14], %s3089_s25 }
 0x3ae   : > { %1859 = vmatprep.subr.mxu0 %v4413_v3  ;;  %1930 = vmatprep.subr.mxu1 %v4416_v4 }
 0x3af   : > { %1860 = vmatpush1.msra.mxu0 %v4421_v55  ;;  %1931 = vmatpush1.msra.mxu1 %v4424_v28 }
 0x3b0   : > { %1861 = vmatprep.subr.mxu0 %v4429_v37  ;;  %1932 = vmatprep.subr.mxu1 %v4432_v58 }
 0x3b1   : > { %1862 = vmatpush1.msra.mxu0 %v4437_v7  ;;  %1933 = vmatpush1.msra.mxu1 %v4440_v56 }
 0x3b2   : > { %1863 = vmatprep.subr.mxu0 %v4445_v5  ;;  %1934 = vmatprep.subr.mxu1 %v4448_v6 }
 0x3b3   : > { %1864 = vmatpush1.msra.mxu0 %v4453_v8  ;;  %1935 = vmatpush1.msra.mxu1 %v4456_v9 }
 0x3b4   : > { %1865 = vmatprep.subr.mxu0 %v4461_v10  ;;  %1936 = vmatprep.subr.mxu1 %v4464_v11 }
 0x3b5   : > { %1866 = vmatpush1.msra.mxu0 %v4469_v13  ;;  %1937 = vmatpush1.msra.mxu1 %v4472_v14 }
 0x3b6   : > { %1867 = vmatprep.subr.mxu0 %v4477_v15  ;;  %1938 = vmatprep.subr.mxu1 %v4480_v16 }
 0x3b7   : > { %1868 = vmatpush1.msra.mxu0 %v4483_v17  ;;  %1939 = vmatpush1.msra.mxu1 %v4488_v18 }
 0x3b8   : > { %1869 = vmatprep.subr.mxu0 %v4491_v20  ;;  %1940 = vmatprep.subr.mxu1 %v4494_v21 }
 0x3b9   : > { %1870 = vmatpush1.msra.mxu0 %v4499_v22  ;;  %1941 = vmatpush1.msra.mxu1 %v4502_v23 }
 0x3ba   : > { %1871 = vmatprep.subr.mxu0 %v4505_v25  ;;  %1942 = vmatprep.subr.mxu1 %v4510_v26 }
 0x3bb   : > { %1872 = vmatpush1.msra.mxu0 %v4513_v27  ;;  %1943 = vmatpush1.msra.mxu1 %v4516_v29 }
 0x3bc   : > { %1873 = vmatprep.subr.mxu0 %v4521_v30  ;;  %1944 = vmatprep.subr.mxu1 %v4524_v31 }
 0x3bd   : > { %1874 = vmatpush1.msra.mxu0 %v4529_v32  ;;  %1945 = vmatpush1.msra.mxu1 %v4532_v33 }
 0x3be   : > { %1875 = vmatprep.subr.mxu0 %v4537_v34  ;;  %1946 = vmatprep.subr.mxu1 %v4540_v35 }
 0x3bf   : > { %1876 = vmatpush1.msra.mxu0 %v4545_v36  ;;  %1947 = vmatpush1.msra.mxu1 %v4548_v38 }
 0x3c0   : > { %1877 = vmatprep.subr.mxu0 %v4553_v39  ;;  %1948 = vmatprep.subr.mxu1 %v4556_v40 }
 0x3c1   : > { %1878 = vmatpush1.msra.mxu0 %v4561_v41  ;;  %1949 = vmatpush1.msra.mxu1 %v5190_v57 }
 0x3c2   : > { %1879 = vmatprep.subr.mxu0 %v5191_v44  ;;  %1950 = vmatprep.subr.mxu1 %v5192_v47 }
 0x3c3   : > { %1880 = vmatpush1.msra.mxu0 %v5193_v48  ;;  %1951 = vmatpush1.msra.mxu1 %v5194_v49  ;;  %v1537_v49 = vld [vmem:[%s1534_s13 + $0x10] sm:$0xff] }
 0x3c4   : > { %1881 = vmatprep.subr.mxu0 %v5195_v50  ;;  %1952 = vmatprep.subr.mxu1 %v5196_v60 }
 0x3c5   : > { %1882 = vmatpush1.msra.mxu0 %v5197_v54  ;;  %1953 = vmatpush1.msra.mxu1 %v5198_v52  ;;  %v5208_v52 = vld [vmem:[#allocation26_spill] sm:$0xff] }
 0x3c6   : > { %1883 = vmatprep.subr.mxu0 %v5199_v53  ;;  %1954 = vmatprep.subr.mxu1 %v5200_v24  ;;  %v5209_v53 = vld [vmem:[#allocation24_spill] sm:$0xff] }
 0x3c7   : > { %1884 = vmatpush1.msra.mxu0 %v5201_v51  ;;  %1955 = vmatpush1.msra.mxu1 %v5202_v59  ;;  %v1536_v59 = vld [vmem:[%s1534_s13 + $0x8] sm:$0xff] }
 0x3c8   : > { %1885 = vmatprep.subr.mxu0 %v5203_v0  ;;  %1956 = vmatprep.subr.mxu1 %v5204_v46  ;;  %v1535_v46 = vld [vmem:[%s1534_s13] sm:$0xff] }
 0x3c9   : > { %1886 = vmatpush1.msra.mxu0 %v5205_v45  ;;  %1919 = vmatprep.mubr.f32.mxu0 %v5206_v43 }
 0x3ca   : > { %1957 = vmatpush1.msra.mxu1 %v5207_v42  ;;  %1990 = vmatprep.mubr.f32.mxu1 %v5206_v43 }
 0x3cb   : > { %2106 = vmatprep.subr.mxu0 %v5208_v52  ;;  %2177 = vmatprep.subr.mxu1 %v5209_v53  ;;  %v1538_v53 = vld [vmem:[%s1534_s13 + $0x18] sm:$0xff]  ;;  %s2282_s13 = smul.u32 6, %s4366_s14 }
 0x3cd   : > { %s4946_s28 = sadd.s32 %s3602_s21, %s2282_s13  ;;  %s4968_s21 = scalar_lea.hbm %s5044_s5, %s3144_s29 }
 0x46a   : > { %v1670_v0 = vpop.f32.mrf.mxu0  ;;  %v1741_v43 = vpop.f32.mrf.mxu1 }
 0x46b   : > { %v1746_v45 = vadd.f32 %v1670_v0, %v1535_v46  ;;  %v1748_v47 = vadd.f32 %v1741_v43, %v1537_v49  ;;  %v5212_v49 = vld [vmem:[#allocation30_spill] sm:$0xff]  ;;  %v5215_v43 = vld [vmem:[#allocation29_spill] sm:$0xff] }
 0x46c   : > { %v1672_v51 = vpop.f32.mrf.mxu0  ;;  %v1743_v52 = vpop.f32.mrf.mxu1 }
 0x46d   : > { %v3112_v24 = vmul.f32 -1.442695, %v1746_v45  ;;  %v1747_v42 = vadd.f32 %v1672_v51, %v1536_v59  ;;  %v1749_v60 = vadd.f32 %v1743_v52, %v1538_v53  ;;  %v5214_v53 = vld [vmem:[#allocation32_spill] sm:$0xff] }
 0x46f   : > { %3302 = vpow2.f32 %v3112_v24  ;;  %v3113_v54 = vmul.f32 -1.442695, %v1747_v42  ;;  %v3114_v50 = vmul.f32 -1.442695, %v1749_v60  ;;  %v5216_v42 = vld [vmem:[#allocation34_spill] sm:$0xff] }
 0x471   : > { %3304 = vpow2.f32 %v3113_v54 }
 0x472   : > { %3306 = vpow2.f32 %v3114_v50  ;;  %v5213_v50 = vld [vmem:[#allocation27_spill] sm:$0xff] }
 0x47c   : > { %v3303_v48 = vpop.eup %3302 }
 0x47d   : > { %v1753_v44 = vadd.f32 1.0, %v3303_v48 }
 0x47e   : > { %v3305_v57 = vpop.eup %3304 }
 0x47f   : > { %3308 = vrcp.f32 %v1753_v44  ;;  %v1759_v0 = vadd.f32 1.0, %v3305_v57  ;;  %v3307_v24 = vpop.eup %3306 }
 0x480   : > { %3310 = vtanh.f32 %v1748_v47  ;;  %v1766_v46 = vadd.f32 1.0, %v3307_v24  ;;  %v5211_v47 = vld [vmem:[#allocation25_spill] sm:$0xff]  ;;  %v5218_v24 = vld [vmem:[#allocation36_spill] sm:$0xff] }
 0x481   : > { %3312 = vrcp.f32 %v1759_v0  ;;  %v5217_v0 = vld [vmem:[#allocation31_spill] sm:$0xff] }
 0x482   : > { %3314 = vrcp.f32 %v1766_v46  ;;  %v5222_v46 = vld [vmem:[#allocation39_spill] sm:$0xff] }
 0x48c   : > { %v3309_v51 = vpop.eup %3308 }
 0x48d   : > { %v3311_v59 = vpop.eup %3310 }
 0x48e   : > { %v3313_v54 = vpop.eup %3312  ;;  %v1771_v45 = vmul.f32 %v3311_v59, %v3309_v51  ;;  %v5219_v51 = vld [vmem:[#allocation33_spill] sm:$0xff]  ;;  %v5220_v59 = vld [vmem:[#allocation38_spill] sm:$0xff] }
 0x48f   : > { %v1770_v60 = vmul.f32 %v3313_v54, %v4644_v1  ;;  %v3315_v48 = vpop.eup %3314  ;;  %v5210_v1 = vld [vmem:[#allocation28_spill] sm:$0xff]  ;;  %v5221_v54 = vld [vmem:[#allocation35_spill] sm:$0xff] }
 0x491   : > { %v4721_v52 = vadd.f32 %v1771_v45, %v1770_v60  ;;  %v5223_v45 = vld [vmem:[#allocation37_spill] sm:$0xff]  ;;  %v5224_v60 = vld [vmem:[#allocation40_spill] sm:$0xff] }
 0x493   : > { %3316 = vtanh.f32 %v4721_v52 }
 0x4a0   : > { %v3317_v44 = vpop.eup %3316 }
 0x4a1   : > { %v1774_v57 = vmul.f32 %v3317_v44, %v3315_v48  ;;  %v5225_v48 = vld [vmem:[#allocation41_spill] sm:$0xff]  ;;  %v5226_v44 = vmov 0.0  }
 0x4a3   : > { %1779 = vst [vmem:[%s1778_s11] sm:$0xff] %v1774_v57  ;;  %1920 = vmatmul.mubr.f32.vlgmr.msra.gmra.mxu0 %v1774_v57  ;;  %1991 = vmatmul.mubr.f32.vlgmr.msra.gmra.mxu1 %v1774_v57  ;;  %v5227_v57 = vld [vmem:[#allocation42_spill] sm:$0xff]  ;;  %s3157_s11 = sshll.u32 %s4946_s28, 5 }
 0x4a4   : > { %2107 = vmatpush1.msra.mxu0 %v4389_v61  ;;  %2178 = vmatpush1.msra.mxu1 %v4392_v62  ;;  %s2286_s12 = scalar_lea.vmem [#allocation2], %s3157_s11  ;;  %s3621_s11 = smov [#allocation13]  }
 0x4a5   : > { %2108 = vmatprep.subr.mxu0 %v4397_v12  ;;  %2179 = vmatprep.subr.mxu1 %v4400_v19 }
 0x4a6   : > { %2109 = vmatpush1.msra.mxu0 %v4405_v2  ;;  %2180 = vmatpush1.msra.mxu1 %v4408_v63 }
 0x4a7   : > { %2110 = vmatprep.subr.mxu0 %v4413_v3  ;;  %2181 = vmatprep.subr.mxu1 %v4416_v4 }
 0x4a8   : > { %2111 = vmatpush1.msra.mxu0 %v4421_v55  ;;  %2182 = vmatpush1.msra.mxu1 %v4424_v28 }
 0x4a9   : > { %2112 = vmatprep.subr.mxu0 %v4429_v37  ;;  %2183 = vmatprep.subr.mxu1 %v4432_v58 }
 0x4aa   : > { %2113 = vmatpush1.msra.mxu0 %v4437_v7  ;;  %2184 = vmatpush1.msra.mxu1 %v4440_v56 }
 0x4ab   : > { %2114 = vmatprep.subr.mxu0 %v4445_v5  ;;  %2185 = vmatprep.subr.mxu1 %v4448_v6 }
 0x4ac   : > { %2115 = vmatpush1.msra.mxu0 %v4453_v8  ;;  %2186 = vmatpush1.msra.mxu1 %v4456_v9 }
 0x4ad   : > { %2116 = vmatprep.subr.mxu0 %v4461_v10  ;;  %2187 = vmatprep.subr.mxu1 %v4464_v11 }
 0x4ae   : > { %2117 = vmatpush1.msra.mxu0 %v4469_v13  ;;  %2188 = vmatpush1.msra.mxu1 %v4472_v14 }
 0x4af   : > { %2118 = vmatprep.subr.mxu0 %v4477_v15  ;;  %2189 = vmatprep.subr.mxu1 %v4480_v16 }
 0x4b0   : > { %2119 = vmatpush1.msra.mxu0 %v4483_v17  ;;  %2190 = vmatpush1.msra.mxu1 %v4488_v18 }
 0x4b1   : > { %2120 = vmatprep.subr.mxu0 %v4491_v20  ;;  %2191 = vmatprep.subr.mxu1 %v4494_v21 }
 0x4b2   : > { %2121 = vmatpush1.msra.mxu0 %v4499_v22  ;;  %2192 = vmatpush1.msra.mxu1 %v4502_v23 }
 0x4b3   : > { %2122 = vmatprep.subr.mxu0 %v4505_v25  ;;  %2193 = vmatprep.subr.mxu1 %v4510_v26 }
 0x4b4   : > { %2123 = vmatpush1.msra.mxu0 %v4513_v27  ;;  %2194 = vmatpush1.msra.mxu1 %v4516_v29 }
 0x4b5   : > { %2124 = vmatprep.subr.mxu0 %v4521_v30  ;;  %2195 = vmatprep.subr.mxu1 %v4524_v31 }
 0x4b6   : > { %2125 = vmatpush1.msra.mxu0 %v4529_v32  ;;  %2196 = vmatpush1.msra.mxu1 %v4532_v33 }
 0x4b7   : > { %2126 = vmatprep.subr.mxu0 %v4537_v34  ;;  %2197 = vmatprep.subr.mxu1 %v4540_v35 }
 0x4b8   : > { %2127 = vmatpush1.msra.mxu0 %v4545_v36  ;;  %2198 = vmatpush1.msra.mxu1 %v4548_v38 }
 0x4b9   : > { %2128 = vmatprep.subr.mxu0 %v4553_v39  ;;  %2199 = vmatprep.subr.mxu1 %v4556_v40 }
 0x4ba   : > { %2129 = vmatpush1.msra.mxu0 %v4561_v41  ;;  %2200 = vmatpush1.msra.mxu1 %v5210_v1 }
 0x4bb   : > { %2130 = vmatprep.subr.mxu0 %v5211_v47  ;;  %2201 = vmatprep.subr.mxu1 %v5212_v49 }
 0x4bc   : > { %2131 = vmatpush1.msra.mxu0 %v5213_v50  ;;  %2202 = vmatpush1.msra.mxu1 %v5214_v53  ;;  %v1788_v53 = vld [vmem:[%s1785_s27 + $0x10] sm:$0xff] }
 0x4bd   : > { %2132 = vmatprep.subr.mxu0 %v5215_v43  ;;  %2203 = vmatprep.subr.mxu1 %v5216_v42 }
 0x4be   : > { %2133 = vmatpush1.msra.mxu0 %v5217_v0  ;;  %2204 = vmatpush1.msra.mxu1 %v5218_v24  ;;  %v5228_v24 = vld [vmem:[#allocation26_spill] sm:$0xff] }
 0x4bf   : > { %2134 = vmatprep.subr.mxu0 %v5219_v51  ;;  %2205 = vmatprep.subr.mxu1 %v5220_v59  ;;  %v5229_v51 = vld [vmem:[#allocation24_spill] sm:$0xff] }
 0x4c0   : > { %2135 = vmatpush1.msra.mxu0 %v5221_v54  ;;  %2206 = vmatpush1.msra.mxu1 %v5222_v46  ;;  %v1787_v46 = vld [vmem:[%s1785_s27 + $0x8] sm:$0xff] }
 0x4c1   : > { %2136 = vmatprep.subr.mxu0 %v5223_v45  ;;  %2207 = vmatprep.subr.mxu1 %v5224_v60  ;;  %v1786_v60 = vld [vmem:[%s1785_s27] sm:$0xff] }
 0x4c2   : > { %2137 = vmatpush1.msra.mxu0 %v5225_v48  ;;  %2170 = vmatprep.mubr.f32.mxu0 %v5226_v44 }
 0x4c3   : > { %2208 = vmatpush1.msra.mxu1 %v5227_v57  ;;  %2241 = vmatprep.mubr.f32.mxu1 %v5226_v44 }
 0x4c4   : > { %2356 = vmatprep.subr.mxu0 %v5228_v24  ;;  %2427 = vmatprep.subr.mxu1 %v5229_v51  ;;  %v1789_v51 = vld [vmem:[%s1785_s27 + $0x18] sm:$0xff]  ;;  %s3141_s27 = smul.u32 56, %s4366_s14 }
 0x4c6   : > { %s2779_s24 = scalar_lea.vmem %s4297_s17, %s3141_s27 [#allocation13] }
 0x563   : > { %v1921_v45 = vpop.f32.mrf.mxu0  ;;  %v1992_v44 = vpop.f32.mrf.mxu1 }
 0x564   : > { %v1997_v48 = vadd.f32 %v1921_v45, %v1786_v60  ;;  %v1999_v49 = vadd.f32 %v1992_v44, %v1788_v53  ;;  %v2604_v44 = vld [vmem:[%s3833_s9 + $0x1f8] sm:$0xff] }
 0x565   : > { %v1923_v54 = vpop.f32.mrf.mxu0  ;;  %v1994_v24 = vpop.f32.mrf.mxu1 }
 0x566   : > { %v3119_v59 = vmul.f32 -1.442695, %v1997_v48  ;;  %v1998_v57 = vadd.f32 %v1923_v54, %v1787_v46  ;;  %v2000_v42 = vadd.f32 %v1994_v24, %v1789_v51  ;;  %v2601_v24 = vld [vmem:[%s3833_s9 + $0x1e0] sm:$0xff]  ;;  %v2603_v51 = vld [vmem:[%s3833_s9 + $0x1f0] sm:$0xff] }
 0x568   : > { %3318 = vpow2.f32 %v3119_v59  ;;  %v3120_v0 = vmul.f32 -1.442695, %v1998_v57  ;;  %v3121_v43 = vmul.f32 -1.442695, %v2000_v42 }
 0x56a   : > { %3320 = vpow2.f32 %v3120_v0 }
 0x56b   : > { %3322 = vpow2.f32 %v3121_v43  ;;  %v2602_v43 = vld [vmem:[%s3833_s9 + $0x1e8] sm:$0xff] }
 0x575   : > { %v3319_v50 = vpop.eup %3318 }
 0x576   : > { %v2004_v47 = vadd.f32 1.0, %v3319_v50 }
 0x577   : > { %v3321_v1 = vpop.eup %3320 }
 0x578   : > { %3324 = vrcp.f32 %v2004_v47  ;;  %v2010_v45 = vadd.f32 1.0, %v3321_v1  ;;  %v3323_v59 = vpop.eup %3322 }
 0x579   : > { %3326 = vtanh.f32 %v1999_v49  ;;  %v2017_v60 = vadd.f32 1.0, %v3323_v59  ;;  %v2600_v59 = vld [vmem:[%s3833_s9 + $0x1d8] sm:$0xff] }
 0x57a   : > { %3328 = vrcp.f32 %v2010_v45  ;;  %v2598_v45 = vld [vmem:[%s3833_s9 + $0x1c8] sm:$0xff] }
 0x57b   : > { %3330 = vrcp.f32 %v2017_v60  ;;  %v2596_v60 = vld [vmem:[%s3833_s9 + $0x1b8] sm:$0xff] }
 0x585   : > { %v3325_v54 = vpop.eup %3324 }
 0x586   : > { %v3327_v46 = vpop.eup %3326 }
 0x587   : > { %v3329_v0 = vpop.eup %3328  ;;  %v2022_v48 = vmul.f32 %v3327_v46, %v3325_v54  ;;  %v2597_v54 = vld [vmem:[%s3833_s9 + $0x1c0] sm:$0xff]  ;;  %v2599_v46 = vld [vmem:[%s3833_s9 + $0x1d0] sm:$0xff] }
 0x588   : > { %v2021_v42 = vmul.f32 %v3329_v0, %v4721_v52  ;;  %v3331_v50 = vpop.eup %3330  ;;  %v2594_v0 = vld [vmem:[%s3833_s9 + $0x1a8] sm:$0xff] }
 0x58a   : > { %v4798_v57 = vadd.f32 %v2022_v48, %v2021_v42  ;;  %v2593_v48 = vld [vmem:[%s3833_s9 + $0x1a0] sm:$0xff]  ;;  %v2595_v42 = vld [vmem:[%s3833_s9 + $0x1b0] sm:$0xff] }
 0x58c   : > { %3332 = vtanh.f32 %v4798_v57 }
 0x599   : > { %v3333_v47 = vpop.eup %3332 }
 0x59a   : > { %v2025_v1 = vmul.f32 %v3333_v47, %v3331_v50  ;;  %v2592_v50 = vld [vmem:[%s3833_s9 + $0x198] sm:$0xff]  ;;  %v2589_v47 = vld [vmem:[%s3833_s9 + $0x180] sm:$0xff] }
 0x59c   : > { %2030 = vst [vmem:[%s2029_s26] sm:$0xff] %v2025_v1  ;;  %2171 = vmatmul.mubr.f32.vlgmr.msra.gmra.mxu0 %v2025_v1  ;;  %2242 = vmatmul.mubr.f32.vlgmr.msra.gmra.mxu1 %v2025_v1  ;;  %v2591_v1 = vld [vmem:[%s3833_s9 + $0x190] sm:$0xff]  ;;  %s2809_s26 = sshll.u32 %s4297_s17, 4  ;;  %s4958_s26 = int_to_ptr.vmem [resolvable:$true] %s2809_s26 }
 0x59d   : > { %2357 = vmatpush1.msra.mxu0 %v4389_v61  ;;  %2428 = vmatpush1.msra.mxu1 %v4392_v62  ;;  %v5230_v61 = vld [vmem:[#allocation28_spill] sm:$0xff]  ;;  %v5231_v62 = vld [vmem:[#allocation25_spill] sm:$0xff] }
 0x59e   : > { %2358 = vmatprep.subr.mxu0 %v4397_v12  ;;  %2429 = vmatprep.subr.mxu1 %v4400_v19  ;;  %v5232_v12 = vld [vmem:[#allocation30_spill] sm:$0xff]  ;;  %v5233_v19 = vld [vmem:[#allocation27_spill] sm:$0xff] }
 0x59f   : > { %2359 = vmatpush1.msra.mxu0 %v4405_v2  ;;  %2430 = vmatpush1.msra.mxu1 %v4408_v63  ;;  %v5234_v2 = vld [vmem:[#allocation32_spill] sm:$0xff]  ;;  %v5235_v63 = vld [vmem:[#allocation29_spill] sm:$0xff] }
 0x5a0   : > { %2360 = vmatprep.subr.mxu0 %v4413_v3  ;;  %2431 = vmatprep.subr.mxu1 %v4416_v4  ;;  %v5236_v3 = vld [vmem:[#allocation34_spill] sm:$0xff]  ;;  %v5237_v4 = vld [vmem:[#allocation31_spill] sm:$0xff] }
 0x5a1   : > { %2361 = vmatpush1.msra.mxu0 %v4421_v55  ;;  %2432 = vmatpush1.msra.mxu1 %v4424_v28  ;;  %v5238_v55 = vld [vmem:[#allocation36_spill] sm:$0xff]  ;;  %v5239_v28 = vld [vmem:[#allocation33_spill] sm:$0xff] }
 0x5a2   : > { %2362 = vmatprep.subr.mxu0 %v4429_v37  ;;  %2433 = vmatprep.subr.mxu1 %v4432_v58  ;;  %v5240_v37 = vld [vmem:[#allocation38_spill] sm:$0xff]  ;;  %v5241_v58 = vld [vmem:[#allocation35_spill] sm:$0xff] }
 0x5a3   : > { %2363 = vmatpush1.msra.mxu0 %v4437_v7  ;;  %2434 = vmatpush1.msra.mxu1 %v4440_v56  ;;  %v5242_v7 = vld [vmem:[#allocation39_spill] sm:$0xff]  ;;  %v5243_v56 = vld [vmem:[#allocation37_spill] sm:$0xff] }
 0x5a4   : > { %2364 = vmatprep.subr.mxu0 %v4445_v5  ;;  %2435 = vmatprep.subr.mxu1 %v4448_v6  ;;  %v5244_v5 = vld [vmem:[#allocation40_spill] sm:$0xff]  ;;  %v5245_v6 = vld [vmem:[#allocation41_spill] sm:$0xff] }
 0x5a5   : > { %2365 = vmatpush1.msra.mxu0 %v4453_v8  ;;  %2436 = vmatpush1.msra.mxu1 %v4456_v9  ;;  %v5246_v8 = vmov 0.0   ;;  %v5247_v9 = vld [vmem:[#allocation42_spill] sm:$0xff] }
 0x5a6   : > { %2366 = vmatprep.subr.mxu0 %v4461_v10  ;;  %2437 = vmatprep.subr.mxu1 %v4464_v11  ;;  %v2037_v10 = vld [vmem:[%s2036_s20] sm:$0xff] }
 0x5a7   : > { %2367 = vmatpush1.msra.mxu0 %v4469_v13  ;;  %2438 = vmatpush1.msra.mxu1 %v4472_v14  ;;  %v2038_v14 = vld [vmem:[%s2036_s20 + $0x8] sm:$0xff] }
 0x5a8   : > { %2368 = vmatprep.subr.mxu0 %v4477_v15  ;;  %2439 = vmatprep.subr.mxu1 %v4480_v16 }
 0x5a9   : > { %2369 = vmatpush1.msra.mxu0 %v4483_v17  ;;  %2440 = vmatpush1.msra.mxu1 %v4488_v18 }
 0x5aa   : > { %2370 = vmatprep.subr.mxu0 %v4491_v20  ;;  %2441 = vmatprep.subr.mxu1 %v4494_v21 }
 0x5ab   : > { %2371 = vmatpush1.msra.mxu0 %v4499_v22  ;;  %2442 = vmatpush1.msra.mxu1 %v4502_v23  ;;  %v2040_v22 = vld [vmem:[%s2036_s20 + $0x18] sm:$0xff] }
 0x5ac   : > { %2372 = vmatprep.subr.mxu0 %v4505_v25  ;;  %2443 = vmatprep.subr.mxu1 %v4510_v26  ;;  %v2039_v26 = vld [vmem:[%s2036_s20 + $0x10] sm:$0xff]  ;;  %s4963_s20 = scalar_lea.hbm %s5043_s4, %s3144_s29 }
 0x5ad   : > { %2373 = vmatpush1.msra.mxu0 %v4513_v27  ;;  %2444 = vmatpush1.msra.mxu1 %v4516_v29 }
 0x5ae   : > { %2374 = vmatprep.subr.mxu0 %v4521_v30  ;;  %2445 = vmatprep.subr.mxu1 %v4524_v31 }
 0x5af   : > { %2375 = vmatpush1.msra.mxu0 %v4529_v32  ;;  %2446 = vmatpush1.msra.mxu1 %v4532_v33 }
 0x5b0   : > { %2376 = vmatprep.subr.mxu0 %v4537_v34  ;;  %2447 = vmatprep.subr.mxu1 %v4540_v35 }
 0x5b1   : > { %2377 = vmatpush1.msra.mxu0 %v4545_v36  ;;  %2448 = vmatpush1.msra.mxu1 %v4548_v38 }
 0x5b2   : > { %2378 = vmatprep.subr.mxu0 %v4553_v39  ;;  %2449 = vmatprep.subr.mxu1 %v4556_v40 }
 0x5b3   : > { %2379 = vmatpush1.msra.mxu0 %v4561_v41  ;;  %2450 = vmatpush1.msra.mxu1 %v5230_v61  ;;  %v2586_v61 = vld [vmem:[%s3833_s9 + $0x168] sm:$0xff] }
 0x5b4   : > { %2380 = vmatprep.subr.mxu0 %v5231_v62  ;;  %2451 = vmatprep.subr.mxu1 %v5232_v12  ;;  %v2588_v62 = vld [vmem:[%s3833_s9 + $0x178] sm:$0xff]  ;;  %v2585_v12 = vld [vmem:[%s3833_s9 + $0x160] sm:$0xff] }
 0x5b5   : > { %2381 = vmatpush1.msra.mxu0 %v5233_v19  ;;  %2452 = vmatpush1.msra.mxu1 %v5234_v2  ;;  %v2587_v19 = vld [vmem:[%s3833_s9 + $0x170] sm:$0xff]  ;;  %v2582_v2 = vld [vmem:[%s3833_s9 + $0x148] sm:$0xff] }
 0x5b6   : > { %2382 = vmatprep.subr.mxu0 %v5235_v63  ;;  %2453 = vmatprep.subr.mxu1 %v5236_v3  ;;  %v2584_v63 = vld [vmem:[%s3833_s9 + $0x158] sm:$0xff]  ;;  %v2581_v3 = vld [vmem:[%s3833_s9 + $0x140] sm:$0xff] }
 0x5b7   : > { %2383 = vmatpush1.msra.mxu0 %v5237_v4  ;;  %2454 = vmatpush1.msra.mxu1 %v5238_v55  ;;  %v2583_v4 = vld [vmem:[%s3833_s9 + $0x150] sm:$0xff]  ;;  %v2578_v55 = vld [vmem:[%s3833_s9 + $0x128] sm:$0xff] }
 0x5b8   : > { %2384 = vmatprep.subr.mxu0 %v5239_v28  ;;  %2455 = vmatprep.subr.mxu1 %v5240_v37  ;;  %v2580_v28 = vld [vmem:[%s3833_s9 + $0x138] sm:$0xff]  ;;  %v2577_v37 = vld [vmem:[%s3833_s9 + $0x120] sm:$0xff] }
 0x5b9   : > { %2385 = vmatpush1.msra.mxu0 %v5241_v58  ;;  %2456 = vmatpush1.msra.mxu1 %v5242_v7  ;;  %v2579_v58 = vld [vmem:[%s3833_s9 + $0x130] sm:$0xff]  ;;  %v2574_v7 = vld [vmem:[%s3833_s9 + $0x108] sm:$0xff] }
 0x5ba   : > { %2386 = vmatprep.subr.mxu0 %v5243_v56  ;;  %2457 = vmatprep.subr.mxu1 %v5244_v5  ;;  %v2576_v56 = vld [vmem:[%s3833_s9 + $0x118] sm:$0xff]  ;;  %v2573_v5 = vld [vmem:[%s3833_s9 + $0x100] sm:$0xff] }
 0x5bb   : > { %2387 = vmatpush1.msra.mxu0 %v5245_v6  ;;  %2420 = vmatprep.mubr.f32.mxu0 %v5246_v8  ;;  %v2575_v6 = vld [vmem:[%s3833_s9 + $0x110] sm:$0xff] }
 0x5bc   : > { %2458 = vmatpush1.msra.mxu1 %v5247_v9  ;;  %2491 = vmatprep.mubr.f32.mxu1 %v5246_v8  ;;  %v2572_v9 = vld [vmem:[%s3833_s9 + $0xf8] sm:$0xff] }
 0x5bd   : > { %2605 = vmatprep.subr.mxu0 %v2602_v43  ;;  %2676 = vmatprep.subr.mxu1 %v2604_v44  ;;  %v2543_v43 = vld [vmem:[%s3833_s9 + $0x10] sm:$0xff]  ;;  %v2287_v44 = vld [vmem:[%s2286_s12] sm:$0xff] }
 0x65c   : > { %v2172_v11 = vpop.f32.mrf.mxu0  ;;  %v2243_v18 = vpop.f32.mrf.mxu1 }
 0x65d   : > { %v2248_v13 = vadd.f32 %v2172_v11, %v2037_v10  ;;  %v2250_v29 = vadd.f32 %v2243_v18, %v2039_v26  ;;  %v2569_v10 = vld [vmem:[%s3833_s9 + $0xe0] sm:$0xff]  ;;  %v2571_v11 = vld [vmem:[%s3833_s9 + $0xf0] sm:$0xff]  ;;  %v2564_v18 = vld [vmem:[%s3833_s9 + $0xb8] sm:$0xff] }
 0x65e   : > { %v2174_v15 = vpop.f32.mrf.mxu0  ;;  %v2245_v21 = vpop.f32.mrf.mxu1  ;;  %v2559_v26 = vld [vmem:[%s3833_s9 + $0x90] sm:$0xff] }
 0x65f   : > { %v3126_v16 = vmul.f32 -1.442695, %v2248_v13  ;;  %v2249_v17 = vadd.f32 %v2174_v15, %v2038_v14  ;;  %v2251_v23 = vadd.f32 %v2245_v21, %v2040_v22  ;;  %v2566_v13 = vld [vmem:[%s3833_s9 + $0xc8] sm:$0xff]  ;;  %v2568_v14 = vld [vmem:[%s3833_s9 + $0xd8] sm:$0xff]  ;;  %v2565_v15 = vld [vmem:[%s3833_s9 + $0xc0] sm:$0xff] }
 0x660   : > { %v2563_v21 = vld [vmem:[%s3833_s9 + $0xb0] sm:$0xff]  ;;  %v2558_v22 = vld [vmem:[%s3833_s9 + $0x88] sm:$0xff] }
 0x661   : > { %3334 = vpow2.f32 %v3126_v16  ;;  %v3127_v20 = vmul.f32 -1.442695, %v2249_v17  ;;  %v3128_v25 = vmul.f32 -1.442695, %v2251_v23  ;;  %v2567_v16 = vld [vmem:[%s3833_s9 + $0xd0] sm:$0xff]  ;;  %v2562_v17 = vld [vmem:[%s3833_s9 + $0xa8] sm:$0xff] }
 0x662   : > { %v2560_v23 = vld [vmem:[%s3833_s9 + $0x98] sm:$0xff] }
 0x663   : > { %3336 = vpow2.f32 %v3127_v20  ;;  %v2561_v20 = vld [vmem:[%s3833_s9 + $0xa0] sm:$0xff] }
 0x664   : > { %3338 = vpow2.f32 %v3128_v25  ;;  %v2557_v25 = vld [vmem:[%s3833_s9 + $0x80] sm:$0xff] }
 0x66e   : > { %v3335_v27 = vpop.eup %3334 }
 0x66f   : > { %v2255_v30 = vadd.f32 1.0, %v3335_v27  ;;  %v2554_v27 = vld [vmem:[%s3833_s9 + $0x68] sm:$0xff] }
 0x670   : > { %v3337_v31 = vpop.eup %3336 }
 0x671   : > { %3340 = vrcp.f32 %v2255_v30  ;;  %v2261_v32 = vadd.f32 1.0, %v3337_v31  ;;  %v3339_v33 = vpop.eup %3338  ;;  %v2553_v30 = vld [vmem:[%s3833_s9 + $0x60] sm:$0xff]  ;;  %v2555_v31 = vld [vmem:[%s3833_s9 + $0x70] sm:$0xff] }
 0x672   : > { %3342 = vtanh.f32 %v2250_v29  ;;  %v2268_v38 = vadd.f32 1.0, %v3339_v33  ;;  %v2556_v29 = vld [vmem:[%s3833_s9 + $0x78] sm:$0xff] }
 0x673   : > { %3344 = vrcp.f32 %v2261_v32  ;;  %v2550_v32 = vld [vmem:[%s3833_s9 + $0x48] sm:$0xff]  ;;  %v2552_v33 = vld [vmem:[%s3833_s9 + $0x58] sm:$0xff] }
 0x674   : > { %3346 = vrcp.f32 %v2268_v38  ;;  %v2548_v38 = vld [vmem:[%s3833_s9 + $0x38] sm:$0xff] }
 0x67e   : > { %v3341_v34 = vpop.eup %3340 }
 0x67f   : > { %v3343_v35 = vpop.eup %3342 }
 0x680   : > { %v3345_v36 = vpop.eup %3344  ;;  %v2273_v39 = vmul.f32 %v3343_v35, %v3341_v34  ;;  %v2549_v34 = vld [vmem:[%s3833_s9 + $0x40] sm:$0xff]  ;;  %v2551_v35 = vld [vmem:[%s3833_s9 + $0x50] sm:$0xff] }
 0x681   : > { %v2272_v40 = vmul.f32 %v3345_v36, %v4798_v57  ;;  %v3347_v52 = vpop.eup %3346  ;;  %v2590_v57 = vld [vmem:[%s3833_s9 + $0x188] sm:$0xff] }
 0x682   : > { %v2546_v36 = vld [vmem:[%s3833_s9 + $0x28] sm:$0xff] }
 0x683   : > { %v4873_v41 = vadd.f32 %v2273_v39, %v2272_v40  ;;  %v2545_v39 = vld [vmem:[%s3833_s9 + $0x20] sm:$0xff]  ;;  %v2547_v40 = vld [vmem:[%s3833_s9 + $0x30] sm:$0xff] }
 0x685   : > { %3348 = vtanh.f32 %v4873_v41 }
 0x692   : > { %v3349_v49 = vpop.eup %3348 }
 0x693   : > { %v2276_v53 = vmul.f32 %v3349_v49, %v3347_v52  ;;  %v2542_v52 = vld [vmem:[%s3833_s9 + $0x8] sm:$0xff]  ;;  %v2544_v49 = vld [vmem:[%s3833_s9 + $0x18] sm:$0xff] }
 0x695   : > { %2281 = vst [vmem:[%s2280_s16] sm:$0xff] %v2276_v53  ;;  %2421 = vmatmul.mubr.f32.vlgmr.msra.gmra.mxu0 %v2276_v53  ;;  %2492 = vmatmul.mubr.f32.vlgmr.msra.gmra.mxu1 %v2276_v53  ;;  %v2541_v53 = vld [vmem:[%s3833_s9] sm:$0xff]  ;;  %s2825_s16 = sshll.u32 %s407_s7, 4  ;;  %s4970_s16 = int_to_ptr.vmem [resolvable:$true] %s2825_s16 }
 0x696   : > { %2669 = vmatprep.mubr.f32.mxu0 %v5246_v8  ;;  %2740 = vmatprep.mubr.f32.mxu1 %v5246_v8  ;;  %v2570_v8 = vld [vmem:[%s3833_s9 + $0xe8] sm:$0xff]  ;;  %s3135_s9 = sshll.u32 %s4946_s28, 3  ;;  %s3492_s28 = scalar_lea.vmem %s4958_s26, 1024 }
 0x697   : > { %2606 = vmatpush1.msra.mxu0 %v2601_v24  ;;  %2677 = vmatpush1.msra.mxu1 %v2603_v51  ;;  %s2530_s1 = scalar_lea.vmem %s4297_s17, %s3135_s9 [#allocation13]  ;;  %s2784_s17 = scalar_lea.sflag [#allocation7], %s3823_s2 }
 0x698   : > { %2607 = vmatprep.subr.mxu0 %v2598_v45  ;;  %2678 = vmatprep.subr.mxu1 %v2600_v59  ;;  %v2288_v45 = vld [vmem:[%s2286_s12 + $0x8] sm:$0xff]  ;;  %p3493_p8 = scmp.ne.s32.totalorder %s4958_s26, %s3492_s28 }
 0x699   : > { %2608 = vmatpush1.msra.mxu0 %v2597_v54  ;;  %2679 = vmatpush1.msra.mxu1 %v2599_v46 }
 0x69a   : > { %2609 = vmatprep.subr.mxu0 %v2594_v0  ;;  %2680 = vmatprep.subr.mxu1 %v2596_v60  ;;  %p3494_p3 = pnand %p3493_p8, %p5248_p0 }
 0x69b   : > { %2610 = vmatpush1.msra.mxu0 %v2593_v48  ;;  %2681 = vmatpush1.msra.mxu1 %v2595_v42  ;;  %v2290_v42 = vld [vmem:[%s2286_s12 + $0x18] sm:$0xff] }
 0x69c   : > { %2611 = vmatprep.subr.mxu0 %v2590_v57  ;;  %2682 = vmatprep.subr.mxu1 %v2592_v50  ;;  %p3495_p10 = pneg %p3494_p3 }
 0x69d   : > { %2612 = vmatpush1.msra.mxu0 %v2589_v47  ;;  %2683 = vmatpush1.msra.mxu1 %v2591_v1  ;;  %v2289_v47 = vld [vmem:[%s2286_s12 + $0x10] sm:$0xff]  ;;  %s3496_s12 = sshll.u32 %s3621_s11, 4  ;;  %s3497_s12 = int_to_ptr.vmem [resolvable:$false] %s3496_s12 }
 0x69e   : > { %2613 = vmatprep.subr.mxu0 %v2586_v61  ;;  %2684 = vmatprep.subr.mxu1 %v2588_v62  ;;  %s3498_s9 = scalar_lea.vmem %s3497_s12, 2048  ;;  %p3499_p6 = scmp.lt.s32.totalorder %s4958_s26, %s3497_s12 }
 0x69f   : > { %2614 = vmatpush1.msra.mxu0 %v2585_v12  ;;  %2685 = vmatpush1.msra.mxu1 %v2587_v19  ;;  %p3500_p5 = scmp.lt.s32.totalorder %s3498_s9, %s3492_s28 }
 0x6a0   : > { %2615 = vmatprep.subr.mxu0 %v2582_v2  ;;  %2686 = vmatprep.subr.mxu1 %v2584_v63 }
 0x6a1   : > { %2616 = vmatpush1.msra.mxu0 %v2581_v3  ;;  %2687 = vmatpush1.msra.mxu1 %v2583_v4  ;;  %p3501_p12 = por %p3500_p5, %p3499_p6 }
 0x6a2   : > { %2617 = vmatprep.subr.mxu0 %v2578_v55  ;;  %2688 = vmatprep.subr.mxu1 %v2580_v28 }
 0x6a3   : > { %2618 = vmatpush1.msra.mxu0 %v2577_v37  ;;  %2689 = vmatpush1.msra.mxu1 %v2579_v58  ;;  %p3502_p2 = pnand %p3501_p12, %p3495_p10 }
 0x6a4   : > { %2619 = vmatprep.subr.mxu0 %v2574_v7  ;;  %2690 = vmatprep.subr.mxu1 %v2576_v56 }
 0x6a5   : > { %2620 = vmatpush1.msra.mxu0 %v2573_v5  ;;  %2691 = vmatpush1.msra.mxu1 %v2575_v6  ;;  %v2536_v6 = vld [vmem:[%s2535_s10] sm:$0xff] }
 0x6a6   : > { %2621 = vmatprep.subr.mxu0 %v2570_v8  ;;  %2692 = vmatprep.subr.mxu1 %v2572_v9 }
 0x6a7   : > { %2622 = vmatpush1.msra.mxu0 %v2569_v10  ;;  %2693 = vmatpush1.msra.mxu1 %v2571_v11  ;;  %v2537_v10 = vld [vmem:[%s2535_s10 + $0x8] sm:$0xff] }
 0x6a8   : > { %2623 = vmatprep.subr.mxu0 %v2566_v13  ;;  %2694 = vmatprep.subr.mxu1 %v2568_v14 }
 0x6a9   : > { %2624 = vmatpush1.msra.mxu0 %v2565_v15  ;;  %2695 = vmatpush1.msra.mxu1 %v2567_v16 }
 0x6aa   : > { %2625 = vmatprep.subr.mxu0 %v2562_v17  ;;  %2696 = vmatprep.subr.mxu1 %v2564_v18  ;;  %v2539_v17 = vld [vmem:[%s2535_s10 + $0x18] sm:$0xff] }
 0x6ab   : > { %2626 = vmatpush1.msra.mxu0 %v2561_v20  ;;  %2697 = vmatpush1.msra.mxu1 %v2563_v21  ;;  %v2538_v21 = vld [vmem:[%s2535_s10 + $0x10] sm:$0xff] }
 0x6ac   : > { %2627 = vmatprep.subr.mxu0 %v2558_v22  ;;  %2698 = vmatprep.subr.mxu1 %v2560_v23 }
 0x6ad   : > { %2628 = vmatpush1.msra.mxu0 %v2557_v25  ;;  %2699 = vmatpush1.msra.mxu1 %v2559_v26 }
 0x6ae   : > { %2629 = vmatprep.subr.mxu0 %v2554_v27  ;;  %2700 = vmatprep.subr.mxu1 %v2556_v29 }
 0x6af   : > { %2630 = vmatpush1.msra.mxu0 %v2553_v30  ;;  %2701 = vmatpush1.msra.mxu1 %v2555_v31 }
 0x6b0   : > { %2631 = vmatprep.subr.mxu0 %v2550_v32  ;;  %2702 = vmatprep.subr.mxu1 %v2552_v33 }
 0x6b1   : > { %2632 = vmatpush1.msra.mxu0 %v2549_v34  ;;  %2703 = vmatpush1.msra.mxu1 %v2551_v35 }
 0x6b2   : > { %2633 = vmatprep.subr.mxu0 %v2546_v36  ;;  %2704 = vmatprep.subr.mxu1 %v2548_v38 }
 0x6b3   : > { %2634 = vmatpush1.msra.mxu0 %v2545_v39  ;;  %2705 = vmatpush1.msra.mxu1 %v2547_v40 }
 0x6b4   : > { %2635 = vmatprep.subr.mxu0 %v2542_v52  ;;  %2706 = vmatprep.subr.mxu1 %v2544_v49 }
 0x6b5   : > { %2636 = vmatpush1.msra.mxu0 %v2541_v53  ;;  %2707 = vmatpush1.msra.mxu1 %v2543_v43 }
 0x755   : > { %v2422_v24 = vpop.f32.mrf.mxu0  ;;  %v2493_v0 = vpop.f32.mrf.mxu1 }
 0x756   : > { %v2498_v51 = vadd.f32 %v2422_v24, %v2287_v44  ;;  %v2500_v61 = vadd.f32 %v2493_v0, %v2289_v47 }
 0x757   : > { %v2424_v59 = vpop.f32.mrf.mxu0  ;;  %v2495_v48 = vpop.f32.mrf.mxu1 }
 0x758   : > { %v3132_v54 = vmul.f32 -1.442695, %v2498_v51  ;;  %v2499_v46 = vadd.f32 %v2424_v59, %v2288_v45  ;;  %v2501_v57 = vadd.f32 %v2495_v48, %v2290_v42 }
 0x75a   : > { %3350 = vpow2.f32 %v3132_v54  ;;  %v3133_v60 = vmul.f32 -1.442695, %v2499_v46  ;;  %v3134_v50 = vmul.f32 -1.442695, %v2501_v57 }
 0x75c   : > { %3352 = vpow2.f32 %v3133_v60 }
 0x75d   : > { %3354 = vpow2.f32 %v3134_v50 }
 0x767   : > { %v3351_v1 = vpop.eup %3350 }
 0x768   : > { %v2505_v62 = vadd.f32 1.0, %v3351_v1 }
 0x769   : > { %v3353_v12 = vpop.eup %3352 }
 0x76a   : > { %3356 = vrcp.f32 %v2505_v62  ;;  %v2511_v19 = vadd.f32 1.0, %v3353_v12  ;;  %v3355_v2 = vpop.eup %3354 }
 0x76b   : > { %3358 = vtanh.f32 %v2500_v61  ;;  %v2518_v55 = vadd.f32 1.0, %v3355_v2 }
 0x76c   : > { %3360 = vrcp.f32 %v2511_v19 }
 0x76d   : > { %3362 = vrcp.f32 %v2518_v55 }
 0x777   : > { %v3357_v63 = vpop.eup %3356 }
 0x778   : > { %v3359_v3 = vpop.eup %3358 }
 0x779   : > { %v3361_v4 = vpop.eup %3360  ;;  %v2523_v28 = vmul.f32 %v3359_v3, %v3357_v63 }
 0x77a   : > { %v2522_v37 = vmul.f32 %v3361_v4, %v4873_v41  ;;  %v3363_v7 = vpop.eup %3362 }
 0x77c   : > { %v2524_v58 = vadd.f32 %v2523_v28, %v2522_v37 }
 0x77e   : > { %3364 = vtanh.f32 %v2524_v58 }
 0x78b   : > { %v3365_v56 = vpop.eup %3364 }
 0x78c   : > { %v2526_v5 = vmul.f32 %v3365_v56, %v3363_v7 }
 0x78e   : > { %2531 = vst [vmem:[%s2530_s1] sm:$0xff] %v2526_v5  ;;  %2670 = vmatmul.mubr.f32.vlgmr.msra.gmra.mxu0 %v2526_v5  ;;  %2741 = vmatmul.mubr.f32.vlgmr.msra.gmra.mxu1 %v2526_v5 }
 0x84e   : > { %v2671_v8 = vpop.f32.mrf.mxu0  ;;  %v2742_v14 = vpop.f32.mrf.mxu1 }
 0x84f   : > { %v2747_v9 = vadd.f32 %v2671_v8, %v2536_v6  ;;  %v2749_v23 = vadd.f32 %v2742_v14, %v2538_v21 }
 0x850   : > { %v2673_v11 = vpop.f32.mrf.mxu0  ;;  %v2744_v16 = vpop.f32.mrf.mxu1 }
 0x851   : > { %v3138_v13 = vmul.f32 -1.442695, %v2747_v9  ;;  %v2748_v41 = vadd.f32 %v2673_v11, %v2537_v10  ;;  %v2750_v18 = vadd.f32 %v2744_v16, %v2539_v17 }
 0x853   : > { %3366 = vpow2.f32 %v3138_v13  ;;  %v3139_v15 = vmul.f32 -1.442695, %v2748_v41  ;;  %v3140_v20 = vmul.f32 -1.442695, %v2750_v18 }
 0x855   : > { %3368 = vpow2.f32 %v3139_v15 }
 0x856   : > { %3370 = vpow2.f32 %v3140_v20 }
 0x860   : > { %v3367_v22 = vpop.eup %3366 }
 0x861   : > { %v2754_v25 = vadd.f32 1.0, %v3367_v22 }
 0x862   : > { %v3369_v26 = vpop.eup %3368 }
 0x863   : > { %3372 = vrcp.f32 %v2754_v25  ;;  %v2760_v27 = vadd.f32 1.0, %v3369_v26  ;;  %v3371_v29 = vpop.eup %3370 }
 0x864   : > { %3374 = vtanh.f32 %v2749_v23  ;;  %v2767_v33 = vadd.f32 1.0, %v3371_v29 }
 0x865   : > { %3376 = vrcp.f32 %v2760_v27 }
 0x866   : > { %3378 = vrcp.f32 %v2767_v33 }
 0x870   : > { %v3373_v30 = vpop.eup %3372 }
 0x871   : > { %v3375_v31 = vpop.eup %3374 }
 0x872   : > { %v3377_v32 = vpop.eup %3376  ;;  %v2772_v34 = vmul.f32 %v3375_v31, %v3373_v30 }
 0x873   : > { %v2771_v35 = vmul.f32 %v3377_v32, %v2524_v58  ;;  %v3379_v38 = vpop.eup %3378 }
 0x875   : > { %v2773_v36 = vadd.f32 %v2772_v34, %v2771_v35 }
 0x877   : > { %3380 = vtanh.f32 %v2773_v36 }
 0x884   : > { %v3381_v39 = vpop.eup %3380 }
 0x885   : > { %v2775_v40 = vmul.f32 %v3381_v39, %v3379_v38 }
 0x887   : > { %2780 = vst [vmem:[%s2779_s24] sm:$0xff] %v2775_v40  ;;  %2782 = vst [vmem:[%s407_s7] sm:$0xff] %v2775_v40 }
 0x888   : > { %3505 = shalt.err (!%p3502_p2)
}
 0x889   : > { %s3506_s1 = scalar_lea.hbm %s4963_s20, 1024  ;;  %s3510_s27 = scalar_lea.hbm %s5043_s4, 2048 }
 0x88a   : > { %p3507_p13 = scmp.ne.s32.totalorder %s4963_s20, %s3506_s1  ;;  %p3511_p9 = scmp.lt.s32.totalorder %s4963_s20, %s5043_s4 }
 0x88b   : > { %p3512_p11 = scmp.lt.s32.totalorder %s3510_s27, %s3506_s1 }
 0x88c   : > { %p3508_p7 = pnand %p3507_p13, %p5248_p0 }
 0x88d   : > { %p3513_p1 = por %p3512_p11, %p3511_p9 }
 0x88e   : > { %p3509_p4 = pneg %p3508_p7 }
 0x890   : > { %p3514_p8 = pnand %p3513_p1, %p3509_p4 }
 0x892   : > { %3517 = shalt.err (!%p3514_p8)
}
 0x893   : > { %s3622_s24 = smov 128   ;;  %s3623_s30 = smov 256  }
 0x894   : > { %s3624_s15 = smov 8   ;;  %s2789_s7 = scalar_lea.sflag [#allocation15], %s3823_s2 }
 0x895   : > { %3169 = dma.vmem_to_hbm [thread:$0]  (%p5248_p0), %s4958_s26, 1024, %s4963_s20, %s2784_s17, %s3622_s24, %s3623_s30, %s3624_s15  }
 0x896   : > { %s3518_s14 = scalar_lea.vmem %s4970_s16, 128  ;;  %s3625_s13 = smov [#allocation14]  }
 0x897   : > { %p3519_p3 = scmp.ne.s32.totalorder %s4970_s16, %s3518_s14  ;;  %s3522_s28 = sshll.u32 %s3625_s13, 4  ;;  %s3523_s28 = int_to_ptr.vmem [resolvable:$false] %s3522_s28 }
 0x898   : > { %s3524_s11 = scalar_lea.vmem %s3523_s28, 256  ;;  %p3525_p5 = scmp.lt.s32.totalorder %s4970_s16, %s3523_s28 }
 0x899   : > { %p3520_p10 = pnand %p3519_p3, %p5248_p0  ;;  %p3526_p12 = scmp.lt.s32.totalorder %s3524_s11, %s3518_s14 }
 0x89b   : > { %p3521_p6 = pneg %p3520_p10  ;;  %p3527_p2 = por %p3526_p12, %p3525_p5 }
 0x89d   : > { %p3528_p13 = pnand %p3527_p2, %p3521_p6 }
 0x89f   : > { %3531 = shalt.err (!%p3528_p13)
}
 0x8a0   : > { %s3532_s26 = scalar_lea.hbm %s4968_s21, 128  ;;  %s3536_s17 = scalar_lea.hbm %s5044_s5, 256 }
 0x8a1   : > { %p3533_p7 = scmp.ne.s32.totalorder %s4968_s21, %s3532_s26  ;;  %p3537_p11 = scmp.lt.s32.totalorder %s4968_s21, %s5044_s5 }
 0x8a2   : > { %p3538_p1 = scmp.lt.s32.totalorder %s3536_s17, %s3532_s26 }
 0x8a3   : > { %p3534_p4 = pnand %p3533_p7, %p5248_p0 }
 0x8a4   : > { %p3539_p8 = por %p3538_p1, %p3537_p11 }
 0x8a5   : > { %p3535_p9 = pneg %p3534_p4 }
 0x8a7   : > { %p3540_p3 = pnand %p3539_p8, %p3535_p9 }
 0x8a9   : > { %3543 = shalt.err (!%p3540_p3)
}
 0x8aa   : > { %3170 = dma.vmem_to_hbm [thread:$0]  (%p5248_p0), %s4970_s16, 128, %s4968_s21, %s2789_s7  }
 0x8ab PF: > { %s2837_s1 = sand.u32 1, %s3590_s18   ;;  %p5249_p10 = scmp.ne.s32.totalorder %s5122_s8, 0 }
 0x8ac   : > { %p5250_p6 = scmp.ge.s32.totalorder %s3610_s23, 2  ;;  %s2838_s0 = scalar_lea.sflag [#allocation7], %s2837_s1 }
 0x8ae   : > { %p3187_p5 = pnand %p5250_p6, %p5249_p10 }
 0x8b0   : > { %p3188_p12 = pneg %p3187_p5 }
 0x8b2   : > { %3581 = dma.done.wait (%p3188_p12), %s2838_s0, 1024  }
 0x8b3   : > { %3583 = vsyncadd (%p3188_p12), %s2838_s0, 4294966272  ;;  %s2847_s10 = scalar_lea.sflag [#allocation15], %s2837_s1 }
 0x8b4   : > { %3585 = dma.done.wait (%p3188_p12), %s2847_s10, 128  }
 0x8b5   : > { %3587 = vsyncadd (%p3188_p12), %s2847_s10, 4294967168  ;;  %s31_s23 = sadd.s32 1, %s3610_s23   ;;  %s5251_s6 = sld [smem:[#allocation21_spill]] }
 0x8b6   : > { %p28_p2 = scmp.ge.s32.totalorder %s31_s23, 4   ;;  %s5252_s20 = sld [smem:[#allocation23_spill]] }
 0x8b7   : > { %s5253_s16 = sld [smem:[#allocation22_spill]]  ;;  %s5254_s18 = smov %s3594_s19 }
 0x8b8   : > { %s5256_s21 = smov %s3606_s22 }
 0x8b9   :  { %30 = sbr.rel (!%p28_p2) target bundleno = 16 (0x10), region = 155 }
 0x8bb   : > { %s5255_s19 = smov %s5251_s6 }
 0x8bd   : > { %s5257_s22 = smov %s5253_s16 }
 0x8be   :  { %2852 = vsyncpa [#allocation6], 1 }
 0x8bf   :  { %2854 = vsyncpa [#allocation6 + $0x1], 1 }
 0x8c0   :  { %2855 = vsyncpa [#allocation9], 1 }
 0x8c1   :  { %2857 = vsyncpa [#allocation9 + $0x1], 1 }
 0x8c2   :  { %2858 = vsyncpa [#allocation12], 1 }
 0x8c3   :  { %2860 = vsyncpa [#allocation12 + $0x1], 1 }
 0x8c4   :  { %2861 = vsyncpa [#allocation7], 1 }
 0x8c5   :  { %2863 = vsyncpa [#allocation7 + $0x1], 1 }
 0x8c6   :  { %2864 = vsyncpa [#allocation15], 1 }
 0x8c7   :  { %2866 = vsyncpa [#allocation15 + $0x1], 1 }

</bundles_post_ra>
